<compile_context>
chip_gen: v5e
topology: v5e:2x2
jax: 0.10.0
libtpu: 0.0.40
codegen_flags: <defaults>
</compile_context>

<pallas_src>
import functools

import jax
import jax.numpy as jnp
from jax.experimental import pallas as pl
from jax.experimental.pallas import tpu as pltpu

BN_EPS = 1e-5
LANE = 128


def _round_up(v, m):
    return ((v + m - 1) // m) * m


def _pad2(a, rows, cols):
    return jnp.pad(a, ((0, rows - a.shape[0]), (0, cols - a.shape[1])))


def _pick_tile_s(s_pad, n_pad, f_in, e_dim, budget_bytes=12 << 20, max_tile=32):
    """Largest subgraph tile (multiple of 8, divides s_pad, bounded unroll) whose
    per-step live set fits a conservative VMEM budget (safe for v7x 64 MiB VMEM /
    32 MiB scoped default as well as v5e/v6e)."""
    def bytes_needed(ts):
        x_tile = n_pad * ts * f_in * 2            # bf16 X tile (double buffered)
        o_tile = n_pad * ts * e_dim * 2           # bf16 output tile (double buffered)
        interm = n_pad * ts * (f_in + e_dim) * 4  # f32 agg + out values
        fixed = (n_pad * n_pad * 2 + n_pad * e_dim * 4      # A0 + h2
                 + 2 * f_in * e_dim * 2 + n_pad * e_dim * 4)  # weights + psum
        return 2 * x_tile + 2 * o_tile + interm + fixed
    best = 8
    for ts in range(8, min(s_pad, max_tile) + 1, 8):
        if s_pad % ts == 0 and bytes_needed(ts) <= budget_bytes:
            best = ts
    return best


# ----------------------------------------------------------------------------
# Pallas kernels
# ----------------------------------------------------------------------------
def dss_layer_kernel(is_first, write_x, tile_s, num_sub, f_in, *refs):
    """One tile of `tile_s` subgraphs of one graph.

      h1_t  = [A_del(t) @ x_t | x_t] @ W_cat + b      (BN folded, fused projections)
      out_t = relu(h1_t + h2)                         (h2 = shared 'sum' branch)

    A_del(t) is realized WITHOUT building a per-subgraph adjacency, via the
    row-mask identity: mask row t of x_t, do one shared-A matmul for the whole
    tile, mask row t of the result.  Also accumulates sum_t out_t over valid
    subgraphs (input to the next layer's sum branch / the graph readout), so X
    is streamed from HBM exactly once per layer.
    """
    x_ref, a0_ref, h2_ref, w_ref, b_ref = refs[:5]
    o_ref = refs[5] if write_x else None
    p_ref = refs[6] if write_x else refs[5]

    step = pl.program_id(1)                      # subgraph-tile index
    n_pad = a0_ref.shape[0]
    e_dim = h2_ref.shape[1]

    a0 = a0_ref[...]                             # [Np, Np]      bf16
    h2 = h2_ref[...]                             # [Np, Ep]      f32
    w = w_ref[...]                               # [2*Fp, Ep]    bf16
    b = b_ref[...]                               # [1, Ep]       f32
    xv = x_ref[...]                              # [Np, Fp] or [Np, TS*Fp] bf16

    row = jax.lax.broadcasted_iota(jnp.int32, (n_pad, f_in), 0)

    # Mask the deleted-node row of each subgraph's features, then one big matmul.
    xs, masked = [], []
    for t in range(tile_s):
        d = step * tile_s + t                    # deleted node id == subgraph id
        x_t = xv if is_first else xv[:, t * f_in:(t + 1) * f_in]
        xs.append(x_t)
        masked.append(jnp.where(row == d, jnp.zeros_like(x_t), x_t))
    agg2d = jnp.dot(a0, jnp.concatenate(masked, axis=1),
                    preferred_element_type=jnp.float32)          # [Np, TS*Fp] f32

    outs = []
    psum = jnp.zeros((n_pad, e_dim), jnp.float32)
    for t in range(tile_s):
        d = step * tile_s + t
        agg_t = agg2d[:, t * f_in:(t + 1) * f_in]
        agg_t = jnp.where(row == d, jnp.zeros_like(agg_t), agg_t)  # deleted-node row
        cat_t = jnp.concatenate([agg_t.astype(jnp.bfloat16), xs[t]], axis=1)
        h1_t = jnp.dot(cat_t, w, preferred_element_type=jnp.float32) + b
        out_t = jnp.maximum(h1_t + h2, 0.0)                        # [Np, Ep] f32
        if write_x:
            outs.append(out_t.astype(o_ref.dtype))
        # exclude padded subgraphs (d >= true S) from the accumulation
        psum = psum + out_t * (d < num_sub).astype(jnp.float32)

    if write_x:
        o_ref[...] = jnp.concatenate(outs, axis=1)                 # [Np, TS*Ep]
    p_ref[0] = psum


def h2_kernel(inv_s, p_ref, a0_ref, w_ref, b_ref, h2_ref):
    """DSS 'sum' branch: h2 = BN(GraphConv_sum(mean_subgraphs(x), original A)).

    `p_ref` holds per-tile partial subgraph sums from the previous layer
    (or the raw node features at layer 0, where all subgraph copies coincide).
    """
    x_mean = (jnp.sum(p_ref[...], axis=0) * inv_s).astype(jnp.bfloat16)   # [Np, F]
    agg = jnp.dot(a0_ref[...], x_mean, preferred_element_type=jnp.float32)
    cat = jnp.concatenate([agg.astype(jnp.bfloat16), x_mean], axis=1)
    h2_ref[...] = (jnp.dot(cat, w_ref[...], preferred_element_type=jnp.float32)
                   + b_ref[...])


def readout_kernel(num_tasks, n_true, inv_rows,
                   p_ref, w1_ref, b1_ref, w2_ref, b2_ref, o_ref):
    """Graph-class readout from the last layer's partial sums: mean over all
    true subgraph-node rows, MLP, log_softmax (padded task lanes masked)."""
    node_sum = jnp.sum(p_ref[...], axis=0)                          # [Np, Ep]
    nrow = jax.lax.broadcasted_iota(jnp.int32, node_sum.shape, 0)
    node_sum = jnp.where(nrow < n_true, node_sum, 0.0)              # drop padded nodes
    h_graph = jnp.sum(node_sum, axis=0, keepdims=True) * inv_rows   # [1, Ep]

    h = jnp.maximum(jnp.dot(h_graph, w1_ref[...],
                            preferred_element_type=jnp.float32) + b1_ref[...], 0.0)
    logits = jnp.dot(h, w2_ref[...],
                     preferred_element_type=jnp.float32) + b2_ref[...]
    col = jax.lax.broadcasted_iota(jnp.int32, logits.shape, 1)
    logits = jnp.where(col < num_tasks, logits, jnp.float32(-1e30))
    m = jnp.max(logits, axis=-1, keepdims=True)
    z = logits - m
    o_ref[...] = z - jnp.log(jnp.sum(jnp.exp(z), axis=-1, keepdims=True))


# ----------------------------------------------------------------------------
# pallas_call wrappers
# ----------------------------------------------------------------------------
def _h2_call(P, A0, w_s, b_s, *, inv_s):
    B, G, Np, F = P.shape
    Ep = w_s.shape[1]
    return pl.pallas_call(
        functools.partial(h2_kernel, inv_s),
        grid=(B,),
        in_specs=[
            pl.BlockSpec((None, G, Np, F), lambda b: (b, 0, 0, 0)),
            pl.BlockSpec((None, Np, Np), lambda b: (b, 0, 0)),
            pl.BlockSpec((2 * F, Ep), lambda b: (0, 0)),
            pl.BlockSpec((1, Ep), lambda b: (0, 0)),
        ],
        out_specs=pl.BlockSpec((None, Np, Ep), lambda b: (b, 0, 0)),
        out_shape=jax.ShapeDtypeStruct((B, Np, Ep), jnp.float32),
        compiler_params=pltpu.CompilerParams(dimension_semantics=("parallel",)),
    )(P, A0, w_s, b_s)


def _dss_layer_call(X_in, A0, h2, w, b, *, is_first, write_x, tile_s, num_sub):
    B, Np, _ = A0.shape
    Ep = h2.shape[-1]
    Fp = w.shape[0] // 2
    Sp = Np                                   # NodeDeleted: padded S == padded N
    G = Sp // tile_s
    kernel = functools.partial(dss_layer_kernel, is_first, write_x,
                               tile_s, num_sub, Fp)

    if is_first:
        x_spec = pl.BlockSpec((None, Np, Fp), lambda bb, i: (bb, 0, 0))
    else:
        x_spec = pl.BlockSpec((None, Np, tile_s * Fp), lambda bb, i: (bb, 0, i))
    in_specs = [
        x_spec,
        pl.BlockSpec((None, Np, Np), lambda bb, i: (bb, 0, 0)),
        pl.BlockSpec((None, Np, Ep), lambda bb, i: (bb, 0, 0)),
        pl.BlockSpec((2 * Fp, Ep), lambda bb, i: (0, 0)),
        pl.BlockSpec((1, Ep), lambda bb, i: (0, 0)),
    ]
    out_shape, out_specs = [], []
    if write_x:
        out_shape.append(jax.ShapeDtypeStruct((B, Np, Sp * Ep), jnp.bfloat16))
        out_specs.append(pl.BlockSpec((None, Np, tile_s * Ep),
                                      lambda bb, i: (bb, 0, i)))
    out_shape.append(jax.ShapeDtypeStruct((B, G, Np, Ep), jnp.float32))
    out_specs.append(pl.BlockSpec((None, 1, Np, Ep), lambda bb, i: (bb, i, 0, 0)))

    return pl.pallas_call(
        kernel,
        grid=(B, G),
        in_specs=in_specs,
        out_specs=out_specs,
        out_shape=out_shape,
        compiler_params=pltpu.CompilerParams(
            dimension_semantics=("parallel", "parallel"),
            vmem_limit_bytes=32 * 1024 * 1024),
    )(X_in, A0, h2, w, b)


def _readout_call(P, fp, *, num_tasks, n_true, num_sub):
    B, G, Np, Ep = P.shape
    Hp, Tp = fp["w1"].shape[1], fp["w2"].shape[1]
    kernel = functools.partial(readout_kernel, num_tasks, n_true,
                               1.0 / (num_sub * n_true))
    return pl.pallas_call(
        kernel,
        grid=(B,),
        in_specs=[
            pl.BlockSpec((None, G, Np, Ep), lambda b: (b, 0, 0, 0)),
            pl.BlockSpec((Ep, Hp), lambda b: (0, 0)),
            pl.BlockSpec((1, Hp), lambda b: (0, 0)),
            pl.BlockSpec((Hp, Tp), lambda b: (0, 0)),
            pl.BlockSpec((1, Tp), lambda b: (0, 0)),
        ],
        out_specs=pl.BlockSpec((None, 1, Tp), lambda b: (b, 0, 0)),
        out_shape=jax.ShapeDtypeStruct((B, 1, Tp), jnp.float32),
        compiler_params=pltpu.CompilerParams(dimension_semantics=("parallel",)),
    )(P, fp["w1"], fp["b1"], fp["w2"], fp["b2"])


# ----------------------------------------------------------------------------
# Parameter init, BN-fold / weight-fusion / lane padding
# ----------------------------------------------------------------------------
def init_params(key, num_layers, in_dim, emb_dim, num_tasks):
    params = {"layers": [], "final": {}}
    for i in range(num_layers):
        f = in_dim if i == 0 else emb_dim
        key, *ks = jax.random.split(key, 9)
        params["layers"].append({
            "w_rel":    jax.random.normal(ks[0], (f, emb_dim), jnp.float32) * 0.1,
            "w_root":   jax.random.normal(ks[1], (f, emb_dim), jnp.float32) * 0.1,
            "b_rel":    jax.random.normal(ks[2], (1, emb_dim), jnp.float32) * 0.1,
            "gamma":    1.0 + 0.1 * jax.random.normal(ks[3], (1, emb_dim), jnp.float32),
            "beta":     jax.random.normal(ks[4], (1, emb_dim), jnp.float32) * 0.1,
            "w_rel_s":  jax.random.normal(ks[5], (f, emb_dim), jnp.float32) * 0.1,
            "w_root_s": jax.random.normal(ks[6], (f, emb_dim), jnp.float32) * 0.1,
            "b_rel_s":  jax.random.normal(ks[7], (1, emb_dim), jnp.float32) * 0.1,
            "gamma_s":  jnp.ones((1, emb_dim), jnp.float32),
            "beta_s":   jnp.zeros((1, emb_dim), jnp.float32),
        })
    key, k1, k2, k3, k4 = jax.random.split(key, 5)
    params["final"] = {
        "w1": jax.random.normal(k1, (emb_dim, 2 * emb_dim), jnp.float32) * 0.1,
        "b1": jax.random.normal(k2, (1, 2 * emb_dim), jnp.float32) * 0.1,
        "w2": jax.random.normal(k3, (2 * emb_dim, num_tasks), jnp.float32) * 0.1,
        "b2": jax.random.normal(k4, (1, num_tasks), jnp.float32) * 0.1,
    }
    return params


def prepare_params(params):
    """Fold eval-mode BatchNorm into the GraphConv weights, fuse [W_rel; W_root]
    into one (2*Fp, Ep) matrix, and pad everything to lane-dense dims."""
    inv = 1.0 / jnp.sqrt(jnp.float32(1.0 + BN_EPS))
    layers = []
    for lp in params["layers"]:
        f, e = lp["w_rel"].shape
        Fp, Ep = _round_up(f, LANE), _round_up(e, LANE)

        def fuse(w_rel, w_root, b_rel, gamma, beta):
            scale = gamma * inv
            w_cat = jnp.concatenate(
                [_pad2(w_rel * scale, Fp, Ep), _pad2(w_root * scale, Fp, Ep)], axis=0)
            bias = _pad2(b_rel * scale + beta, 1, Ep)
            return w_cat.astype(jnp.bfloat16), bias.astype(jnp.float32)

        w, b = fuse(lp["w_rel"], lp["w_root"], lp["b_rel"], lp["gamma"], lp["beta"])
        w_s, b_s = fuse(lp["w_rel_s"], lp["w_root_s"], lp["b_rel_s"],
                        lp["gamma_s"], lp["beta_s"])
        layers.append({"w": w, "b": b, "w_s": w_s, "b_s": b_s})

    e, h = params["final"]["w1"].shape
    t = params["final"]["w2"].shape[1]
    Ep, Hp, Tp = _round_up(e, LANE), _round_up(h, LANE), _round_up(t, LANE)
    final = {
        "w1": _pad2(params["final"]["w1"], Ep, Hp),
        "b1": _pad2(params["final"]["b1"], 1, Hp),
        "w2": _pad2(params["final"]["w2"], Hp, Tp),
        "b2": _pad2(params["final"]["b2"], 1, Tp),
    }
    return {"layers": layers, "final": final}


# ----------------------------------------------------------------------------
# Batched forward
# ----------------------------------------------------------------------------
@functools.partial(jax.jit, static_argnames=("num_tasks",))
def dss_forward(x, A, fparams, *, num_tasks):
    """x: [B, N, F] node features, A: [B, N, N] dense adjacency (A[dst, src])."""
    B, N, F = x.shape
    S = N                                     # NodeDeleted: one subgraph per node
    Np = _round_up(N, 8)
    Sp = Np                                   # padded subgraph count (masked in-kernel)
    layers = fparams["layers"]
    Ep = layers[0]["w"].shape[1]
    Fp0 = layers[0]["w"].shape[0] // 2

    A0b = jnp.pad(A, ((0, 0), (0, Np - N), (0, Np - N))).astype(jnp.bfloat16)
    x0 = jnp.pad(x, ((0, 0), (0, Np - N), (0, Fp0 - F)))          # f32, padded
    x0b = x0.astype(jnp.bfloat16)

    X = None
    P = x0[:, None]                           # [B, 1, Np, Fp0]; mean of identical copies
    inv_s = 1.0                               # layer-0 subgraph copies coincide
    for li, lp in enumerate(layers):
        Fp = lp["w"].shape[0] // 2
        h2 = _h2_call(P, A0b, lp["w_s"], lp["b_s"], inv_s=inv_s)
        is_first = li == 0
        write_x = li < len(layers) - 1        # last layer only emits partial sums
        tile_s = _pick_tile_s(Sp, Np, Fp, Ep)
        outs = _dss_layer_call(x0b if is_first else X, A0b, h2, lp["w"], lp["b"],
                               is_first=is_first, write_x=write_x,
                               tile_s=tile_s, num_sub=S)
        if write_x:
            X, P = outs
        else:
            P = outs[0]
        inv_s = 1.0 / S

    pred = _readout_call(P, fparams["final"], num_tasks=num_tasks,
                         n_true=N, num_sub=S)
    return pred[:, 0, :num_tasks]


def dss_forward_batch(x, A, params, num_tasks):
    fparams = prepare_params(params)
    return dss_forward(x, A, fparams, num_tasks=num_tasks), 0


# ----------------------------------------------------------------------------
# Plain-JAX f32 reference (for a loose numerical sanity check)
# ----------------------------------------------------------------------------
def _reference_forward(x, A, params, num_tasks):
    inv = 1.0 / jnp.sqrt(1.0 + BN_EPS)
    B, N, _ = x.shape
    preds = []
    for g in range(B):
        xs = jnp.tile(x[g][None], (N, 1, 1))                       # [S, N, F]
        A0 = A[g]
        mask = 1.0 - jnp.eye(N)                                    # [S, N]
        A_sub = A0[None] * mask[:, :, None] * mask[:, None, :]     # deleted-node edges
        for lp in params["layers"]:
            agg = jnp.einsum('snm,smf->snf', A_sub, xs)
            h1 = agg @ lp["w_rel"] + xs @ lp["w_root"] + lp["b_rel"]
            h1 = h1 * (lp["gamma"] * inv) + lp["beta"]
            x_mean = xs.mean(axis=0)
            h2 = (A0 @ x_mean) @ lp["w_rel_s"] + x_mean @ lp["w_root_s"] + lp["b_rel_s"]
            h2 = h2 * (lp["gamma_s"] * inv) + lp["beta_s"]
            xs = jax.nn.relu(h1 + h2[None])
        h_graph = xs.mean(axis=1).mean(axis=0, keepdims=True)
        h = jax.nn.relu(h_graph @ params["final"]["w1"] + params["final"]["b1"])
        logits = h @ params["final"]["w2"] + params["final"]["b2"]
        preds.append(jax.nn.log_softmax(logits, axis=-1))
    return jnp.concatenate(preds, axis=0)


# ----------------------------------------------------------------------------
if __name__ == "__main__":
    num_layers = 2
    in_dim = 8
    emb_dim = 16
    num_tasks = 4
    num_nodes = 16
    num_graphs = 2

    key = jax.random.PRNGKey(0)
    key, pkey = jax.random.split(key)
    params = init_params(pkey, num_layers, in_dim, emb_dim, num_tasks)

    key, kx, ka = jax.random.split(key, 3)
    x = jax.random.normal(kx, (num_graphs, num_nodes, in_dim), jnp.float32)
    a = (jax.random.uniform(ka, (num_graphs, num_nodes, num_nodes)) > 0.5
         ).astype(jnp.float32)
    a = jnp.maximum(a, jnp.swapaxes(a, 1, 2)) * (1.0 - jnp.eye(num_nodes)[None])

    preds, _ = dss_forward_batch(x, a, params, num_tasks)
    preds = jax.block_until_ready(preds)
    assert preds.shape == (num_graphs, num_tasks)
    assert bool(jnp.all(jnp.isfinite(preds)))

    ref = _reference_forward(x, a, params, num_tasks)
    assert float(jnp.max(jnp.abs(preds - ref))) < 0.1   # loose: bf16 MXU vs f32 ref

    print("KERNEL_OK")
</pallas_src>

<mosaic_0001>
module attributes {stable_mosaic.version = 11 : i64} {
  func.func @dss_layer_kernel(%arg0: i32, %arg1: i32, %arg2: memref<1x16x128xbf16, #tpu.memory_space<vmem>>, %arg3: memref<1x16x16xbf16, #tpu.memory_space<vmem>>, %arg4: memref<1x16x128xf32, #tpu.memory_space<vmem>>, %arg5: memref<256x128xbf16, #tpu.memory_space<vmem>>, %arg6: memref<1x128xf32, #tpu.memory_space<vmem>>, %arg7: memref<1x16x2048xbf16, #tpu.memory_space<vmem>>, %arg8: memref<1x1x16x128xf32, #tpu.memory_space<vmem>>) attributes {dimension_semantics = [#tpu.dimension_semantics<parallel>, #tpu.dimension_semantics<parallel>], iteration_bounds = array<i64: 2, 1>, scalar_prefetch = 0 : i64, scratch_operands = 0 : i64, tpu.core_type = #tpu.core_type<tc>, window_params = [{transform_indices = @transform_0, window_bounds = array<i64: 1, 16, 128>}, {transform_indices = @transform_1, window_bounds = array<i64: 1, 16, 16>}, {transform_indices = @transform_2, window_bounds = array<i64: 1, 16, 128>}, {pipeline_mode = #tpu.pipeline_mode<synchronous>, transform_indices = @transform_3, window_bounds = array<i64: 256, 128>}, {pipeline_mode = #tpu.pipeline_mode<synchronous>, transform_indices = @transform_4, window_bounds = array<i64: 1, 128>}, {transform_indices = @transform_5, window_bounds = array<i64: 1, 16, 2048>}, {transform_indices = @transform_6, window_bounds = array<i64: 1, 1, 16, 128>}]} {
    %c0 = arith.constant 0 : index
    %c0_0 = arith.constant 0 : index
    %c0_1 = arith.constant 0 : index
    %0 = vector.load %arg3[%c0, %c0_0, %c0_1] : memref<1x16x16xbf16, #tpu.memory_space<vmem>>, vector<1x16x16xbf16>
    %1 = vector.shape_cast %0 : vector<1x16x16xbf16> to vector<16x16xbf16>
    %c0_2 = arith.constant 0 : index
    %c0_3 = arith.constant 0 : index
    %c0_4 = arith.constant 0 : index
    %2 = vector.load %arg4[%c0_2, %c0_3, %c0_4] : memref<1x16x128xf32, #tpu.memory_space<vmem>>, vector<1x16x128xf32>
    %3 = vector.shape_cast %2 : vector<1x16x128xf32> to vector<16x128xf32>
    %c0_5 = arith.constant 0 : index
    %c0_6 = arith.constant 0 : index
    %4 = vector.load %arg5[%c0_5, %c0_6] : memref<256x128xbf16, #tpu.memory_space<vmem>>, vector<256x128xbf16>
    %c0_7 = arith.constant 0 : index
    %c0_8 = arith.constant 0 : index
    %5 = vector.load %arg6[%c0_7, %c0_8] : memref<1x128xf32, #tpu.memory_space<vmem>>, vector<1x128xf32>
    %c0_9 = arith.constant 0 : index
    %c0_10 = arith.constant 0 : index
    %c0_11 = arith.constant 0 : index
    %6 = vector.load %arg2[%c0_9, %c0_10, %c0_11] : memref<1x16x128xbf16, #tpu.memory_space<vmem>>, vector<1x16x128xbf16>
    %7 = vector.shape_cast %6 : vector<1x16x128xbf16> to vector<16x128xbf16>
    %8 = tpu.iota {dimensions = array<i32: 0>} : vector<16x128xi32>
    %c16_i32 = arith.constant 16 : i32
    %9 = arith.muli %arg1, %c16_i32 : i32
    %c0_i32 = arith.constant 0 : i32
    %10 = arith.addi %9, %c0_i32 : i32
    %11 = vector.broadcast %10 : i32 to vector<16x128xi32>
    %12 = arith.cmpi eq, %8, %11 : vector<16x128xi32>
    %cst = arith.constant 0.000000e+00 : bf16
    %13 = vector.broadcast %cst : bf16 to vector<16x128xbf16>
    %14 = arith.select %12, %13, %7 : vector<16x128xi1>, vector<16x128xbf16>
    %c16_i32_12 = arith.constant 16 : i32
    %15 = arith.muli %arg1, %c16_i32_12 : i32
    %c1_i32 = arith.constant 1 : i32
    %16 = arith.addi %15, %c1_i32 : i32
    %17 = vector.broadcast %16 : i32 to vector<16x128xi32>
    %18 = arith.cmpi eq, %8, %17 : vector<16x128xi32>
    %cst_13 = arith.constant 0.000000e+00 : bf16
    %19 = vector.broadcast %cst_13 : bf16 to vector<16x128xbf16>
    %20 = arith.select %18, %19, %7 : vector<16x128xi1>, vector<16x128xbf16>
    %c16_i32_14 = arith.constant 16 : i32
    %21 = arith.muli %arg1, %c16_i32_14 : i32
    %c2_i32 = arith.constant 2 : i32
    %22 = arith.addi %21, %c2_i32 : i32
    %23 = vector.broadcast %22 : i32 to vector<16x128xi32>
    %24 = arith.cmpi eq, %8, %23 : vector<16x128xi32>
    %cst_15 = arith.constant 0.000000e+00 : bf16
    %25 = vector.broadcast %cst_15 : bf16 to vector<16x128xbf16>
    %26 = arith.select %24, %25, %7 : vector<16x128xi1>, vector<16x128xbf16>
    %c16_i32_16 = arith.constant 16 : i32
    %27 = arith.muli %arg1, %c16_i32_16 : i32
    %c3_i32 = arith.constant 3 : i32
    %28 = arith.addi %27, %c3_i32 : i32
    %29 = vector.broadcast %28 : i32 to vector<16x128xi32>
    %30 = arith.cmpi eq, %8, %29 : vector<16x128xi32>
    %cst_17 = arith.constant 0.000000e+00 : bf16
    %31 = vector.broadcast %cst_17 : bf16 to vector<16x128xbf16>
    %32 = arith.select %30, %31, %7 : vector<16x128xi1>, vector<16x128xbf16>
    %c16_i32_18 = arith.constant 16 : i32
    %33 = arith.muli %arg1, %c16_i32_18 : i32
    %c4_i32 = arith.constant 4 : i32
    %34 = arith.addi %33, %c4_i32 : i32
    %35 = vector.broadcast %34 : i32 to vector<16x128xi32>
    %36 = arith.cmpi eq, %8, %35 : vector<16x128xi32>
    %cst_19 = arith.constant 0.000000e+00 : bf16
    %37 = vector.broadcast %cst_19 : bf16 to vector<16x128xbf16>
    %38 = arith.select %36, %37, %7 : vector<16x128xi1>, vector<16x128xbf16>
    %c16_i32_20 = arith.constant 16 : i32
    %39 = arith.muli %arg1, %c16_i32_20 : i32
    %c5_i32 = arith.constant 5 : i32
    %40 = arith.addi %39, %c5_i32 : i32
    %41 = vector.broadcast %40 : i32 to vector<16x128xi32>
    %42 = arith.cmpi eq, %8, %41 : vector<16x128xi32>
    %cst_21 = arith.constant 0.000000e+00 : bf16
    %43 = vector.broadcast %cst_21 : bf16 to vector<16x128xbf16>
    %44 = arith.select %42, %43, %7 : vector<16x128xi1>, vector<16x128xbf16>
    %c16_i32_22 = arith.constant 16 : i32
    %45 = arith.muli %arg1, %c16_i32_22 : i32
    %c6_i32 = arith.constant 6 : i32
    %46 = arith.addi %45, %c6_i32 : i32
    %47 = vector.broadcast %46 : i32 to vector<16x128xi32>
    %48 = arith.cmpi eq, %8, %47 : vector<16x128xi32>
    %cst_23 = arith.constant 0.000000e+00 : bf16
    %49 = vector.broadcast %cst_23 : bf16 to vector<16x128xbf16>
    %50 = arith.select %48, %49, %7 : vector<16x128xi1>, vector<16x128xbf16>
    %c16_i32_24 = arith.constant 16 : i32
    %51 = arith.muli %arg1, %c16_i32_24 : i32
    %c7_i32 = arith.constant 7 : i32
    %52 = arith.addi %51, %c7_i32 : i32
    %53 = vector.broadcast %52 : i32 to vector<16x128xi32>
    %54 = arith.cmpi eq, %8, %53 : vector<16x128xi32>
    %cst_25 = arith.constant 0.000000e+00 : bf16
    %55 = vector.broadcast %cst_25 : bf16 to vector<16x128xbf16>
    %56 = arith.select %54, %55, %7 : vector<16x128xi1>, vector<16x128xbf16>
    %c16_i32_26 = arith.constant 16 : i32
    %57 = arith.muli %arg1, %c16_i32_26 : i32
    %c8_i32 = arith.constant 8 : i32
    %58 = arith.addi %57, %c8_i32 : i32
    %59 = vector.broadcast %58 : i32 to vector<16x128xi32>
    %60 = arith.cmpi eq, %8, %59 : vector<16x128xi32>
    %cst_27 = arith.constant 0.000000e+00 : bf16
    %61 = vector.broadcast %cst_27 : bf16 to vector<16x128xbf16>
    %62 = arith.select %60, %61, %7 : vector<16x128xi1>, vector<16x128xbf16>
    %c16_i32_28 = arith.constant 16 : i32
    %63 = arith.muli %arg1, %c16_i32_28 : i32
    %c9_i32 = arith.constant 9 : i32
    %64 = arith.addi %63, %c9_i32 : i32
    %65 = vector.broadcast %64 : i32 to vector<16x128xi32>
    %66 = arith.cmpi eq, %8, %65 : vector<16x128xi32>
    %cst_29 = arith.constant 0.000000e+00 : bf16
    %67 = vector.broadcast %cst_29 : bf16 to vector<16x128xbf16>
    %68 = arith.select %66, %67, %7 : vector<16x128xi1>, vector<16x128xbf16>
    %c16_i32_30 = arith.constant 16 : i32
    %69 = arith.muli %arg1, %c16_i32_30 : i32
    %c10_i32 = arith.constant 10 : i32
    %70 = arith.addi %69, %c10_i32 : i32
    %71 = vector.broadcast %70 : i32 to vector<16x128xi32>
    %72 = arith.cmpi eq, %8, %71 : vector<16x128xi32>
    %cst_31 = arith.constant 0.000000e+00 : bf16
    %73 = vector.broadcast %cst_31 : bf16 to vector<16x128xbf16>
    %74 = arith.select %72, %73, %7 : vector<16x128xi1>, vector<16x128xbf16>
    %c16_i32_32 = arith.constant 16 : i32
    %75 = arith.muli %arg1, %c16_i32_32 : i32
    %c11_i32 = arith.constant 11 : i32
    %76 = arith.addi %75, %c11_i32 : i32
    %77 = vector.broadcast %76 : i32 to vector<16x128xi32>
    %78 = arith.cmpi eq, %8, %77 : vector<16x128xi32>
    %cst_33 = arith.constant 0.000000e+00 : bf16
    %79 = vector.broadcast %cst_33 : bf16 to vector<16x128xbf16>
    %80 = arith.select %78, %79, %7 : vector<16x128xi1>, vector<16x128xbf16>
    %c16_i32_34 = arith.constant 16 : i32
    %81 = arith.muli %arg1, %c16_i32_34 : i32
    %c12_i32 = arith.constant 12 : i32
    %82 = arith.addi %81, %c12_i32 : i32
    %83 = vector.broadcast %82 : i32 to vector<16x128xi32>
    %84 = arith.cmpi eq, %8, %83 : vector<16x128xi32>
    %cst_35 = arith.constant 0.000000e+00 : bf16
    %85 = vector.broadcast %cst_35 : bf16 to vector<16x128xbf16>
    %86 = arith.select %84, %85, %7 : vector<16x128xi1>, vector<16x128xbf16>
    %c16_i32_36 = arith.constant 16 : i32
    %87 = arith.muli %arg1, %c16_i32_36 : i32
    %c13_i32 = arith.constant 13 : i32
    %88 = arith.addi %87, %c13_i32 : i32
    %89 = vector.broadcast %88 : i32 to vector<16x128xi32>
    %90 = arith.cmpi eq, %8, %89 : vector<16x128xi32>
    %cst_37 = arith.constant 0.000000e+00 : bf16
    %91 = vector.broadcast %cst_37 : bf16 to vector<16x128xbf16>
    %92 = arith.select %90, %91, %7 : vector<16x128xi1>, vector<16x128xbf16>
    %c16_i32_38 = arith.constant 16 : i32
    %93 = arith.muli %arg1, %c16_i32_38 : i32
    %c14_i32 = arith.constant 14 : i32
    %94 = arith.addi %93, %c14_i32 : i32
    %95 = vector.broadcast %94 : i32 to vector<16x128xi32>
    %96 = arith.cmpi eq, %8, %95 : vector<16x128xi32>
    %cst_39 = arith.constant 0.000000e+00 : bf16
    %97 = vector.broadcast %cst_39 : bf16 to vector<16x128xbf16>
    %98 = arith.select %96, %97, %7 : vector<16x128xi1>, vector<16x128xbf16>
    %c16_i32_40 = arith.constant 16 : i32
    %99 = arith.muli %arg1, %c16_i32_40 : i32
    %c15_i32 = arith.constant 15 : i32
    %100 = arith.addi %99, %c15_i32 : i32
    %101 = vector.broadcast %100 : i32 to vector<16x128xi32>
    %102 = arith.cmpi eq, %8, %101 : vector<16x128xi32>
    %cst_41 = arith.constant 0.000000e+00 : bf16
    %103 = vector.broadcast %cst_41 : bf16 to vector<16x128xbf16>
    %104 = arith.select %102, %103, %7 : vector<16x128xi1>, vector<16x128xbf16>
    %105 = tpu.concatenate %14, %20, %26, %32, %38, %44, %50, %56, %62, %68, %74, %80, %86, %92, %98, %104 in 1 : vector<16x128xbf16>, vector<16x128xbf16>, vector<16x128xbf16>, vector<16x128xbf16>, vector<16x128xbf16>, vector<16x128xbf16>, vector<16x128xbf16>, vector<16x128xbf16>, vector<16x128xbf16>, vector<16x128xbf16>, vector<16x128xbf16>, vector<16x128xbf16>, vector<16x128xbf16>, vector<16x128xbf16>, vector<16x128xbf16>, vector<16x128xbf16> -> vector<16x2048xbf16>
    %cst_42 = arith.constant dense<0.000000e+00> : vector<16x2048xf32>
    %106 = tpu.matmul %1, %105, %cst_42 {dimension_numbers = #tpu.dot_dimension_numbers<[1], [0], [0], [1], [0, 0, 1, 1], [], []>} : vector<16x16xbf16>, vector<16x2048xbf16>, vector<16x2048xf32> -> vector<16x2048xf32>
    %cst_43 = arith.constant 0.000000e+00 : f32
    %107 = vector.broadcast %cst_43 : f32 to vector<16x128xf32>
    %c16_i32_44 = arith.constant 16 : i32
    %108 = arith.muli %arg1, %c16_i32_44 : i32
    %c0_i32_45 = arith.constant 0 : i32
    %109 = arith.addi %108, %c0_i32_45 : i32
    %110 = vector.extract_strided_slice %106 {offsets = [0, 0], sizes = [16, 128], strides = [1, 1]} : vector<16x2048xf32> to vector<16x128xf32>
    %111 = vector.broadcast %109 : i32 to vector<16x128xi32>
    %112 = arith.cmpi eq, %8, %111 : vector<16x128xi32>
    %cst_46 = arith.constant 0.000000e+00 : f32
    %113 = vector.broadcast %cst_46 : f32 to vector<16x128xf32>
    %114 = arith.select %112, %113, %110 : vector<16x128xi1>, vector<16x128xf32>
    %115 = arith.truncf %114 : vector<16x128xf32> to vector<16x128xbf16>
    %116 = tpu.concatenate %115, %7 in 1 : vector<16x128xbf16>, vector<16x128xbf16> -> vector<16x256xbf16>
    %cst_47 = arith.constant dense<0.000000e+00> : vector<16x128xf32>
    %117 = tpu.matmul %116, %4, %cst_47 {dimension_numbers = #tpu.dot_dimension_numbers<[1], [0], [0], [1], [0, 0, 1, 1], [], []>} : vector<16x256xbf16>, vector<256x128xbf16>, vector<16x128xf32> -> vector<16x128xf32>
    %118 = vector.broadcast %5 : vector<1x128xf32> to vector<16x128xf32>
    %119 = arith.addf %117, %118 : vector<16x128xf32>
    %120 = arith.addf %119, %3 : vector<16x128xf32>
    %cst_48 = arith.constant 0.000000e+00 : f32
    %121 = vector.broadcast %cst_48 : f32 to vector<16x128xf32>
    %122 = arith.maximumf %120, %121 : vector<16x128xf32>
    %123 = arith.truncf %122 : vector<16x128xf32> to vector<16x128xbf16>
    %c16_i32_49 = arith.constant 16 : i32
    %124 = arith.cmpi slt, %109, %c16_i32_49 : i32
    %125 = arith.extui %124 : i1 to i32
    %126 = arith.sitofp %125 : i32 to f32
    %127 = vector.broadcast %126 : f32 to vector<16x128xf32>
    %128 = arith.mulf %122, %127 : vector<16x128xf32>
    %129 = arith.addf %107, %128 : vector<16x128xf32>
    %c16_i32_50 = arith.constant 16 : i32
    %130 = arith.muli %arg1, %c16_i32_50 : i32
    %c1_i32_51 = arith.constant 1 : i32
    %131 = arith.addi %130, %c1_i32_51 : i32
    %132 = vector.extract_strided_slice %106 {offsets = [0, 128], sizes = [16, 128], strides = [1, 1]} : vector<16x2048xf32> to vector<16x128xf32>
    %133 = vector.broadcast %131 : i32 to vector<16x128xi32>
    %134 = arith.cmpi eq, %8, %133 : vector<16x128xi32>
    %cst_52 = arith.constant 0.000000e+00 : f32
    %135 = vector.broadcast %cst_52 : f32 to vector<16x128xf32>
    %136 = arith.select %134, %135, %132 : vector<16x128xi1>, vector<16x128xf32>
    %137 = arith.truncf %136 : vector<16x128xf32> to vector<16x128xbf16>
    %138 = tpu.concatenate %137, %7 in 1 : vector<16x128xbf16>, vector<16x128xbf16> -> vector<16x256xbf16>
    %cst_53 = arith.constant dense<0.000000e+00> : vector<16x128xf32>
    %139 = tpu.matmul %138, %4, %cst_53 {dimension_numbers = #tpu.dot_dimension_numbers<[1], [0], [0], [1], [0, 0, 1, 1], [], []>} : vector<16x256xbf16>, vector<256x128xbf16>, vector<16x128xf32> -> vector<16x128xf32>
    %140 = vector.broadcast %5 : vector<1x128xf32> to vector<16x128xf32>
    %141 = arith.addf %139, %140 : vector<16x128xf32>
    %142 = arith.addf %141, %3 : vector<16x128xf32>
    %cst_54 = arith.constant 0.000000e+00 : f32
    %143 = vector.broadcast %cst_54 : f32 to vector<16x128xf32>
    %144 = arith.maximumf %142, %143 : vector<16x128xf32>
    %145 = arith.truncf %144 : vector<16x128xf32> to vector<16x128xbf16>
    %c16_i32_55 = arith.constant 16 : i32
    %146 = arith.cmpi slt, %131, %c16_i32_55 : i32
    %147 = arith.extui %146 : i1 to i32
    %148 = arith.sitofp %147 : i32 to f32
    %149 = vector.broadcast %148 : f32 to vector<16x128xf32>
    %150 = arith.mulf %144, %149 : vector<16x128xf32>
    %151 = arith.addf %129, %150 : vector<16x128xf32>
    %c16_i32_56 = arith.constant 16 : i32
    %152 = arith.muli %arg1, %c16_i32_56 : i32
    %c2_i32_57 = arith.constant 2 : i32
    %153 = arith.addi %152, %c2_i32_57 : i32
    %154 = vector.extract_strided_slice %106 {offsets = [0, 256], sizes = [16, 128], strides = [1, 1]} : vector<16x2048xf32> to vector<16x128xf32>
    %155 = vector.broadcast %153 : i32 to vector<16x128xi32>
    %156 = arith.cmpi eq, %8, %155 : vector<16x128xi32>
    %cst_58 = arith.constant 0.000000e+00 : f32
    %157 = vector.broadcast %cst_58 : f32 to vector<16x128xf32>
    %158 = arith.select %156, %157, %154 : vector<16x128xi1>, vector<16x128xf32>
    %159 = arith.truncf %158 : vector<16x128xf32> to vector<16x128xbf16>
    %160 = tpu.concatenate %159, %7 in 1 : vector<16x128xbf16>, vector<16x128xbf16> -> vector<16x256xbf16>
    %cst_59 = arith.constant dense<0.000000e+00> : vector<16x128xf32>
    %161 = tpu.matmul %160, %4, %cst_59 {dimension_numbers = #tpu.dot_dimension_numbers<[1], [0], [0], [1], [0, 0, 1, 1], [], []>} : vector<16x256xbf16>, vector<256x128xbf16>, vector<16x128xf32> -> vector<16x128xf32>
    %162 = vector.broadcast %5 : vector<1x128xf32> to vector<16x128xf32>
    %163 = arith.addf %161, %162 : vector<16x128xf32>
    %164 = arith.addf %163, %3 : vector<16x128xf32>
    %cst_60 = arith.constant 0.000000e+00 : f32
    %165 = vector.broadcast %cst_60 : f32 to vector<16x128xf32>
    %166 = arith.maximumf %164, %165 : vector<16x128xf32>
    %167 = arith.truncf %166 : vector<16x128xf32> to vector<16x128xbf16>
    %c16_i32_61 = arith.constant 16 : i32
    %168 = arith.cmpi slt, %153, %c16_i32_61 : i32
    %169 = arith.extui %168 : i1 to i32
    %170 = arith.sitofp %169 : i32 to f32
    %171 = vector.broadcast %170 : f32 to vector<16x128xf32>
    %172 = arith.mulf %166, %171 : vector<16x128xf32>
    %173 = arith.addf %151, %172 : vector<16x128xf32>
    %c16_i32_62 = arith.constant 16 : i32
    %174 = arith.muli %arg1, %c16_i32_62 : i32
    %c3_i32_63 = arith.constant 3 : i32
    %175 = arith.addi %174, %c3_i32_63 : i32
    %176 = vector.extract_strided_slice %106 {offsets = [0, 384], sizes = [16, 128], strides = [1, 1]} : vector<16x2048xf32> to vector<16x128xf32>
    %177 = vector.broadcast %175 : i32 to vector<16x128xi32>
    %178 = arith.cmpi eq, %8, %177 : vector<16x128xi32>
    %cst_64 = arith.constant 0.000000e+00 : f32
    %179 = vector.broadcast %cst_64 : f32 to vector<16x128xf32>
    %180 = arith.select %178, %179, %176 : vector<16x128xi1>, vector<16x128xf32>
    %181 = arith.truncf %180 : vector<16x128xf32> to vector<16x128xbf16>
    %182 = tpu.concatenate %181, %7 in 1 : vector<16x128xbf16>, vector<16x128xbf16> -> vector<16x256xbf16>
    %cst_65 = arith.constant dense<0.000000e+00> : vector<16x128xf32>
    %183 = tpu.matmul %182, %4, %cst_65 {dimension_numbers = #tpu.dot_dimension_numbers<[1], [0], [0], [1], [0, 0, 1, 1], [], []>} : vector<16x256xbf16>, vector<256x128xbf16>, vector<16x128xf32> -> vector<16x128xf32>
    %184 = vector.broadcast %5 : vector<1x128xf32> to vector<16x128xf32>
    %185 = arith.addf %183, %184 : vector<16x128xf32>
    %186 = arith.addf %185, %3 : vector<16x128xf32>
    %cst_66 = arith.constant 0.000000e+00 : f32
    %187 = vector.broadcast %cst_66 : f32 to vector<16x128xf32>
    %188 = arith.maximumf %186, %187 : vector<16x128xf32>
    %189 = arith.truncf %188 : vector<16x128xf32> to vector<16x128xbf16>
    %c16_i32_67 = arith.constant 16 : i32
    %190 = arith.cmpi slt, %175, %c16_i32_67 : i32
    %191 = arith.extui %190 : i1 to i32
    %192 = arith.sitofp %191 : i32 to f32
    %193 = vector.broadcast %192 : f32 to vector<16x128xf32>
    %194 = arith.mulf %188, %193 : vector<16x128xf32>
    %195 = arith.addf %173, %194 : vector<16x128xf32>
    %c16_i32_68 = arith.constant 16 : i32
    %196 = arith.muli %arg1, %c16_i32_68 : i32
    %c4_i32_69 = arith.constant 4 : i32
    %197 = arith.addi %196, %c4_i32_69 : i32
    %198 = vector.extract_strided_slice %106 {offsets = [0, 512], sizes = [16, 128], strides = [1, 1]} : vector<16x2048xf32> to vector<16x128xf32>
    %199 = vector.broadcast %197 : i32 to vector<16x128xi32>
    %200 = arith.cmpi eq, %8, %199 : vector<16x128xi32>
    %cst_70 = arith.constant 0.000000e+00 : f32
    %201 = vector.broadcast %cst_70 : f32 to vector<16x128xf32>
    %202 = arith.select %200, %201, %198 : vector<16x128xi1>, vector<16x128xf32>
    %203 = arith.truncf %202 : vector<16x128xf32> to vector<16x128xbf16>
    %204 = tpu.concatenate %203, %7 in 1 : vector<16x128xbf16>, vector<16x128xbf16> -> vector<16x256xbf16>
    %cst_71 = arith.constant dense<0.000000e+00> : vector<16x128xf32>
    %205 = tpu.matmul %204, %4, %cst_71 {dimension_numbers = #tpu.dot_dimension_numbers<[1], [0], [0], [1], [0, 0, 1, 1], [], []>} : vector<16x256xbf16>, vector<256x128xbf16>, vector<16x128xf32> -> vector<16x128xf32>
    %206 = vector.broadcast %5 : vector<1x128xf32> to vector<16x128xf32>
    %207 = arith.addf %205, %206 : vector<16x128xf32>
    %208 = arith.addf %207, %3 : vector<16x128xf32>
    %cst_72 = arith.constant 0.000000e+00 : f32
    %209 = vector.broadcast %cst_72 : f32 to vector<16x128xf32>
    %210 = arith.maximumf %208, %209 : vector<16x128xf32>
    %211 = arith.truncf %210 : vector<16x128xf32> to vector<16x128xbf16>
    %c16_i32_73 = arith.constant 16 : i32
    %212 = arith.cmpi slt, %197, %c16_i32_73 : i32
    %213 = arith.extui %212 : i1 to i32
    %214 = arith.sitofp %213 : i32 to f32
    %215 = vector.broadcast %214 : f32 to vector<16x128xf32>
    %216 = arith.mulf %210, %215 : vector<16x128xf32>
    %217 = arith.addf %195, %216 : vector<16x128xf32>
    %c16_i32_74 = arith.constant 16 : i32
    %218 = arith.muli %arg1, %c16_i32_74 : i32
    %c5_i32_75 = arith.constant 5 : i32
    %219 = arith.addi %218, %c5_i32_75 : i32
    %220 = vector.extract_strided_slice %106 {offsets = [0, 640], sizes = [16, 128], strides = [1, 1]} : vector<16x2048xf32> to vector<16x128xf32>
    %221 = vector.broadcast %219 : i32 to vector<16x128xi32>
    %222 = arith.cmpi eq, %8, %221 : vector<16x128xi32>
    %cst_76 = arith.constant 0.000000e+00 : f32
    %223 = vector.broadcast %cst_76 : f32 to vector<16x128xf32>
    %224 = arith.select %222, %223, %220 : vector<16x128xi1>, vector<16x128xf32>
    %225 = arith.truncf %224 : vector<16x128xf32> to vector<16x128xbf16>
    %226 = tpu.concatenate %225, %7 in 1 : vector<16x128xbf16>, vector<16x128xbf16> -> vector<16x256xbf16>
    %cst_77 = arith.constant dense<0.000000e+00> : vector<16x128xf32>
    %227 = tpu.matmul %226, %4, %cst_77 {dimension_numbers = #tpu.dot_dimension_numbers<[1], [0], [0], [1], [0, 0, 1, 1], [], []>} : vector<16x256xbf16>, vector<256x128xbf16>, vector<16x128xf32> -> vector<16x128xf32>
    %228 = vector.broadcast %5 : vector<1x128xf32> to vector<16x128xf32>
    %229 = arith.addf %227, %228 : vector<16x128xf32>
    %230 = arith.addf %229, %3 : vector<16x128xf32>
    %cst_78 = arith.constant 0.000000e+00 : f32
    %231 = vector.broadcast %cst_78 : f32 to vector<16x128xf32>
    %232 = arith.maximumf %230, %231 : vector<16x128xf32>
    %233 = arith.truncf %232 : vector<16x128xf32> to vector<16x128xbf16>
    %c16_i32_79 = arith.constant 16 : i32
    %234 = arith.cmpi slt, %219, %c16_i32_79 : i32
    %235 = arith.extui %234 : i1 to i32
    %236 = arith.sitofp %235 : i32 to f32
    %237 = vector.broadcast %236 : f32 to vector<16x128xf32>
    %238 = arith.mulf %232, %237 : vector<16x128xf32>
    %239 = arith.addf %217, %238 : vector<16x128xf32>
    %c16_i32_80 = arith.constant 16 : i32
    %240 = arith.muli %arg1, %c16_i32_80 : i32
    %c6_i32_81 = arith.constant 6 : i32
    %241 = arith.addi %240, %c6_i32_81 : i32
    %242 = vector.extract_strided_slice %106 {offsets = [0, 768], sizes = [16, 128], strides = [1, 1]} : vector<16x2048xf32> to vector<16x128xf32>
    %243 = vector.broadcast %241 : i32 to vector<16x128xi32>
    %244 = arith.cmpi eq, %8, %243 : vector<16x128xi32>
    %cst_82 = arith.constant 0.000000e+00 : f32
    %245 = vector.broadcast %cst_82 : f32 to vector<16x128xf32>
    %246 = arith.select %244, %245, %242 : vector<16x128xi1>, vector<16x128xf32>
    %247 = arith.truncf %246 : vector<16x128xf32> to vector<16x128xbf16>
    %248 = tpu.concatenate %247, %7 in 1 : vector<16x128xbf16>, vector<16x128xbf16> -> vector<16x256xbf16>
    %cst_83 = arith.constant dense<0.000000e+00> : vector<16x128xf32>
    %249 = tpu.matmul %248, %4, %cst_83 {dimension_numbers = #tpu.dot_dimension_numbers<[1], [0], [0], [1], [0, 0, 1, 1], [], []>} : vector<16x256xbf16>, vector<256x128xbf16>, vector<16x128xf32> -> vector<16x128xf32>
    %250 = vector.broadcast %5 : vector<1x128xf32> to vector<16x128xf32>
    %251 = arith.addf %249, %250 : vector<16x128xf32>
    %252 = arith.addf %251, %3 : vector<16x128xf32>
    %cst_84 = arith.constant 0.000000e+00 : f32
    %253 = vector.broadcast %cst_84 : f32 to vector<16x128xf32>
    %254 = arith.maximumf %252, %253 : vector<16x128xf32>
    %255 = arith.truncf %254 : vector<16x128xf32> to vector<16x128xbf16>
    %c16_i32_85 = arith.constant 16 : i32
    %256 = arith.cmpi slt, %241, %c16_i32_85 : i32
    %257 = arith.extui %256 : i1 to i32
    %258 = arith.sitofp %257 : i32 to f32
    %259 = vector.broadcast %258 : f32 to vector<16x128xf32>
    %260 = arith.mulf %254, %259 : vector<16x128xf32>
    %261 = arith.addf %239, %260 : vector<16x128xf32>
    %c16_i32_86 = arith.constant 16 : i32
    %262 = arith.muli %arg1, %c16_i32_86 : i32
    %c7_i32_87 = arith.constant 7 : i32
    %263 = arith.addi %262, %c7_i32_87 : i32
    %264 = vector.extract_strided_slice %106 {offsets = [0, 896], sizes = [16, 128], strides = [1, 1]} : vector<16x2048xf32> to vector<16x128xf32>
    %265 = vector.broadcast %263 : i32 to vector<16x128xi32>
    %266 = arith.cmpi eq, %8, %265 : vector<16x128xi32>
    %cst_88 = arith.constant 0.000000e+00 : f32
    %267 = vector.broadcast %cst_88 : f32 to vector<16x128xf32>
    %268 = arith.select %266, %267, %264 : vector<16x128xi1>, vector<16x128xf32>
    %269 = arith.truncf %268 : vector<16x128xf32> to vector<16x128xbf16>
    %270 = tpu.concatenate %269, %7 in 1 : vector<16x128xbf16>, vector<16x128xbf16> -> vector<16x256xbf16>
    %cst_89 = arith.constant dense<0.000000e+00> : vector<16x128xf32>
    %271 = tpu.matmul %270, %4, %cst_89 {dimension_numbers = #tpu.dot_dimension_numbers<[1], [0], [0], [1], [0, 0, 1, 1], [], []>} : vector<16x256xbf16>, vector<256x128xbf16>, vector<16x128xf32> -> vector<16x128xf32>
    %272 = vector.broadcast %5 : vector<1x128xf32> to vector<16x128xf32>
    %273 = arith.addf %271, %272 : vector<16x128xf32>
    %274 = arith.addf %273, %3 : vector<16x128xf32>
    %cst_90 = arith.constant 0.000000e+00 : f32
    %275 = vector.broadcast %cst_90 : f32 to vector<16x128xf32>
    %276 = arith.maximumf %274, %275 : vector<16x128xf32>
    %277 = arith.truncf %276 : vector<16x128xf32> to vector<16x128xbf16>
    %c16_i32_91 = arith.constant 16 : i32
    %278 = arith.cmpi slt, %263, %c16_i32_91 : i32
    %279 = arith.extui %278 : i1 to i32
    %280 = arith.sitofp %279 : i32 to f32
    %281 = vector.broadcast %280 : f32 to vector<16x128xf32>
    %282 = arith.mulf %276, %281 : vector<16x128xf32>
    %283 = arith.addf %261, %282 : vector<16x128xf32>
    %c16_i32_92 = arith.constant 16 : i32
    %284 = arith.muli %arg1, %c16_i32_92 : i32
    %c8_i32_93 = arith.constant 8 : i32
    %285 = arith.addi %284, %c8_i32_93 : i32
    %286 = vector.extract_strided_slice %106 {offsets = [0, 1024], sizes = [16, 128], strides = [1, 1]} : vector<16x2048xf32> to vector<16x128xf32>
    %287 = vector.broadcast %285 : i32 to vector<16x128xi32>
    %288 = arith.cmpi eq, %8, %287 : vector<16x128xi32>
    %cst_94 = arith.constant 0.000000e+00 : f32
    %289 = vector.broadcast %cst_94 : f32 to vector<16x128xf32>
    %290 = arith.select %288, %289, %286 : vector<16x128xi1>, vector<16x128xf32>
    %291 = arith.truncf %290 : vector<16x128xf32> to vector<16x128xbf16>
    %292 = tpu.concatenate %291, %7 in 1 : vector<16x128xbf16>, vector<16x128xbf16> -> vector<16x256xbf16>
    %cst_95 = arith.constant dense<0.000000e+00> : vector<16x128xf32>
    %293 = tpu.matmul %292, %4, %cst_95 {dimension_numbers = #tpu.dot_dimension_numbers<[1], [0], [0], [1], [0, 0, 1, 1], [], []>} : vector<16x256xbf16>, vector<256x128xbf16>, vector<16x128xf32> -> vector<16x128xf32>
    %294 = vector.broadcast %5 : vector<1x128xf32> to vector<16x128xf32>
    %295 = arith.addf %293, %294 : vector<16x128xf32>
    %296 = arith.addf %295, %3 : vector<16x128xf32>
    %cst_96 = arith.constant 0.000000e+00 : f32
    %297 = vector.broadcast %cst_96 : f32 to vector<16x128xf32>
    %298 = arith.maximumf %296, %297 : vector<16x128xf32>
    %299 = arith.truncf %298 : vector<16x128xf32> to vector<16x128xbf16>
    %c16_i32_97 = arith.constant 16 : i32
    %300 = arith.cmpi slt, %285, %c16_i32_97 : i32
    %301 = arith.extui %300 : i1 to i32
    %302 = arith.sitofp %301 : i32 to f32
    %303 = vector.broadcast %302 : f32 to vector<16x128xf32>
    %304 = arith.mulf %298, %303 : vector<16x128xf32>
    %305 = arith.addf %283, %304 : vector<16x128xf32>
    %c16_i32_98 = arith.constant 16 : i32
    %306 = arith.muli %arg1, %c16_i32_98 : i32
    %c9_i32_99 = arith.constant 9 : i32
    %307 = arith.addi %306, %c9_i32_99 : i32
    %308 = vector.extract_strided_slice %106 {offsets = [0, 1152], sizes = [16, 128], strides = [1, 1]} : vector<16x2048xf32> to vector<16x128xf32>
    %309 = vector.broadcast %307 : i32 to vector<16x128xi32>
    %310 = arith.cmpi eq, %8, %309 : vector<16x128xi32>
    %cst_100 = arith.constant 0.000000e+00 : f32
    %311 = vector.broadcast %cst_100 : f32 to vector<16x128xf32>
    %312 = arith.select %310, %311, %308 : vector<16x128xi1>, vector<16x128xf32>
    %313 = arith.truncf %312 : vector<16x128xf32> to vector<16x128xbf16>
    %314 = tpu.concatenate %313, %7 in 1 : vector<16x128xbf16>, vector<16x128xbf16> -> vector<16x256xbf16>
    %cst_101 = arith.constant dense<0.000000e+00> : vector<16x128xf32>
    %315 = tpu.matmul %314, %4, %cst_101 {dimension_numbers = #tpu.dot_dimension_numbers<[1], [0], [0], [1], [0, 0, 1, 1], [], []>} : vector<16x256xbf16>, vector<256x128xbf16>, vector<16x128xf32> -> vector<16x128xf32>
    %316 = vector.broadcast %5 : vector<1x128xf32> to vector<16x128xf32>
    %317 = arith.addf %315, %316 : vector<16x128xf32>
    %318 = arith.addf %317, %3 : vector<16x128xf32>
    %cst_102 = arith.constant 0.000000e+00 : f32
    %319 = vector.broadcast %cst_102 : f32 to vector<16x128xf32>
    %320 = arith.maximumf %318, %319 : vector<16x128xf32>
    %321 = arith.truncf %320 : vector<16x128xf32> to vector<16x128xbf16>
    %c16_i32_103 = arith.constant 16 : i32
    %322 = arith.cmpi slt, %307, %c16_i32_103 : i32
    %323 = arith.extui %322 : i1 to i32
    %324 = arith.sitofp %323 : i32 to f32
    %325 = vector.broadcast %324 : f32 to vector<16x128xf32>
    %326 = arith.mulf %320, %325 : vector<16x128xf32>
    %327 = arith.addf %305, %326 : vector<16x128xf32>
    %c16_i32_104 = arith.constant 16 : i32
    %328 = arith.muli %arg1, %c16_i32_104 : i32
    %c10_i32_105 = arith.constant 10 : i32
    %329 = arith.addi %328, %c10_i32_105 : i32
    %330 = vector.extract_strided_slice %106 {offsets = [0, 1280], sizes = [16, 128], strides = [1, 1]} : vector<16x2048xf32> to vector<16x128xf32>
    %331 = vector.broadcast %329 : i32 to vector<16x128xi32>
    %332 = arith.cmpi eq, %8, %331 : vector<16x128xi32>
    %cst_106 = arith.constant 0.000000e+00 : f32
    %333 = vector.broadcast %cst_106 : f32 to vector<16x128xf32>
    %334 = arith.select %332, %333, %330 : vector<16x128xi1>, vector<16x128xf32>
    %335 = arith.truncf %334 : vector<16x128xf32> to vector<16x128xbf16>
    %336 = tpu.concatenate %335, %7 in 1 : vector<16x128xbf16>, vector<16x128xbf16> -> vector<16x256xbf16>
    %cst_107 = arith.constant dense<0.000000e+00> : vector<16x128xf32>
    %337 = tpu.matmul %336, %4, %cst_107 {dimension_numbers = #tpu.dot_dimension_numbers<[1], [0], [0], [1], [0, 0, 1, 1], [], []>} : vector<16x256xbf16>, vector<256x128xbf16>, vector<16x128xf32> -> vector<16x128xf32>
    %338 = vector.broadcast %5 : vector<1x128xf32> to vector<16x128xf32>
    %339 = arith.addf %337, %338 : vector<16x128xf32>
    %340 = arith.addf %339, %3 : vector<16x128xf32>
    %cst_108 = arith.constant 0.000000e+00 : f32
    %341 = vector.broadcast %cst_108 : f32 to vector<16x128xf32>
    %342 = arith.maximumf %340, %341 : vector<16x128xf32>
    %343 = arith.truncf %342 : vector<16x128xf32> to vector<16x128xbf16>
    %c16_i32_109 = arith.constant 16 : i32
    %344 = arith.cmpi slt, %329, %c16_i32_109 : i32
    %345 = arith.extui %344 : i1 to i32
    %346 = arith.sitofp %345 : i32 to f32
    %347 = vector.broadcast %346 : f32 to vector<16x128xf32>
    %348 = arith.mulf %342, %347 : vector<16x128xf32>
    %349 = arith.addf %327, %348 : vector<16x128xf32>
    %c16_i32_110 = arith.constant 16 : i32
    %350 = arith.muli %arg1, %c16_i32_110 : i32
    %c11_i32_111 = arith.constant 11 : i32
    %351 = arith.addi %350, %c11_i32_111 : i32
    %352 = vector.extract_strided_slice %106 {offsets = [0, 1408], sizes = [16, 128], strides = [1, 1]} : vector<16x2048xf32> to vector<16x128xf32>
    %353 = vector.broadcast %351 : i32 to vector<16x128xi32>
    %354 = arith.cmpi eq, %8, %353 : vector<16x128xi32>
    %cst_112 = arith.constant 0.000000e+00 : f32
    %355 = vector.broadcast %cst_112 : f32 to vector<16x128xf32>
    %356 = arith.select %354, %355, %352 : vector<16x128xi1>, vector<16x128xf32>
    %357 = arith.truncf %356 : vector<16x128xf32> to vector<16x128xbf16>
    %358 = tpu.concatenate %357, %7 in 1 : vector<16x128xbf16>, vector<16x128xbf16> -> vector<16x256xbf16>
    %cst_113 = arith.constant dense<0.000000e+00> : vector<16x128xf32>
    %359 = tpu.matmul %358, %4, %cst_113 {dimension_numbers = #tpu.dot_dimension_numbers<[1], [0], [0], [1], [0, 0, 1, 1], [], []>} : vector<16x256xbf16>, vector<256x128xbf16>, vector<16x128xf32> -> vector<16x128xf32>
    %360 = vector.broadcast %5 : vector<1x128xf32> to vector<16x128xf32>
    %361 = arith.addf %359, %360 : vector<16x128xf32>
    %362 = arith.addf %361, %3 : vector<16x128xf32>
    %cst_114 = arith.constant 0.000000e+00 : f32
    %363 = vector.broadcast %cst_114 : f32 to vector<16x128xf32>
    %364 = arith.maximumf %362, %363 : vector<16x128xf32>
    %365 = arith.truncf %364 : vector<16x128xf32> to vector<16x128xbf16>
    %c16_i32_115 = arith.constant 16 : i32
    %366 = arith.cmpi slt, %351, %c16_i32_115 : i32
    %367 = arith.extui %366 : i1 to i32
    %368 = arith.sitofp %367 : i32 to f32
    %369 = vector.broadcast %368 : f32 to vector<16x128xf32>
    %370 = arith.mulf %364, %369 : vector<16x128xf32>
    %371 = arith.addf %349, %370 : vector<16x128xf32>
    %c16_i32_116 = arith.constant 16 : i32
    %372 = arith.muli %arg1, %c16_i32_116 : i32
    %c12_i32_117 = arith.constant 12 : i32
    %373 = arith.addi %372, %c12_i32_117 : i32
    %374 = vector.extract_strided_slice %106 {offsets = [0, 1536], sizes = [16, 128], strides = [1, 1]} : vector<16x2048xf32> to vector<16x128xf32>
    %375 = vector.broadcast %373 : i32 to vector<16x128xi32>
    %376 = arith.cmpi eq, %8, %375 : vector<16x128xi32>
    %cst_118 = arith.constant 0.000000e+00 : f32
    %377 = vector.broadcast %cst_118 : f32 to vector<16x128xf32>
    %378 = arith.select %376, %377, %374 : vector<16x128xi1>, vector<16x128xf32>
    %379 = arith.truncf %378 : vector<16x128xf32> to vector<16x128xbf16>
    %380 = tpu.concatenate %379, %7 in 1 : vector<16x128xbf16>, vector<16x128xbf16> -> vector<16x256xbf16>
    %cst_119 = arith.constant dense<0.000000e+00> : vector<16x128xf32>
    %381 = tpu.matmul %380, %4, %cst_119 {dimension_numbers = #tpu.dot_dimension_numbers<[1], [0], [0], [1], [0, 0, 1, 1], [], []>} : vector<16x256xbf16>, vector<256x128xbf16>, vector<16x128xf32> -> vector<16x128xf32>
    %382 = vector.broadcast %5 : vector<1x128xf32> to vector<16x128xf32>
    %383 = arith.addf %381, %382 : vector<16x128xf32>
    %384 = arith.addf %383, %3 : vector<16x128xf32>
    %cst_120 = arith.constant 0.000000e+00 : f32
    %385 = vector.broadcast %cst_120 : f32 to vector<16x128xf32>
    %386 = arith.maximumf %384, %385 : vector<16x128xf32>
    %387 = arith.truncf %386 : vector<16x128xf32> to vector<16x128xbf16>
    %c16_i32_121 = arith.constant 16 : i32
    %388 = arith.cmpi slt, %373, %c16_i32_121 : i32
    %389 = arith.extui %388 : i1 to i32
    %390 = arith.sitofp %389 : i32 to f32
    %391 = vector.broadcast %390 : f32 to vector<16x128xf32>
    %392 = arith.mulf %386, %391 : vector<16x128xf32>
    %393 = arith.addf %371, %392 : vector<16x128xf32>
    %c16_i32_122 = arith.constant 16 : i32
    %394 = arith.muli %arg1, %c16_i32_122 : i32
    %c13_i32_123 = arith.constant 13 : i32
    %395 = arith.addi %394, %c13_i32_123 : i32
    %396 = vector.extract_strided_slice %106 {offsets = [0, 1664], sizes = [16, 128], strides = [1, 1]} : vector<16x2048xf32> to vector<16x128xf32>
    %397 = vector.broadcast %395 : i32 to vector<16x128xi32>
    %398 = arith.cmpi eq, %8, %397 : vector<16x128xi32>
    %cst_124 = arith.constant 0.000000e+00 : f32
    %399 = vector.broadcast %cst_124 : f32 to vector<16x128xf32>
    %400 = arith.select %398, %399, %396 : vector<16x128xi1>, vector<16x128xf32>
    %401 = arith.truncf %400 : vector<16x128xf32> to vector<16x128xbf16>
    %402 = tpu.concatenate %401, %7 in 1 : vector<16x128xbf16>, vector<16x128xbf16> -> vector<16x256xbf16>
    %cst_125 = arith.constant dense<0.000000e+00> : vector<16x128xf32>
    %403 = tpu.matmul %402, %4, %cst_125 {dimension_numbers = #tpu.dot_dimension_numbers<[1], [0], [0], [1], [0, 0, 1, 1], [], []>} : vector<16x256xbf16>, vector<256x128xbf16>, vector<16x128xf32> -> vector<16x128xf32>
    %404 = vector.broadcast %5 : vector<1x128xf32> to vector<16x128xf32>
    %405 = arith.addf %403, %404 : vector<16x128xf32>
    %406 = arith.addf %405, %3 : vector<16x128xf32>
    %cst_126 = arith.constant 0.000000e+00 : f32
    %407 = vector.broadcast %cst_126 : f32 to vector<16x128xf32>
    %408 = arith.maximumf %406, %407 : vector<16x128xf32>
    %409 = arith.truncf %408 : vector<16x128xf32> to vector<16x128xbf16>
    %c16_i32_127 = arith.constant 16 : i32
    %410 = arith.cmpi slt, %395, %c16_i32_127 : i32
    %411 = arith.extui %410 : i1 to i32
    %412 = arith.sitofp %411 : i32 to f32
    %413 = vector.broadcast %412 : f32 to vector<16x128xf32>
    %414 = arith.mulf %408, %413 : vector<16x128xf32>
    %415 = arith.addf %393, %414 : vector<16x128xf32>
    %c16_i32_128 = arith.constant 16 : i32
    %416 = arith.muli %arg1, %c16_i32_128 : i32
    %c14_i32_129 = arith.constant 14 : i32
    %417 = arith.addi %416, %c14_i32_129 : i32
    %418 = vector.extract_strided_slice %106 {offsets = [0, 1792], sizes = [16, 128], strides = [1, 1]} : vector<16x2048xf32> to vector<16x128xf32>
    %419 = vector.broadcast %417 : i32 to vector<16x128xi32>
    %420 = arith.cmpi eq, %8, %419 : vector<16x128xi32>
    %cst_130 = arith.constant 0.000000e+00 : f32
    %421 = vector.broadcast %cst_130 : f32 to vector<16x128xf32>
    %422 = arith.select %420, %421, %418 : vector<16x128xi1>, vector<16x128xf32>
    %423 = arith.truncf %422 : vector<16x128xf32> to vector<16x128xbf16>
    %424 = tpu.concatenate %423, %7 in 1 : vector<16x128xbf16>, vector<16x128xbf16> -> vector<16x256xbf16>
    %cst_131 = arith.constant dense<0.000000e+00> : vector<16x128xf32>
    %425 = tpu.matmul %424, %4, %cst_131 {dimension_numbers = #tpu.dot_dimension_numbers<[1], [0], [0], [1], [0, 0, 1, 1], [], []>} : vector<16x256xbf16>, vector<256x128xbf16>, vector<16x128xf32> -> vector<16x128xf32>
    %426 = vector.broadcast %5 : vector<1x128xf32> to vector<16x128xf32>
    %427 = arith.addf %425, %426 : vector<16x128xf32>
    %428 = arith.addf %427, %3 : vector<16x128xf32>
    %cst_132 = arith.constant 0.000000e+00 : f32
    %429 = vector.broadcast %cst_132 : f32 to vector<16x128xf32>
    %430 = arith.maximumf %428, %429 : vector<16x128xf32>
    %431 = arith.truncf %430 : vector<16x128xf32> to vector<16x128xbf16>
    %c16_i32_133 = arith.constant 16 : i32
    %432 = arith.cmpi slt, %417, %c16_i32_133 : i32
    %433 = arith.extui %432 : i1 to i32
    %434 = arith.sitofp %433 : i32 to f32
    %435 = vector.broadcast %434 : f32 to vector<16x128xf32>
    %436 = arith.mulf %430, %435 : vector<16x128xf32>
    %437 = arith.addf %415, %436 : vector<16x128xf32>
    %c16_i32_134 = arith.constant 16 : i32
    %438 = arith.muli %arg1, %c16_i32_134 : i32
    %c15_i32_135 = arith.constant 15 : i32
    %439 = arith.addi %438, %c15_i32_135 : i32
    %440 = vector.extract_strided_slice %106 {offsets = [0, 1920], sizes = [16, 128], strides = [1, 1]} : vector<16x2048xf32> to vector<16x128xf32>
    %441 = vector.broadcast %439 : i32 to vector<16x128xi32>
    %442 = arith.cmpi eq, %8, %441 : vector<16x128xi32>
    %cst_136 = arith.constant 0.000000e+00 : f32
    %443 = vector.broadcast %cst_136 : f32 to vector<16x128xf32>
    %444 = arith.select %442, %443, %440 : vector<16x128xi1>, vector<16x128xf32>
    %445 = arith.truncf %444 : vector<16x128xf32> to vector<16x128xbf16>
    %446 = tpu.concatenate %445, %7 in 1 : vector<16x128xbf16>, vector<16x128xbf16> -> vector<16x256xbf16>
    %cst_137 = arith.constant dense<0.000000e+00> : vector<16x128xf32>
    %447 = tpu.matmul %446, %4, %cst_137 {dimension_numbers = #tpu.dot_dimension_numbers<[1], [0], [0], [1], [0, 0, 1, 1], [], []>} : vector<16x256xbf16>, vector<256x128xbf16>, vector<16x128xf32> -> vector<16x128xf32>
    %448 = vector.broadcast %5 : vector<1x128xf32> to vector<16x128xf32>
    %449 = arith.addf %447, %448 : vector<16x128xf32>
    %450 = arith.addf %449, %3 : vector<16x128xf32>
    %cst_138 = arith.constant 0.000000e+00 : f32
    %451 = vector.broadcast %cst_138 : f32 to vector<16x128xf32>
    %452 = arith.maximumf %450, %451 : vector<16x128xf32>
    %453 = arith.truncf %452 : vector<16x128xf32> to vector<16x128xbf16>
    %c16_i32_139 = arith.constant 16 : i32
    %454 = arith.cmpi slt, %439, %c16_i32_139 : i32
    %455 = arith.extui %454 : i1 to i32
    %456 = arith.sitofp %455 : i32 to f32
    %457 = vector.broadcast %456 : f32 to vector<16x128xf32>
    %458 = arith.mulf %452, %457 : vector<16x128xf32>
    %459 = arith.addf %437, %458 : vector<16x128xf32>
    %460 = tpu.concatenate %123, %145, %167, %189, %211, %233, %255, %277, %299, %321, %343, %365, %387, %409, %431, %453 in 1 : vector<16x128xbf16>, vector<16x128xbf16>, vector<16x128xbf16>, vector<16x128xbf16>, vector<16x128xbf16>, vector<16x128xbf16>, vector<16x128xbf16>, vector<16x128xbf16>, vector<16x128xbf16>, vector<16x128xbf16>, vector<16x128xbf16>, vector<16x128xbf16>, vector<16x128xbf16>, vector<16x128xbf16>, vector<16x128xbf16>, vector<16x128xbf16> -> vector<16x2048xbf16>
    %c0_140 = arith.constant 0 : index
    %c0_141 = arith.constant 0 : index
    %c0_142 = arith.constant 0 : index
    %461 = vector.load %arg7[%c0_140, %c0_141, %c0_142] : memref<1x16x2048xbf16, #tpu.memory_space<vmem>>, vector<1x16x2048xbf16>
    %462 = vector.shape_cast %461 : vector<1x16x2048xbf16> to vector<16x2048xbf16>
    %463 = vector.shape_cast %460 : vector<16x2048xbf16> to vector<1x16x2048xbf16>
    tpu.vector_store %arg7[%c0_140, %c0_141, %c0_142], %463 {strides = array<i32>} : memref<1x16x2048xbf16, #tpu.memory_space<vmem>>, vector<1x16x2048xbf16>,
    %c0_143 = arith.constant 0 : index
    %c0_144 = arith.constant 0 : index
    %c0_145 = arith.constant 0 : index
    %c0_146 = arith.constant 0 : index
    %464 = vector.load %arg8[%c0_143, %c0_144, %c0_145, %c0_146] : memref<1x1x16x128xf32, #tpu.memory_space<vmem>>, vector<1x1x16x128xf32>
    %465 = vector.shape_cast %464 : vector<1x1x16x128xf32> to vector<16x128xf32>
    %466 = vector.shape_cast %459 : vector<16x128xf32> to vector<1x1x16x128xf32>
    tpu.vector_store %arg8[%c0_143, %c0_144, %c0_145, %c0_146], %466 {strides = array<i32>} : memref<1x1x16x128xf32, #tpu.memory_space<vmem>>, vector<1x1x16x128xf32>,
    return
  }
  func.func @transform_0(%arg0: i32, %arg1: i32) -> (i32, i32, i32) {
    %c0_i32 = arith.constant 0 : i32
    %c0_i32_0 = arith.constant 0 : i32
    %c0_i32_1 = arith.constant 0 : i32
    return %arg0, %c0_i32, %c0_i32_0 : i32, i32, i32
  }
  func.func @transform_1(%arg0: i32, %arg1: i32) -> (i32, i32, i32) {
    %c0_i32 = arith.constant 0 : i32
    %c0_i32_0 = arith.constant 0 : i32
    %c0_i32_1 = arith.constant 0 : i32
    return %arg0, %c0_i32, %c0_i32_0 : i32, i32, i32
  }
  func.func @transform_2(%arg0: i32, %arg1: i32) -> (i32, i32, i32) {
    %c0_i32 = arith.constant 0 : i32
    %c0_i32_0 = arith.constant 0 : i32
    %c0_i32_1 = arith.constant 0 : i32
    return %arg0, %c0_i32, %c0_i32_0 : i32, i32, i32
  }
  func.func @transform_3(%arg0: i32, %arg1: i32) -> (i32, i32) {
    %c0_i32 = arith.constant 0 : i32
    %c0_i32_0 = arith.constant 0 : i32
    %c0_i32_1 = arith.constant 0 : i32
    return %c0_i32, %c0_i32_0 : i32, i32
  }
  func.func @transform_4(%arg0: i32, %arg1: i32) -> (i32, i32) {
    %c0_i32 = arith.constant 0 : i32
    %c0_i32_0 = arith.constant 0 : i32
    %c0_i32_1 = arith.constant 0 : i32
    return %c0_i32, %c0_i32_0 : i32, i32
  }
  func.func @transform_5(%arg0: i32, %arg1: i32) -> (i32, i32, i32) {
    %c0_i32 = arith.constant 0 : i32
    %c0_i32_0 = arith.constant 0 : i32
    return %arg0, %c0_i32, %arg1 : i32, i32, i32
  }
  func.func @transform_6(%arg0: i32, %arg1: i32) -> (i32, i32, i32, i32) {
    %c0_i32 = arith.constant 0 : i32
    %c0_i32_0 = arith.constant 0 : i32
    %c0_i32_1 = arith.constant 0 : i32
    return %arg0, %arg1, %c0_i32, %c0_i32_0 : i32, i32, i32, i32
  }
}

module attributes {stable_mosaic.version = 11 : i64} {
  func.func @h2_kernel(%arg0: i32, %arg1: memref<1x1x16x128xf32, #tpu.memory_space<vmem>>, %arg2: memref<1x16x16xbf16, #tpu.memory_space<vmem>>, %arg3: memref<256x128xbf16, #tpu.memory_space<vmem>>, %arg4: memref<1x128xf32, #tpu.memory_space<vmem>>, %arg5: memref<1x16x128xf32, #tpu.memory_space<vmem>>) attributes {dimension_semantics = [#tpu.dimension_semantics<parallel>], iteration_bounds = array<i64: 2>, scalar_prefetch = 0 : i64, scratch_operands = 0 : i64, tpu.core_type = #tpu.core_type<tc>, window_params = [{transform_indices = @transform_0, window_bounds = array<i64: 1, 1, 16, 128>}, {transform_indices = @transform_1, window_bounds = array<i64: 1, 16, 16>}, {pipeline_mode = #tpu.pipeline_mode<synchronous>, transform_indices = @transform_2, window_bounds = array<i64: 256, 128>}, {pipeline_mode = #tpu.pipeline_mode<synchronous>, transform_indices = @transform_3, window_bounds = array<i64: 1, 128>}, {transform_indices = @transform_4, window_bounds = array<i64: 1, 16, 128>}]} {
    %c0 = arith.constant 0 : index
    %c0_0 = arith.constant 0 : index
    %c0_1 = arith.constant 0 : index
    %c0_2 = arith.constant 0 : index
    %0 = vector.load %arg1[%c0, %c0_0, %c0_1, %c0_2] : memref<1x1x16x128xf32, #tpu.memory_space<vmem>>, vector<1x1x16x128xf32>
    %1 = vector.shape_cast %0 : vector<1x1x16x128xf32> to vector<1x16x128xf32>
    %cst = arith.constant dense<0.000000e+00> : vector<16x128xf32>
    %2 = vector.multi_reduction <add>, %1, %cst [0] : vector<1x16x128xf32> to vector<16x128xf32>
    %cst_3 = arith.constant 6.250000e-02 : f32
    %3 = vector.broadcast %cst_3 : f32 to vector<16x128xf32>
    %4 = arith.mulf %2, %3 : vector<16x128xf32>
    %5 = arith.truncf %4 : vector<16x128xf32> to vector<16x128xbf16>
    %c0_4 = arith.constant 0 : index
    %c0_5 = arith.constant 0 : index
    %c0_6 = arith.constant 0 : index
    %6 = vector.load %arg2[%c0_4, %c0_5, %c0_6] : memref<1x16x16xbf16, #tpu.memory_space<vmem>>, vector<1x16x16xbf16>
    %7 = vector.shape_cast %6 : vector<1x16x16xbf16> to vector<16x16xbf16>
    %cst_7 = arith.constant dense<0.000000e+00> : vector<16x128xf32>
    %8 = tpu.matmul %7, %5, %cst_7 {dimension_numbers = #tpu.dot_dimension_numbers<[1], [0], [0], [1], [0, 0, 1, 1], [], []>} : vector<16x16xbf16>, vector<16x128xbf16>, vector<16x128xf32> -> vector<16x128xf32>
    %9 = arith.truncf %8 : vector<16x128xf32> to vector<16x128xbf16>
    %10 = tpu.concatenate %9, %5 in 1 : vector<16x128xbf16>, vector<16x128xbf16> -> vector<16x256xbf16>
    %c0_8 = arith.constant 0 : index
    %c0_9 = arith.constant 0 : index
    %11 = vector.load %arg3[%c0_8, %c0_9] : memref<256x128xbf16, #tpu.memory_space<vmem>>, vector<256x128xbf16>
    %cst_10 = arith.constant dense<0.000000e+00> : vector<16x128xf32>
    %12 = tpu.matmul %10, %11, %cst_10 {dimension_numbers = #tpu.dot_dimension_numbers<[1], [0], [0], [1], [0, 0, 1, 1], [], []>} : vector<16x256xbf16>, vector<256x128xbf16>, vector<16x128xf32> -> vector<16x128xf32>
    %c0_11 = arith.constant 0 : index
    %c0_12 = arith.constant 0 : index
    %13 = vector.load %arg4[%c0_11, %c0_12] : memref<1x128xf32, #tpu.memory_space<vmem>>, vector<1x128xf32>
    %14 = vector.broadcast %13 : vector<1x128xf32> to vector<16x128xf32>
    %15 = arith.addf %12, %14 : vector<16x128xf32>
    %c0_13 = arith.constant 0 : index
    %c0_14 = arith.constant 0 : index
    %c0_15 = arith.constant 0 : index
    %16 = vector.load %arg5[%c0_13, %c0_14, %c0_15] : memref<1x16x128xf32, #tpu.memory_space<vmem>>, vector<1x16x128xf32>
    %17 = vector.shape_cast %16 : vector<1x16x128xf32> to vector<16x128xf32>
    %18 = vector.shape_cast %15 : vector<16x128xf32> to vector<1x16x128xf32>
    tpu.vector_store %arg5[%c0_13, %c0_14, %c0_15], %18 {strides = array<i32>} : memref<1x16x128xf32, #tpu.memory_space<vmem>>, vector<1x16x128xf32>,
    return
  }
  func.func @transform_0(%arg0: i32) -> (i32, i32, i32, i32) {
    %c0_i32 = arith.constant 0 : i32
    %c0_i32_0 = arith.constant 0 : i32
    %c0_i32_1 = arith.constant 0 : i32
    %c0_i32_2 = arith.constant 0 : i32
    return %arg0, %c0_i32, %c0_i32_0, %c0_i32_1 : i32, i32, i32, i32
  }
  func.func @transform_1(%arg0: i32) -> (i32, i32, i32) {
    %c0_i32 = arith.constant 0 : i32
    %c0_i32_0 = arith.constant 0 : i32
    %c0_i32_1 = arith.constant 0 : i32
    return %arg0, %c0_i32, %c0_i32_0 : i32, i32, i32
  }
  func.func @transform_2(%arg0: i32) -> (i32, i32) {
    %c0_i32 = arith.constant 0 : i32
    %c0_i32_0 = arith.constant 0 : i32
    %c0_i32_1 = arith.constant 0 : i32
    return %c0_i32, %c0_i32_0 : i32, i32
  }
  func.func @transform_3(%arg0: i32) -> (i32, i32) {
    %c0_i32 = arith.constant 0 : i32
    %c0_i32_0 = arith.constant 0 : i32
    %c0_i32_1 = arith.constant 0 : i32
    return %c0_i32, %c0_i32_0 : i32, i32
  }
  func.func @transform_4(%arg0: i32) -> (i32, i32, i32) {
    %c0_i32 = arith.constant 0 : i32
    %c0_i32_0 = arith.constant 0 : i32
    %c0_i32_1 = arith.constant 0 : i32
    return %arg0, %c0_i32, %c0_i32_0 : i32, i32, i32
  }
}

module attributes {stable_mosaic.version = 11 : i64} {
  func.func @h2_kernel(%arg0: i32, %arg1: memref<1x1x16x128xf32, #tpu.memory_space<vmem>>, %arg2: memref<1x16x16xbf16, #tpu.memory_space<vmem>>, %arg3: memref<256x128xbf16, #tpu.memory_space<vmem>>, %arg4: memref<1x128xf32, #tpu.memory_space<vmem>>, %arg5: memref<1x16x128xf32, #tpu.memory_space<vmem>>) attributes {dimension_semantics = [#tpu.dimension_semantics<parallel>], iteration_bounds = array<i64: 2>, scalar_prefetch = 0 : i64, scratch_operands = 0 : i64, tpu.core_type = #tpu.core_type<tc>, window_params = [{transform_indices = @transform_0, window_bounds = array<i64: 1, 1, 16, 128>}, {transform_indices = @transform_1, window_bounds = array<i64: 1, 16, 16>}, {pipeline_mode = #tpu.pipeline_mode<synchronous>, transform_indices = @transform_2, window_bounds = array<i64: 256, 128>}, {pipeline_mode = #tpu.pipeline_mode<synchronous>, transform_indices = @transform_3, window_bounds = array<i64: 1, 128>}, {transform_indices = @transform_4, window_bounds = array<i64: 1, 16, 128>}]} {
    %c0 = arith.constant 0 : index
    %c0_0 = arith.constant 0 : index
    %c0_1 = arith.constant 0 : index
    %c0_2 = arith.constant 0 : index
    %0 = vector.load %arg1[%c0, %c0_0, %c0_1, %c0_2] : memref<1x1x16x128xf32, #tpu.memory_space<vmem>>, vector<1x1x16x128xf32>
    %1 = vector.shape_cast %0 : vector<1x1x16x128xf32> to vector<1x16x128xf32>
    %cst = arith.constant dense<0.000000e+00> : vector<16x128xf32>
    %2 = vector.multi_reduction <add>, %1, %cst [0] : vector<1x16x128xf32> to vector<16x128xf32>
    %cst_3 = arith.constant 1.000000e+00 : f32
    %3 = vector.broadcast %cst_3 : f32 to vector<16x128xf32>
    %4 = arith.mulf %2, %3 : vector<16x128xf32>
    %5 = arith.truncf %4 : vector<16x128xf32> to vector<16x128xbf16>
    %c0_4 = arith.constant 0 : index
    %c0_5 = arith.constant 0 : index
    %c0_6 = arith.constant 0 : index
    %6 = vector.load %arg2[%c0_4, %c0_5, %c0_6] : memref<1x16x16xbf16, #tpu.memory_space<vmem>>, vector<1x16x16xbf16>
    %7 = vector.shape_cast %6 : vector<1x16x16xbf16> to vector<16x16xbf16>
    %cst_7 = arith.constant dense<0.000000e+00> : vector<16x128xf32>
    %8 = tpu.matmul %7, %5, %cst_7 {dimension_numbers = #tpu.dot_dimension_numbers<[1], [0], [0], [1], [0, 0, 1, 1], [], []>} : vector<16x16xbf16>, vector<16x128xbf16>, vector<16x128xf32> -> vector<16x128xf32>
    %9 = arith.truncf %8 : vector<16x128xf32> to vector<16x128xbf16>
    %10 = tpu.concatenate %9, %5 in 1 : vector<16x128xbf16>, vector<16x128xbf16> -> vector<16x256xbf16>
    %c0_8 = arith.constant 0 : index
    %c0_9 = arith.constant 0 : index
    %11 = vector.load %arg3[%c0_8, %c0_9] : memref<256x128xbf16, #tpu.memory_space<vmem>>, vector<256x128xbf16>
    %cst_10 = arith.constant dense<0.000000e+00> : vector<16x128xf32>
    %12 = tpu.matmul %10, %11, %cst_10 {dimension_numbers = #tpu.dot_dimension_numbers<[1], [0], [0], [1], [0, 0, 1, 1], [], []>} : vector<16x256xbf16>, vector<256x128xbf16>, vector<16x128xf32> -> vector<16x128xf32>
    %c0_11 = arith.constant 0 : index
    %c0_12 = arith.constant 0 : index
    %13 = vector.load %arg4[%c0_11, %c0_12] : memref<1x128xf32, #tpu.memory_space<vmem>>, vector<1x128xf32>
    %14 = vector.broadcast %13 : vector<1x128xf32> to vector<16x128xf32>
    %15 = arith.addf %12, %14 : vector<16x128xf32>
    %c0_13 = arith.constant 0 : index
    %c0_14 = arith.constant 0 : index
    %c0_15 = arith.constant 0 : index
    %16 = vector.load %arg5[%c0_13, %c0_14, %c0_15] : memref<1x16x128xf32, #tpu.memory_space<vmem>>, vector<1x16x128xf32>
    %17 = vector.shape_cast %16 : vector<1x16x128xf32> to vector<16x128xf32>
    %18 = vector.shape_cast %15 : vector<16x128xf32> to vector<1x16x128xf32>
    tpu.vector_store %arg5[%c0_13, %c0_14, %c0_15], %18 {strides = array<i32>} : memref<1x16x128xf32, #tpu.memory_space<vmem>>, vector<1x16x128xf32>,
    return
  }
  func.func @transform_0(%arg0: i32) -> (i32, i32, i32, i32) {
    %c0_i32 = arith.constant 0 : i32
    %c0_i32_0 = arith.constant 0 : i32
    %c0_i32_1 = arith.constant 0 : i32
    %c0_i32_2 = arith.constant 0 : i32
    return %arg0, %c0_i32, %c0_i32_0, %c0_i32_1 : i32, i32, i32, i32
  }
  func.func @transform_1(%arg0: i32) -> (i32, i32, i32) {
    %c0_i32 = arith.constant 0 : i32
    %c0_i32_0 = arith.constant 0 : i32
    %c0_i32_1 = arith.constant 0 : i32
    return %arg0, %c0_i32, %c0_i32_0 : i32, i32, i32
  }
  func.func @transform_2(%arg0: i32) -> (i32, i32) {
    %c0_i32 = arith.constant 0 : i32
    %c0_i32_0 = arith.constant 0 : i32
    %c0_i32_1 = arith.constant 0 : i32
    return %c0_i32, %c0_i32_0 : i32, i32
  }
  func.func @transform_3(%arg0: i32) -> (i32, i32) {
    %c0_i32 = arith.constant 0 : i32
    %c0_i32_0 = arith.constant 0 : i32
    %c0_i32_1 = arith.constant 0 : i32
    return %c0_i32, %c0_i32_0 : i32, i32
  }
  func.func @transform_4(%arg0: i32) -> (i32, i32, i32) {
    %c0_i32 = arith.constant 0 : i32
    %c0_i32_0 = arith.constant 0 : i32
    %c0_i32_1 = arith.constant 0 : i32
    return %arg0, %c0_i32, %c0_i32_0 : i32, i32, i32
  }
}

module attributes {stable_mosaic.version = 11 : i64} {
  func.func @dss_layer_kernel(%arg0: i32, %arg1: i32, %arg2: memref<1x16x2048xbf16, #tpu.memory_space<vmem>>, %arg3: memref<1x16x16xbf16, #tpu.memory_space<vmem>>, %arg4: memref<1x16x128xf32, #tpu.memory_space<vmem>>, %arg5: memref<256x128xbf16, #tpu.memory_space<vmem>>, %arg6: memref<1x128xf32, #tpu.memory_space<vmem>>, %arg7: memref<1x1x16x128xf32, #tpu.memory_space<vmem>>) attributes {dimension_semantics = [#tpu.dimension_semantics<parallel>, #tpu.dimension_semantics<parallel>], iteration_bounds = array<i64: 2, 1>, scalar_prefetch = 0 : i64, scratch_operands = 0 : i64, tpu.core_type = #tpu.core_type<tc>, window_params = [{transform_indices = @transform_0, window_bounds = array<i64: 1, 16, 2048>}, {transform_indices = @transform_1, window_bounds = array<i64: 1, 16, 16>}, {transform_indices = @transform_2, window_bounds = array<i64: 1, 16, 128>}, {pipeline_mode = #tpu.pipeline_mode<synchronous>, transform_indices = @transform_3, window_bounds = array<i64: 256, 128>}, {pipeline_mode = #tpu.pipeline_mode<synchronous>, transform_indices = @transform_4, window_bounds = array<i64: 1, 128>}, {transform_indices = @transform_5, window_bounds = array<i64: 1, 1, 16, 128>}]} {
    %c0 = arith.constant 0 : index
    %c0_0 = arith.constant 0 : index
    %c0_1 = arith.constant 0 : index
    %0 = vector.load %arg3[%c0, %c0_0, %c0_1] : memref<1x16x16xbf16, #tpu.memory_space<vmem>>, vector<1x16x16xbf16>
    %1 = vector.shape_cast %0 : vector<1x16x16xbf16> to vector<16x16xbf16>
    %c0_2 = arith.constant 0 : index
    %c0_3 = arith.constant 0 : index
    %c0_4 = arith.constant 0 : index
    %2 = vector.load %arg4[%c0_2, %c0_3, %c0_4] : memref<1x16x128xf32, #tpu.memory_space<vmem>>, vector<1x16x128xf32>
    %3 = vector.shape_cast %2 : vector<1x16x128xf32> to vector<16x128xf32>
    %c0_5 = arith.constant 0 : index
    %c0_6 = arith.constant 0 : index
    %4 = vector.load %arg5[%c0_5, %c0_6] : memref<256x128xbf16, #tpu.memory_space<vmem>>, vector<256x128xbf16>
    %c0_7 = arith.constant 0 : index
    %c0_8 = arith.constant 0 : index
    %5 = vector.load %arg6[%c0_7, %c0_8] : memref<1x128xf32, #tpu.memory_space<vmem>>, vector<1x128xf32>
    %c0_9 = arith.constant 0 : index
    %c0_10 = arith.constant 0 : index
    %c0_11 = arith.constant 0 : index
    %6 = vector.load %arg2[%c0_9, %c0_10, %c0_11] : memref<1x16x2048xbf16, #tpu.memory_space<vmem>>, vector<1x16x2048xbf16>
    %7 = vector.shape_cast %6 : vector<1x16x2048xbf16> to vector<16x2048xbf16>
    %8 = tpu.iota {dimensions = array<i32: 0>} : vector<16x128xi32>
    %c16_i32 = arith.constant 16 : i32
    %9 = arith.muli %arg1, %c16_i32 : i32
    %c0_i32 = arith.constant 0 : i32
    %10 = arith.addi %9, %c0_i32 : i32
    %11 = vector.extract_strided_slice %7 {offsets = [0, 0], sizes = [16, 128], strides = [1, 1]} : vector<16x2048xbf16> to vector<16x128xbf16>
    %12 = vector.broadcast %10 : i32 to vector<16x128xi32>
    %13 = arith.cmpi eq, %8, %12 : vector<16x128xi32>
    %cst = arith.constant 0.000000e+00 : bf16
    %14 = vector.broadcast %cst : bf16 to vector<16x128xbf16>
    %15 = arith.select %13, %14, %11 : vector<16x128xi1>, vector<16x128xbf16>
    %c16_i32_12 = arith.constant 16 : i32
    %16 = arith.muli %arg1, %c16_i32_12 : i32
    %c1_i32 = arith.constant 1 : i32
    %17 = arith.addi %16, %c1_i32 : i32
    %18 = vector.extract_strided_slice %7 {offsets = [0, 128], sizes = [16, 128], strides = [1, 1]} : vector<16x2048xbf16> to vector<16x128xbf16>
    %19 = vector.broadcast %17 : i32 to vector<16x128xi32>
    %20 = arith.cmpi eq, %8, %19 : vector<16x128xi32>
    %cst_13 = arith.constant 0.000000e+00 : bf16
    %21 = vector.broadcast %cst_13 : bf16 to vector<16x128xbf16>
    %22 = arith.select %20, %21, %18 : vector<16x128xi1>, vector<16x128xbf16>
    %c16_i32_14 = arith.constant 16 : i32
    %23 = arith.muli %arg1, %c16_i32_14 : i32
    %c2_i32 = arith.constant 2 : i32
    %24 = arith.addi %23, %c2_i32 : i32
    %25 = vector.extract_strided_slice %7 {offsets = [0, 256], sizes = [16, 128], strides = [1, 1]} : vector<16x2048xbf16> to vector<16x128xbf16>
    %26 = vector.broadcast %24 : i32 to vector<16x128xi32>
    %27 = arith.cmpi eq, %8, %26 : vector<16x128xi32>
    %cst_15 = arith.constant 0.000000e+00 : bf16
    %28 = vector.broadcast %cst_15 : bf16 to vector<16x128xbf16>
    %29 = arith.select %27, %28, %25 : vector<16x128xi1>, vector<16x128xbf16>
    %c16_i32_16 = arith.constant 16 : i32
    %30 = arith.muli %arg1, %c16_i32_16 : i32
    %c3_i32 = arith.constant 3 : i32
    %31 = arith.addi %30, %c3_i32 : i32
    %32 = vector.extract_strided_slice %7 {offsets = [0, 384], sizes = [16, 128], strides = [1, 1]} : vector<16x2048xbf16> to vector<16x128xbf16>
    %33 = vector.broadcast %31 : i32 to vector<16x128xi32>
    %34 = arith.cmpi eq, %8, %33 : vector<16x128xi32>
    %cst_17 = arith.constant 0.000000e+00 : bf16
    %35 = vector.broadcast %cst_17 : bf16 to vector<16x128xbf16>
    %36 = arith.select %34, %35, %32 : vector<16x128xi1>, vector<16x128xbf16>
    %c16_i32_18 = arith.constant 16 : i32
    %37 = arith.muli %arg1, %c16_i32_18 : i32
    %c4_i32 = arith.constant 4 : i32
    %38 = arith.addi %37, %c4_i32 : i32
    %39 = vector.extract_strided_slice %7 {offsets = [0, 512], sizes = [16, 128], strides = [1, 1]} : vector<16x2048xbf16> to vector<16x128xbf16>
    %40 = vector.broadcast %38 : i32 to vector<16x128xi32>
    %41 = arith.cmpi eq, %8, %40 : vector<16x128xi32>
    %cst_19 = arith.constant 0.000000e+00 : bf16
    %42 = vector.broadcast %cst_19 : bf16 to vector<16x128xbf16>
    %43 = arith.select %41, %42, %39 : vector<16x128xi1>, vector<16x128xbf16>
    %c16_i32_20 = arith.constant 16 : i32
    %44 = arith.muli %arg1, %c16_i32_20 : i32
    %c5_i32 = arith.constant 5 : i32
    %45 = arith.addi %44, %c5_i32 : i32
    %46 = vector.extract_strided_slice %7 {offsets = [0, 640], sizes = [16, 128], strides = [1, 1]} : vector<16x2048xbf16> to vector<16x128xbf16>
    %47 = vector.broadcast %45 : i32 to vector<16x128xi32>
    %48 = arith.cmpi eq, %8, %47 : vector<16x128xi32>
    %cst_21 = arith.constant 0.000000e+00 : bf16
    %49 = vector.broadcast %cst_21 : bf16 to vector<16x128xbf16>
    %50 = arith.select %48, %49, %46 : vector<16x128xi1>, vector<16x128xbf16>
    %c16_i32_22 = arith.constant 16 : i32
    %51 = arith.muli %arg1, %c16_i32_22 : i32
    %c6_i32 = arith.constant 6 : i32
    %52 = arith.addi %51, %c6_i32 : i32
    %53 = vector.extract_strided_slice %7 {offsets = [0, 768], sizes = [16, 128], strides = [1, 1]} : vector<16x2048xbf16> to vector<16x128xbf16>
    %54 = vector.broadcast %52 : i32 to vector<16x128xi32>
    %55 = arith.cmpi eq, %8, %54 : vector<16x128xi32>
    %cst_23 = arith.constant 0.000000e+00 : bf16
    %56 = vector.broadcast %cst_23 : bf16 to vector<16x128xbf16>
    %57 = arith.select %55, %56, %53 : vector<16x128xi1>, vector<16x128xbf16>
    %c16_i32_24 = arith.constant 16 : i32
    %58 = arith.muli %arg1, %c16_i32_24 : i32
    %c7_i32 = arith.constant 7 : i32
    %59 = arith.addi %58, %c7_i32 : i32
    %60 = vector.extract_strided_slice %7 {offsets = [0, 896], sizes = [16, 128], strides = [1, 1]} : vector<16x2048xbf16> to vector<16x128xbf16>
    %61 = vector.broadcast %59 : i32 to vector<16x128xi32>
    %62 = arith.cmpi eq, %8, %61 : vector<16x128xi32>
    %cst_25 = arith.constant 0.000000e+00 : bf16
    %63 = vector.broadcast %cst_25 : bf16 to vector<16x128xbf16>
    %64 = arith.select %62, %63, %60 : vector<16x128xi1>, vector<16x128xbf16>
    %c16_i32_26 = arith.constant 16 : i32
    %65 = arith.muli %arg1, %c16_i32_26 : i32
    %c8_i32 = arith.constant 8 : i32
    %66 = arith.addi %65, %c8_i32 : i32
    %67 = vector.extract_strided_slice %7 {offsets = [0, 1024], sizes = [16, 128], strides = [1, 1]} : vector<16x2048xbf16> to vector<16x128xbf16>
    %68 = vector.broadcast %66 : i32 to vector<16x128xi32>
    %69 = arith.cmpi eq, %8, %68 : vector<16x128xi32>
    %cst_27 = arith.constant 0.000000e+00 : bf16
    %70 = vector.broadcast %cst_27 : bf16 to vector<16x128xbf16>
    %71 = arith.select %69, %70, %67 : vector<16x128xi1>, vector<16x128xbf16>
    %c16_i32_28 = arith.constant 16 : i32
    %72 = arith.muli %arg1, %c16_i32_28 : i32
    %c9_i32 = arith.constant 9 : i32
    %73 = arith.addi %72, %c9_i32 : i32
    %74 = vector.extract_strided_slice %7 {offsets = [0, 1152], sizes = [16, 128], strides = [1, 1]} : vector<16x2048xbf16> to vector<16x128xbf16>
    %75 = vector.broadcast %73 : i32 to vector<16x128xi32>
    %76 = arith.cmpi eq, %8, %75 : vector<16x128xi32>
    %cst_29 = arith.constant 0.000000e+00 : bf16
    %77 = vector.broadcast %cst_29 : bf16 to vector<16x128xbf16>
    %78 = arith.select %76, %77, %74 : vector<16x128xi1>, vector<16x128xbf16>
    %c16_i32_30 = arith.constant 16 : i32
    %79 = arith.muli %arg1, %c16_i32_30 : i32
    %c10_i32 = arith.constant 10 : i32
    %80 = arith.addi %79, %c10_i32 : i32
    %81 = vector.extract_strided_slice %7 {offsets = [0, 1280], sizes = [16, 128], strides = [1, 1]} : vector<16x2048xbf16> to vector<16x128xbf16>
    %82 = vector.broadcast %80 : i32 to vector<16x128xi32>
    %83 = arith.cmpi eq, %8, %82 : vector<16x128xi32>
    %cst_31 = arith.constant 0.000000e+00 : bf16
    %84 = vector.broadcast %cst_31 : bf16 to vector<16x128xbf16>
    %85 = arith.select %83, %84, %81 : vector<16x128xi1>, vector<16x128xbf16>
    %c16_i32_32 = arith.constant 16 : i32
    %86 = arith.muli %arg1, %c16_i32_32 : i32
    %c11_i32 = arith.constant 11 : i32
    %87 = arith.addi %86, %c11_i32 : i32
    %88 = vector.extract_strided_slice %7 {offsets = [0, 1408], sizes = [16, 128], strides = [1, 1]} : vector<16x2048xbf16> to vector<16x128xbf16>
    %89 = vector.broadcast %87 : i32 to vector<16x128xi32>
    %90 = arith.cmpi eq, %8, %89 : vector<16x128xi32>
    %cst_33 = arith.constant 0.000000e+00 : bf16
    %91 = vector.broadcast %cst_33 : bf16 to vector<16x128xbf16>
    %92 = arith.select %90, %91, %88 : vector<16x128xi1>, vector<16x128xbf16>
    %c16_i32_34 = arith.constant 16 : i32
    %93 = arith.muli %arg1, %c16_i32_34 : i32
    %c12_i32 = arith.constant 12 : i32
    %94 = arith.addi %93, %c12_i32 : i32
    %95 = vector.extract_strided_slice %7 {offsets = [0, 1536], sizes = [16, 128], strides = [1, 1]} : vector<16x2048xbf16> to vector<16x128xbf16>
    %96 = vector.broadcast %94 : i32 to vector<16x128xi32>
    %97 = arith.cmpi eq, %8, %96 : vector<16x128xi32>
    %cst_35 = arith.constant 0.000000e+00 : bf16
    %98 = vector.broadcast %cst_35 : bf16 to vector<16x128xbf16>
    %99 = arith.select %97, %98, %95 : vector<16x128xi1>, vector<16x128xbf16>
    %c16_i32_36 = arith.constant 16 : i32
    %100 = arith.muli %arg1, %c16_i32_36 : i32
    %c13_i32 = arith.constant 13 : i32
    %101 = arith.addi %100, %c13_i32 : i32
    %102 = vector.extract_strided_slice %7 {offsets = [0, 1664], sizes = [16, 128], strides = [1, 1]} : vector<16x2048xbf16> to vector<16x128xbf16>
    %103 = vector.broadcast %101 : i32 to vector<16x128xi32>
    %104 = arith.cmpi eq, %8, %103 : vector<16x128xi32>
    %cst_37 = arith.constant 0.000000e+00 : bf16
    %105 = vector.broadcast %cst_37 : bf16 to vector<16x128xbf16>
    %106 = arith.select %104, %105, %102 : vector<16x128xi1>, vector<16x128xbf16>
    %c16_i32_38 = arith.constant 16 : i32
    %107 = arith.muli %arg1, %c16_i32_38 : i32
    %c14_i32 = arith.constant 14 : i32
    %108 = arith.addi %107, %c14_i32 : i32
    %109 = vector.extract_strided_slice %7 {offsets = [0, 1792], sizes = [16, 128], strides = [1, 1]} : vector<16x2048xbf16> to vector<16x128xbf16>
    %110 = vector.broadcast %108 : i32 to vector<16x128xi32>
    %111 = arith.cmpi eq, %8, %110 : vector<16x128xi32>
    %cst_39 = arith.constant 0.000000e+00 : bf16
    %112 = vector.broadcast %cst_39 : bf16 to vector<16x128xbf16>
    %113 = arith.select %111, %112, %109 : vector<16x128xi1>, vector<16x128xbf16>
    %c16_i32_40 = arith.constant 16 : i32
    %114 = arith.muli %arg1, %c16_i32_40 : i32
    %c15_i32 = arith.constant 15 : i32
    %115 = arith.addi %114, %c15_i32 : i32
    %116 = vector.extract_strided_slice %7 {offsets = [0, 1920], sizes = [16, 128], strides = [1, 1]} : vector<16x2048xbf16> to vector<16x128xbf16>
    %117 = vector.broadcast %115 : i32 to vector<16x128xi32>
    %118 = arith.cmpi eq, %8, %117 : vector<16x128xi32>
    %cst_41 = arith.constant 0.000000e+00 : bf16
    %119 = vector.broadcast %cst_41 : bf16 to vector<16x128xbf16>
    %120 = arith.select %118, %119, %116 : vector<16x128xi1>, vector<16x128xbf16>
    %121 = tpu.concatenate %15, %22, %29, %36, %43, %50, %57, %64, %71, %78, %85, %92, %99, %106, %113, %120 in 1 : vector<16x128xbf16>, vector<16x128xbf16>, vector<16x128xbf16>, vector<16x128xbf16>, vector<16x128xbf16>, vector<16x128xbf16>, vector<16x128xbf16>, vector<16x128xbf16>, vector<16x128xbf16>, vector<16x128xbf16>, vector<16x128xbf16>, vector<16x128xbf16>, vector<16x128xbf16>, vector<16x128xbf16>, vector<16x128xbf16>, vector<16x128xbf16> -> vector<16x2048xbf16>
    %cst_42 = arith.constant dense<0.000000e+00> : vector<16x2048xf32>
    %122 = tpu.matmul %1, %121, %cst_42 {dimension_numbers = #tpu.dot_dimension_numbers<[1], [0], [0], [1], [0, 0, 1, 1], [], []>} : vector<16x16xbf16>, vector<16x2048xbf16>, vector<16x2048xf32> -> vector<16x2048xf32>
    %cst_43 = arith.constant 0.000000e+00 : f32
    %123 = vector.broadcast %cst_43 : f32 to vector<16x128xf32>
    %c16_i32_44 = arith.constant 16 : i32
    %124 = arith.muli %arg1, %c16_i32_44 : i32
    %c0_i32_45 = arith.constant 0 : i32
    %125 = arith.addi %124, %c0_i32_45 : i32
    %126 = vector.extract_strided_slice %122 {offsets = [0, 0], sizes = [16, 128], strides = [1, 1]} : vector<16x2048xf32> to vector<16x128xf32>
    %127 = vector.broadcast %125 : i32 to vector<16x128xi32>
    %128 = arith.cmpi eq, %8, %127 : vector<16x128xi32>
    %cst_46 = arith.constant 0.000000e+00 : f32
    %129 = vector.broadcast %cst_46 : f32 to vector<16x128xf32>
    %130 = arith.select %128, %129, %126 : vector<16x128xi1>, vector<16x128xf32>
    %131 = arith.truncf %130 : vector<16x128xf32> to vector<16x128xbf16>
    %132 = tpu.concatenate %131, %11 in 1 : vector<16x128xbf16>, vector<16x128xbf16> -> vector<16x256xbf16>
    %cst_47 = arith.constant dense<0.000000e+00> : vector<16x128xf32>
    %133 = tpu.matmul %132, %4, %cst_47 {dimension_numbers = #tpu.dot_dimension_numbers<[1], [0], [0], [1], [0, 0, 1, 1], [], []>} : vector<16x256xbf16>, vector<256x128xbf16>, vector<16x128xf32> -> vector<16x128xf32>
    %134 = vector.broadcast %5 : vector<1x128xf32> to vector<16x128xf32>
    %135 = arith.addf %133, %134 : vector<16x128xf32>
    %136 = arith.addf %135, %3 : vector<16x128xf32>
    %cst_48 = arith.constant 0.000000e+00 : f32
    %137 = vector.broadcast %cst_48 : f32 to vector<16x128xf32>
    %138 = arith.maximumf %136, %137 : vector<16x128xf32>
    %c16_i32_49 = arith.constant 16 : i32
    %139 = arith.cmpi slt, %125, %c16_i32_49 : i32
    %140 = arith.extui %139 : i1 to i32
    %141 = arith.sitofp %140 : i32 to f32
    %142 = vector.broadcast %141 : f32 to vector<16x128xf32>
    %143 = arith.mulf %138, %142 : vector<16x128xf32>
    %144 = arith.addf %123, %143 : vector<16x128xf32>
    %c16_i32_50 = arith.constant 16 : i32
    %145 = arith.muli %arg1, %c16_i32_50 : i32
    %c1_i32_51 = arith.constant 1 : i32
    %146 = arith.addi %145, %c1_i32_51 : i32
    %147 = vector.extract_strided_slice %122 {offsets = [0, 128], sizes = [16, 128], strides = [1, 1]} : vector<16x2048xf32> to vector<16x128xf32>
    %148 = vector.broadcast %146 : i32 to vector<16x128xi32>
    %149 = arith.cmpi eq, %8, %148 : vector<16x128xi32>
    %cst_52 = arith.constant 0.000000e+00 : f32
    %150 = vector.broadcast %cst_52 : f32 to vector<16x128xf32>
    %151 = arith.select %149, %150, %147 : vector<16x128xi1>, vector<16x128xf32>
    %152 = arith.truncf %151 : vector<16x128xf32> to vector<16x128xbf16>
    %153 = tpu.concatenate %152, %18 in 1 : vector<16x128xbf16>, vector<16x128xbf16> -> vector<16x256xbf16>
    %cst_53 = arith.constant dense<0.000000e+00> : vector<16x128xf32>
    %154 = tpu.matmul %153, %4, %cst_53 {dimension_numbers = #tpu.dot_dimension_numbers<[1], [0], [0], [1], [0, 0, 1, 1], [], []>} : vector<16x256xbf16>, vector<256x128xbf16>, vector<16x128xf32> -> vector<16x128xf32>
    %155 = vector.broadcast %5 : vector<1x128xf32> to vector<16x128xf32>
    %156 = arith.addf %154, %155 : vector<16x128xf32>
    %157 = arith.addf %156, %3 : vector<16x128xf32>
    %cst_54 = arith.constant 0.000000e+00 : f32
    %158 = vector.broadcast %cst_54 : f32 to vector<16x128xf32>
    %159 = arith.maximumf %157, %158 : vector<16x128xf32>
    %c16_i32_55 = arith.constant 16 : i32
    %160 = arith.cmpi slt, %146, %c16_i32_55 : i32
    %161 = arith.extui %160 : i1 to i32
    %162 = arith.sitofp %161 : i32 to f32
    %163 = vector.broadcast %162 : f32 to vector<16x128xf32>
    %164 = arith.mulf %159, %163 : vector<16x128xf32>
    %165 = arith.addf %144, %164 : vector<16x128xf32>
    %c16_i32_56 = arith.constant 16 : i32
    %166 = arith.muli %arg1, %c16_i32_56 : i32
    %c2_i32_57 = arith.constant 2 : i32
    %167 = arith.addi %166, %c2_i32_57 : i32
    %168 = vector.extract_strided_slice %122 {offsets = [0, 256], sizes = [16, 128], strides = [1, 1]} : vector<16x2048xf32> to vector<16x128xf32>
    %169 = vector.broadcast %167 : i32 to vector<16x128xi32>
    %170 = arith.cmpi eq, %8, %169 : vector<16x128xi32>
    %cst_58 = arith.constant 0.000000e+00 : f32
    %171 = vector.broadcast %cst_58 : f32 to vector<16x128xf32>
    %172 = arith.select %170, %171, %168 : vector<16x128xi1>, vector<16x128xf32>
    %173 = arith.truncf %172 : vector<16x128xf32> to vector<16x128xbf16>
    %174 = tpu.concatenate %173, %25 in 1 : vector<16x128xbf16>, vector<16x128xbf16> -> vector<16x256xbf16>
    %cst_59 = arith.constant dense<0.000000e+00> : vector<16x128xf32>
    %175 = tpu.matmul %174, %4, %cst_59 {dimension_numbers = #tpu.dot_dimension_numbers<[1], [0], [0], [1], [0, 0, 1, 1], [], []>} : vector<16x256xbf16>, vector<256x128xbf16>, vector<16x128xf32> -> vector<16x128xf32>
    %176 = vector.broadcast %5 : vector<1x128xf32> to vector<16x128xf32>
    %177 = arith.addf %175, %176 : vector<16x128xf32>
    %178 = arith.addf %177, %3 : vector<16x128xf32>
    %cst_60 = arith.constant 0.000000e+00 : f32
    %179 = vector.broadcast %cst_60 : f32 to vector<16x128xf32>
    %180 = arith.maximumf %178, %179 : vector<16x128xf32>
    %c16_i32_61 = arith.constant 16 : i32
    %181 = arith.cmpi slt, %167, %c16_i32_61 : i32
    %182 = arith.extui %181 : i1 to i32
    %183 = arith.sitofp %182 : i32 to f32
    %184 = vector.broadcast %183 : f32 to vector<16x128xf32>
    %185 = arith.mulf %180, %184 : vector<16x128xf32>
    %186 = arith.addf %165, %185 : vector<16x128xf32>
    %c16_i32_62 = arith.constant 16 : i32
    %187 = arith.muli %arg1, %c16_i32_62 : i32
    %c3_i32_63 = arith.constant 3 : i32
    %188 = arith.addi %187, %c3_i32_63 : i32
    %189 = vector.extract_strided_slice %122 {offsets = [0, 384], sizes = [16, 128], strides = [1, 1]} : vector<16x2048xf32> to vector<16x128xf32>
    %190 = vector.broadcast %188 : i32 to vector<16x128xi32>
    %191 = arith.cmpi eq, %8, %190 : vector<16x128xi32>
    %cst_64 = arith.constant 0.000000e+00 : f32
    %192 = vector.broadcast %cst_64 : f32 to vector<16x128xf32>
    %193 = arith.select %191, %192, %189 : vector<16x128xi1>, vector<16x128xf32>
    %194 = arith.truncf %193 : vector<16x128xf32> to vector<16x128xbf16>
    %195 = tpu.concatenate %194, %32 in 1 : vector<16x128xbf16>, vector<16x128xbf16> -> vector<16x256xbf16>
    %cst_65 = arith.constant dense<0.000000e+00> : vector<16x128xf32>
    %196 = tpu.matmul %195, %4, %cst_65 {dimension_numbers = #tpu.dot_dimension_numbers<[1], [0], [0], [1], [0, 0, 1, 1], [], []>} : vector<16x256xbf16>, vector<256x128xbf16>, vector<16x128xf32> -> vector<16x128xf32>
    %197 = vector.broadcast %5 : vector<1x128xf32> to vector<16x128xf32>
    %198 = arith.addf %196, %197 : vector<16x128xf32>
    %199 = arith.addf %198, %3 : vector<16x128xf32>
    %cst_66 = arith.constant 0.000000e+00 : f32
    %200 = vector.broadcast %cst_66 : f32 to vector<16x128xf32>
    %201 = arith.maximumf %199, %200 : vector<16x128xf32>
    %c16_i32_67 = arith.constant 16 : i32
    %202 = arith.cmpi slt, %188, %c16_i32_67 : i32
    %203 = arith.extui %202 : i1 to i32
    %204 = arith.sitofp %203 : i32 to f32
    %205 = vector.broadcast %204 : f32 to vector<16x128xf32>
    %206 = arith.mulf %201, %205 : vector<16x128xf32>
    %207 = arith.addf %186, %206 : vector<16x128xf32>
    %c16_i32_68 = arith.constant 16 : i32
    %208 = arith.muli %arg1, %c16_i32_68 : i32
    %c4_i32_69 = arith.constant 4 : i32
    %209 = arith.addi %208, %c4_i32_69 : i32
    %210 = vector.extract_strided_slice %122 {offsets = [0, 512], sizes = [16, 128], strides = [1, 1]} : vector<16x2048xf32> to vector<16x128xf32>
    %211 = vector.broadcast %209 : i32 to vector<16x128xi32>
    %212 = arith.cmpi eq, %8, %211 : vector<16x128xi32>
    %cst_70 = arith.constant 0.000000e+00 : f32
    %213 = vector.broadcast %cst_70 : f32 to vector<16x128xf32>
    %214 = arith.select %212, %213, %210 : vector<16x128xi1>, vector<16x128xf32>
    %215 = arith.truncf %214 : vector<16x128xf32> to vector<16x128xbf16>
    %216 = tpu.concatenate %215, %39 in 1 : vector<16x128xbf16>, vector<16x128xbf16> -> vector<16x256xbf16>
    %cst_71 = arith.constant dense<0.000000e+00> : vector<16x128xf32>
    %217 = tpu.matmul %216, %4, %cst_71 {dimension_numbers = #tpu.dot_dimension_numbers<[1], [0], [0], [1], [0, 0, 1, 1], [], []>} : vector<16x256xbf16>, vector<256x128xbf16>, vector<16x128xf32> -> vector<16x128xf32>
    %218 = vector.broadcast %5 : vector<1x128xf32> to vector<16x128xf32>
    %219 = arith.addf %217, %218 : vector<16x128xf32>
    %220 = arith.addf %219, %3 : vector<16x128xf32>
    %cst_72 = arith.constant 0.000000e+00 : f32
    %221 = vector.broadcast %cst_72 : f32 to vector<16x128xf32>
    %222 = arith.maximumf %220, %221 : vector<16x128xf32>
    %c16_i32_73 = arith.constant 16 : i32
    %223 = arith.cmpi slt, %209, %c16_i32_73 : i32
    %224 = arith.extui %223 : i1 to i32
    %225 = arith.sitofp %224 : i32 to f32
    %226 = vector.broadcast %225 : f32 to vector<16x128xf32>
    %227 = arith.mulf %222, %226 : vector<16x128xf32>
    %228 = arith.addf %207, %227 : vector<16x128xf32>
    %c16_i32_74 = arith.constant 16 : i32
    %229 = arith.muli %arg1, %c16_i32_74 : i32
    %c5_i32_75 = arith.constant 5 : i32
    %230 = arith.addi %229, %c5_i32_75 : i32
    %231 = vector.extract_strided_slice %122 {offsets = [0, 640], sizes = [16, 128], strides = [1, 1]} : vector<16x2048xf32> to vector<16x128xf32>
    %232 = vector.broadcast %230 : i32 to vector<16x128xi32>
    %233 = arith.cmpi eq, %8, %232 : vector<16x128xi32>
    %cst_76 = arith.constant 0.000000e+00 : f32
    %234 = vector.broadcast %cst_76 : f32 to vector<16x128xf32>
    %235 = arith.select %233, %234, %231 : vector<16x128xi1>, vector<16x128xf32>
    %236 = arith.truncf %235 : vector<16x128xf32> to vector<16x128xbf16>
    %237 = tpu.concatenate %236, %46 in 1 : vector<16x128xbf16>, vector<16x128xbf16> -> vector<16x256xbf16>
    %cst_77 = arith.constant dense<0.000000e+00> : vector<16x128xf32>
    %238 = tpu.matmul %237, %4, %cst_77 {dimension_numbers = #tpu.dot_dimension_numbers<[1], [0], [0], [1], [0, 0, 1, 1], [], []>} : vector<16x256xbf16>, vector<256x128xbf16>, vector<16x128xf32> -> vector<16x128xf32>
    %239 = vector.broadcast %5 : vector<1x128xf32> to vector<16x128xf32>
    %240 = arith.addf %238, %239 : vector<16x128xf32>
    %241 = arith.addf %240, %3 : vector<16x128xf32>
    %cst_78 = arith.constant 0.000000e+00 : f32
    %242 = vector.broadcast %cst_78 : f32 to vector<16x128xf32>
    %243 = arith.maximumf %241, %242 : vector<16x128xf32>
    %c16_i32_79 = arith.constant 16 : i32
    %244 = arith.cmpi slt, %230, %c16_i32_79 : i32
    %245 = arith.extui %244 : i1 to i32
    %246 = arith.sitofp %245 : i32 to f32
    %247 = vector.broadcast %246 : f32 to vector<16x128xf32>
    %248 = arith.mulf %243, %247 : vector<16x128xf32>
    %249 = arith.addf %228, %248 : vector<16x128xf32>
    %c16_i32_80 = arith.constant 16 : i32
    %250 = arith.muli %arg1, %c16_i32_80 : i32
    %c6_i32_81 = arith.constant 6 : i32
    %251 = arith.addi %250, %c6_i32_81 : i32
    %252 = vector.extract_strided_slice %122 {offsets = [0, 768], sizes = [16, 128], strides = [1, 1]} : vector<16x2048xf32> to vector<16x128xf32>
    %253 = vector.broadcast %251 : i32 to vector<16x128xi32>
    %254 = arith.cmpi eq, %8, %253 : vector<16x128xi32>
    %cst_82 = arith.constant 0.000000e+00 : f32
    %255 = vector.broadcast %cst_82 : f32 to vector<16x128xf32>
    %256 = arith.select %254, %255, %252 : vector<16x128xi1>, vector<16x128xf32>
    %257 = arith.truncf %256 : vector<16x128xf32> to vector<16x128xbf16>
    %258 = tpu.concatenate %257, %53 in 1 : vector<16x128xbf16>, vector<16x128xbf16> -> vector<16x256xbf16>
    %cst_83 = arith.constant dense<0.000000e+00> : vector<16x128xf32>
    %259 = tpu.matmul %258, %4, %cst_83 {dimension_numbers = #tpu.dot_dimension_numbers<[1], [0], [0], [1], [0, 0, 1, 1], [], []>} : vector<16x256xbf16>, vector<256x128xbf16>, vector<16x128xf32> -> vector<16x128xf32>
    %260 = vector.broadcast %5 : vector<1x128xf32> to vector<16x128xf32>
    %261 = arith.addf %259, %260 : vector<16x128xf32>
    %262 = arith.addf %261, %3 : vector<16x128xf32>
    %cst_84 = arith.constant 0.000000e+00 : f32
    %263 = vector.broadcast %cst_84 : f32 to vector<16x128xf32>
    %264 = arith.maximumf %262, %263 : vector<16x128xf32>
    %c16_i32_85 = arith.constant 16 : i32
    %265 = arith.cmpi slt, %251, %c16_i32_85 : i32
    %266 = arith.extui %265 : i1 to i32
    %267 = arith.sitofp %266 : i32 to f32
    %268 = vector.broadcast %267 : f32 to vector<16x128xf32>
    %269 = arith.mulf %264, %268 : vector<16x128xf32>
    %270 = arith.addf %249, %269 : vector<16x128xf32>
    %c16_i32_86 = arith.constant 16 : i32
    %271 = arith.muli %arg1, %c16_i32_86 : i32
    %c7_i32_87 = arith.constant 7 : i32
    %272 = arith.addi %271, %c7_i32_87 : i32
    %273 = vector.extract_strided_slice %122 {offsets = [0, 896], sizes = [16, 128], strides = [1, 1]} : vector<16x2048xf32> to vector<16x128xf32>
    %274 = vector.broadcast %272 : i32 to vector<16x128xi32>
    %275 = arith.cmpi eq, %8, %274 : vector<16x128xi32>
    %cst_88 = arith.constant 0.000000e+00 : f32
    %276 = vector.broadcast %cst_88 : f32 to vector<16x128xf32>
    %277 = arith.select %275, %276, %273 : vector<16x128xi1>, vector<16x128xf32>
    %278 = arith.truncf %277 : vector<16x128xf32> to vector<16x128xbf16>
    %279 = tpu.concatenate %278, %60 in 1 : vector<16x128xbf16>, vector<16x128xbf16> -> vector<16x256xbf16>
    %cst_89 = arith.constant dense<0.000000e+00> : vector<16x128xf32>
    %280 = tpu.matmul %279, %4, %cst_89 {dimension_numbers = #tpu.dot_dimension_numbers<[1], [0], [0], [1], [0, 0, 1, 1], [], []>} : vector<16x256xbf16>, vector<256x128xbf16>, vector<16x128xf32> -> vector<16x128xf32>
    %281 = vector.broadcast %5 : vector<1x128xf32> to vector<16x128xf32>
    %282 = arith.addf %280, %281 : vector<16x128xf32>
    %283 = arith.addf %282, %3 : vector<16x128xf32>
    %cst_90 = arith.constant 0.000000e+00 : f32
    %284 = vector.broadcast %cst_90 : f32 to vector<16x128xf32>
    %285 = arith.maximumf %283, %284 : vector<16x128xf32>
    %c16_i32_91 = arith.constant 16 : i32
    %286 = arith.cmpi slt, %272, %c16_i32_91 : i32
    %287 = arith.extui %286 : i1 to i32
    %288 = arith.sitofp %287 : i32 to f32
    %289 = vector.broadcast %288 : f32 to vector<16x128xf32>
    %290 = arith.mulf %285, %289 : vector<16x128xf32>
    %291 = arith.addf %270, %290 : vector<16x128xf32>
    %c16_i32_92 = arith.constant 16 : i32
    %292 = arith.muli %arg1, %c16_i32_92 : i32
    %c8_i32_93 = arith.constant 8 : i32
    %293 = arith.addi %292, %c8_i32_93 : i32
    %294 = vector.extract_strided_slice %122 {offsets = [0, 1024], sizes = [16, 128], strides = [1, 1]} : vector<16x2048xf32> to vector<16x128xf32>
    %295 = vector.broadcast %293 : i32 to vector<16x128xi32>
    %296 = arith.cmpi eq, %8, %295 : vector<16x128xi32>
    %cst_94 = arith.constant 0.000000e+00 : f32
    %297 = vector.broadcast %cst_94 : f32 to vector<16x128xf32>
    %298 = arith.select %296, %297, %294 : vector<16x128xi1>, vector<16x128xf32>
    %299 = arith.truncf %298 : vector<16x128xf32> to vector<16x128xbf16>
    %300 = tpu.concatenate %299, %67 in 1 : vector<16x128xbf16>, vector<16x128xbf16> -> vector<16x256xbf16>
    %cst_95 = arith.constant dense<0.000000e+00> : vector<16x128xf32>
    %301 = tpu.matmul %300, %4, %cst_95 {dimension_numbers = #tpu.dot_dimension_numbers<[1], [0], [0], [1], [0, 0, 1, 1], [], []>} : vector<16x256xbf16>, vector<256x128xbf16>, vector<16x128xf32> -> vector<16x128xf32>
    %302 = vector.broadcast %5 : vector<1x128xf32> to vector<16x128xf32>
    %303 = arith.addf %301, %302 : vector<16x128xf32>
    %304 = arith.addf %303, %3 : vector<16x128xf32>
    %cst_96 = arith.constant 0.000000e+00 : f32
    %305 = vector.broadcast %cst_96 : f32 to vector<16x128xf32>
    %306 = arith.maximumf %304, %305 : vector<16x128xf32>
    %c16_i32_97 = arith.constant 16 : i32
    %307 = arith.cmpi slt, %293, %c16_i32_97 : i32
    %308 = arith.extui %307 : i1 to i32
    %309 = arith.sitofp %308 : i32 to f32
    %310 = vector.broadcast %309 : f32 to vector<16x128xf32>
    %311 = arith.mulf %306, %310 : vector<16x128xf32>
    %312 = arith.addf %291, %311 : vector<16x128xf32>
    %c16_i32_98 = arith.constant 16 : i32
    %313 = arith.muli %arg1, %c16_i32_98 : i32
    %c9_i32_99 = arith.constant 9 : i32
    %314 = arith.addi %313, %c9_i32_99 : i32
    %315 = vector.extract_strided_slice %122 {offsets = [0, 1152], sizes = [16, 128], strides = [1, 1]} : vector<16x2048xf32> to vector<16x128xf32>
    %316 = vector.broadcast %314 : i32 to vector<16x128xi32>
    %317 = arith.cmpi eq, %8, %316 : vector<16x128xi32>
    %cst_100 = arith.constant 0.000000e+00 : f32
    %318 = vector.broadcast %cst_100 : f32 to vector<16x128xf32>
    %319 = arith.select %317, %318, %315 : vector<16x128xi1>, vector<16x128xf32>
    %320 = arith.truncf %319 : vector<16x128xf32> to vector<16x128xbf16>
    %321 = tpu.concatenate %320, %74 in 1 : vector<16x128xbf16>, vector<16x128xbf16> -> vector<16x256xbf16>
    %cst_101 = arith.constant dense<0.000000e+00> : vector<16x128xf32>
    %322 = tpu.matmul %321, %4, %cst_101 {dimension_numbers = #tpu.dot_dimension_numbers<[1], [0], [0], [1], [0, 0, 1, 1], [], []>} : vector<16x256xbf16>, vector<256x128xbf16>, vector<16x128xf32> -> vector<16x128xf32>
    %323 = vector.broadcast %5 : vector<1x128xf32> to vector<16x128xf32>
    %324 = arith.addf %322, %323 : vector<16x128xf32>
    %325 = arith.addf %324, %3 : vector<16x128xf32>
    %cst_102 = arith.constant 0.000000e+00 : f32
    %326 = vector.broadcast %cst_102 : f32 to vector<16x128xf32>
    %327 = arith.maximumf %325, %326 : vector<16x128xf32>
    %c16_i32_103 = arith.constant 16 : i32
    %328 = arith.cmpi slt, %314, %c16_i32_103 : i32
    %329 = arith.extui %328 : i1 to i32
    %330 = arith.sitofp %329 : i32 to f32
    %331 = vector.broadcast %330 : f32 to vector<16x128xf32>
    %332 = arith.mulf %327, %331 : vector<16x128xf32>
    %333 = arith.addf %312, %332 : vector<16x128xf32>
    %c16_i32_104 = arith.constant 16 : i32
    %334 = arith.muli %arg1, %c16_i32_104 : i32
    %c10_i32_105 = arith.constant 10 : i32
    %335 = arith.addi %334, %c10_i32_105 : i32
    %336 = vector.extract_strided_slice %122 {offsets = [0, 1280], sizes = [16, 128], strides = [1, 1]} : vector<16x2048xf32> to vector<16x128xf32>
    %337 = vector.broadcast %335 : i32 to vector<16x128xi32>
    %338 = arith.cmpi eq, %8, %337 : vector<16x128xi32>
    %cst_106 = arith.constant 0.000000e+00 : f32
    %339 = vector.broadcast %cst_106 : f32 to vector<16x128xf32>
    %340 = arith.select %338, %339, %336 : vector<16x128xi1>, vector<16x128xf32>
    %341 = arith.truncf %340 : vector<16x128xf32> to vector<16x128xbf16>
    %342 = tpu.concatenate %341, %81 in 1 : vector<16x128xbf16>, vector<16x128xbf16> -> vector<16x256xbf16>
    %cst_107 = arith.constant dense<0.000000e+00> : vector<16x128xf32>
    %343 = tpu.matmul %342, %4, %cst_107 {dimension_numbers = #tpu.dot_dimension_numbers<[1], [0], [0], [1], [0, 0, 1, 1], [], []>} : vector<16x256xbf16>, vector<256x128xbf16>, vector<16x128xf32> -> vector<16x128xf32>
    %344 = vector.broadcast %5 : vector<1x128xf32> to vector<16x128xf32>
    %345 = arith.addf %343, %344 : vector<16x128xf32>
    %346 = arith.addf %345, %3 : vector<16x128xf32>
    %cst_108 = arith.constant 0.000000e+00 : f32
    %347 = vector.broadcast %cst_108 : f32 to vector<16x128xf32>
    %348 = arith.maximumf %346, %347 : vector<16x128xf32>
    %c16_i32_109 = arith.constant 16 : i32
    %349 = arith.cmpi slt, %335, %c16_i32_109 : i32
    %350 = arith.extui %349 : i1 to i32
    %351 = arith.sitofp %350 : i32 to f32
    %352 = vector.broadcast %351 : f32 to vector<16x128xf32>
    %353 = arith.mulf %348, %352 : vector<16x128xf32>
    %354 = arith.addf %333, %353 : vector<16x128xf32>
    %c16_i32_110 = arith.constant 16 : i32
    %355 = arith.muli %arg1, %c16_i32_110 : i32
    %c11_i32_111 = arith.constant 11 : i32
    %356 = arith.addi %355, %c11_i32_111 : i32
    %357 = vector.extract_strided_slice %122 {offsets = [0, 1408], sizes = [16, 128], strides = [1, 1]} : vector<16x2048xf32> to vector<16x128xf32>
    %358 = vector.broadcast %356 : i32 to vector<16x128xi32>
    %359 = arith.cmpi eq, %8, %358 : vector<16x128xi32>
    %cst_112 = arith.constant 0.000000e+00 : f32
    %360 = vector.broadcast %cst_112 : f32 to vector<16x128xf32>
    %361 = arith.select %359, %360, %357 : vector<16x128xi1>, vector<16x128xf32>
    %362 = arith.truncf %361 : vector<16x128xf32> to vector<16x128xbf16>
    %363 = tpu.concatenate %362, %88 in 1 : vector<16x128xbf16>, vector<16x128xbf16> -> vector<16x256xbf16>
    %cst_113 = arith.constant dense<0.000000e+00> : vector<16x128xf32>
    %364 = tpu.matmul %363, %4, %cst_113 {dimension_numbers = #tpu.dot_dimension_numbers<[1], [0], [0], [1], [0, 0, 1, 1], [], []>} : vector<16x256xbf16>, vector<256x128xbf16>, vector<16x128xf32> -> vector<16x128xf32>
    %365 = vector.broadcast %5 : vector<1x128xf32> to vector<16x128xf32>
    %366 = arith.addf %364, %365 : vector<16x128xf32>
    %367 = arith.addf %366, %3 : vector<16x128xf32>
    %cst_114 = arith.constant 0.000000e+00 : f32
    %368 = vector.broadcast %cst_114 : f32 to vector<16x128xf32>
    %369 = arith.maximumf %367, %368 : vector<16x128xf32>
    %c16_i32_115 = arith.constant 16 : i32
    %370 = arith.cmpi slt, %356, %c16_i32_115 : i32
    %371 = arith.extui %370 : i1 to i32
    %372 = arith.sitofp %371 : i32 to f32
    %373 = vector.broadcast %372 : f32 to vector<16x128xf32>
    %374 = arith.mulf %369, %373 : vector<16x128xf32>
    %375 = arith.addf %354, %374 : vector<16x128xf32>
    %c16_i32_116 = arith.constant 16 : i32
    %376 = arith.muli %arg1, %c16_i32_116 : i32
    %c12_i32_117 = arith.constant 12 : i32
    %377 = arith.addi %376, %c12_i32_117 : i32
    %378 = vector.extract_strided_slice %122 {offsets = [0, 1536], sizes = [16, 128], strides = [1, 1]} : vector<16x2048xf32> to vector<16x128xf32>
    %379 = vector.broadcast %377 : i32 to vector<16x128xi32>
    %380 = arith.cmpi eq, %8, %379 : vector<16x128xi32>
    %cst_118 = arith.constant 0.000000e+00 : f32
    %381 = vector.broadcast %cst_118 : f32 to vector<16x128xf32>
    %382 = arith.select %380, %381, %378 : vector<16x128xi1>, vector<16x128xf32>
    %383 = arith.truncf %382 : vector<16x128xf32> to vector<16x128xbf16>
    %384 = tpu.concatenate %383, %95 in 1 : vector<16x128xbf16>, vector<16x128xbf16> -> vector<16x256xbf16>
    %cst_119 = arith.constant dense<0.000000e+00> : vector<16x128xf32>
    %385 = tpu.matmul %384, %4, %cst_119 {dimension_numbers = #tpu.dot_dimension_numbers<[1], [0], [0], [1], [0, 0, 1, 1], [], []>} : vector<16x256xbf16>, vector<256x128xbf16>, vector<16x128xf32> -> vector<16x128xf32>
    %386 = vector.broadcast %5 : vector<1x128xf32> to vector<16x128xf32>
    %387 = arith.addf %385, %386 : vector<16x128xf32>
    %388 = arith.addf %387, %3 : vector<16x128xf32>
    %cst_120 = arith.constant 0.000000e+00 : f32
    %389 = vector.broadcast %cst_120 : f32 to vector<16x128xf32>
    %390 = arith.maximumf %388, %389 : vector<16x128xf32>
    %c16_i32_121 = arith.constant 16 : i32
    %391 = arith.cmpi slt, %377, %c16_i32_121 : i32
    %392 = arith.extui %391 : i1 to i32
    %393 = arith.sitofp %392 : i32 to f32
    %394 = vector.broadcast %393 : f32 to vector<16x128xf32>
    %395 = arith.mulf %390, %394 : vector<16x128xf32>
    %396 = arith.addf %375, %395 : vector<16x128xf32>
    %c16_i32_122 = arith.constant 16 : i32
    %397 = arith.muli %arg1, %c16_i32_122 : i32
    %c13_i32_123 = arith.constant 13 : i32
    %398 = arith.addi %397, %c13_i32_123 : i32
    %399 = vector.extract_strided_slice %122 {offsets = [0, 1664], sizes = [16, 128], strides = [1, 1]} : vector<16x2048xf32> to vector<16x128xf32>
    %400 = vector.broadcast %398 : i32 to vector<16x128xi32>
    %401 = arith.cmpi eq, %8, %400 : vector<16x128xi32>
    %cst_124 = arith.constant 0.000000e+00 : f32
    %402 = vector.broadcast %cst_124 : f32 to vector<16x128xf32>
    %403 = arith.select %401, %402, %399 : vector<16x128xi1>, vector<16x128xf32>
    %404 = arith.truncf %403 : vector<16x128xf32> to vector<16x128xbf16>
    %405 = tpu.concatenate %404, %102 in 1 : vector<16x128xbf16>, vector<16x128xbf16> -> vector<16x256xbf16>
    %cst_125 = arith.constant dense<0.000000e+00> : vector<16x128xf32>
    %406 = tpu.matmul %405, %4, %cst_125 {dimension_numbers = #tpu.dot_dimension_numbers<[1], [0], [0], [1], [0, 0, 1, 1], [], []>} : vector<16x256xbf16>, vector<256x128xbf16>, vector<16x128xf32> -> vector<16x128xf32>
    %407 = vector.broadcast %5 : vector<1x128xf32> to vector<16x128xf32>
    %408 = arith.addf %406, %407 : vector<16x128xf32>
    %409 = arith.addf %408, %3 : vector<16x128xf32>
    %cst_126 = arith.constant 0.000000e+00 : f32
    %410 = vector.broadcast %cst_126 : f32 to vector<16x128xf32>
    %411 = arith.maximumf %409, %410 : vector<16x128xf32>
    %c16_i32_127 = arith.constant 16 : i32
    %412 = arith.cmpi slt, %398, %c16_i32_127 : i32
    %413 = arith.extui %412 : i1 to i32
    %414 = arith.sitofp %413 : i32 to f32
    %415 = vector.broadcast %414 : f32 to vector<16x128xf32>
    %416 = arith.mulf %411, %415 : vector<16x128xf32>
    %417 = arith.addf %396, %416 : vector<16x128xf32>
    %c16_i32_128 = arith.constant 16 : i32
    %418 = arith.muli %arg1, %c16_i32_128 : i32
    %c14_i32_129 = arith.constant 14 : i32
    %419 = arith.addi %418, %c14_i32_129 : i32
    %420 = vector.extract_strided_slice %122 {offsets = [0, 1792], sizes = [16, 128], strides = [1, 1]} : vector<16x2048xf32> to vector<16x128xf32>
    %421 = vector.broadcast %419 : i32 to vector<16x128xi32>
    %422 = arith.cmpi eq, %8, %421 : vector<16x128xi32>
    %cst_130 = arith.constant 0.000000e+00 : f32
    %423 = vector.broadcast %cst_130 : f32 to vector<16x128xf32>
    %424 = arith.select %422, %423, %420 : vector<16x128xi1>, vector<16x128xf32>
    %425 = arith.truncf %424 : vector<16x128xf32> to vector<16x128xbf16>
    %426 = tpu.concatenate %425, %109 in 1 : vector<16x128xbf16>, vector<16x128xbf16> -> vector<16x256xbf16>
    %cst_131 = arith.constant dense<0.000000e+00> : vector<16x128xf32>
    %427 = tpu.matmul %426, %4, %cst_131 {dimension_numbers = #tpu.dot_dimension_numbers<[1], [0], [0], [1], [0, 0, 1, 1], [], []>} : vector<16x256xbf16>, vector<256x128xbf16>, vector<16x128xf32> -> vector<16x128xf32>
    %428 = vector.broadcast %5 : vector<1x128xf32> to vector<16x128xf32>
    %429 = arith.addf %427, %428 : vector<16x128xf32>
    %430 = arith.addf %429, %3 : vector<16x128xf32>
    %cst_132 = arith.constant 0.000000e+00 : f32
    %431 = vector.broadcast %cst_132 : f32 to vector<16x128xf32>
    %432 = arith.maximumf %430, %431 : vector<16x128xf32>
    %c16_i32_133 = arith.constant 16 : i32
    %433 = arith.cmpi slt, %419, %c16_i32_133 : i32
    %434 = arith.extui %433 : i1 to i32
    %435 = arith.sitofp %434 : i32 to f32
    %436 = vector.broadcast %435 : f32 to vector<16x128xf32>
    %437 = arith.mulf %432, %436 : vector<16x128xf32>
    %438 = arith.addf %417, %437 : vector<16x128xf32>
    %c16_i32_134 = arith.constant 16 : i32
    %439 = arith.muli %arg1, %c16_i32_134 : i32
    %c15_i32_135 = arith.constant 15 : i32
    %440 = arith.addi %439, %c15_i32_135 : i32
    %441 = vector.extract_strided_slice %122 {offsets = [0, 1920], sizes = [16, 128], strides = [1, 1]} : vector<16x2048xf32> to vector<16x128xf32>
    %442 = vector.broadcast %440 : i32 to vector<16x128xi32>
    %443 = arith.cmpi eq, %8, %442 : vector<16x128xi32>
    %cst_136 = arith.constant 0.000000e+00 : f32
    %444 = vector.broadcast %cst_136 : f32 to vector<16x128xf32>
    %445 = arith.select %443, %444, %441 : vector<16x128xi1>, vector<16x128xf32>
    %446 = arith.truncf %445 : vector<16x128xf32> to vector<16x128xbf16>
    %447 = tpu.concatenate %446, %116 in 1 : vector<16x128xbf16>, vector<16x128xbf16> -> vector<16x256xbf16>
    %cst_137 = arith.constant dense<0.000000e+00> : vector<16x128xf32>
    %448 = tpu.matmul %447, %4, %cst_137 {dimension_numbers = #tpu.dot_dimension_numbers<[1], [0], [0], [1], [0, 0, 1, 1], [], []>} : vector<16x256xbf16>, vector<256x128xbf16>, vector<16x128xf32> -> vector<16x128xf32>
    %449 = vector.broadcast %5 : vector<1x128xf32> to vector<16x128xf32>
    %450 = arith.addf %448, %449 : vector<16x128xf32>
    %451 = arith.addf %450, %3 : vector<16x128xf32>
    %cst_138 = arith.constant 0.000000e+00 : f32
    %452 = vector.broadcast %cst_138 : f32 to vector<16x128xf32>
    %453 = arith.maximumf %451, %452 : vector<16x128xf32>
    %c16_i32_139 = arith.constant 16 : i32
    %454 = arith.cmpi slt, %440, %c16_i32_139 : i32
    %455 = arith.extui %454 : i1 to i32
    %456 = arith.sitofp %455 : i32 to f32
    %457 = vector.broadcast %456 : f32 to vector<16x128xf32>
    %458 = arith.mulf %453, %457 : vector<16x128xf32>
    %459 = arith.addf %438, %458 : vector<16x128xf32>
    %c0_140 = arith.constant 0 : index
    %c0_141 = arith.constant 0 : index
    %c0_142 = arith.constant 0 : index
    %c0_143 = arith.constant 0 : index
    %460 = vector.load %arg7[%c0_140, %c0_141, %c0_142, %c0_143] : memref<1x1x16x128xf32, #tpu.memory_space<vmem>>, vector<1x1x16x128xf32>
    %461 = vector.shape_cast %460 : vector<1x1x16x128xf32> to vector<16x128xf32>
    %462 = vector.shape_cast %459 : vector<16x128xf32> to vector<1x1x16x128xf32>
    tpu.vector_store %arg7[%c0_140, %c0_141, %c0_142, %c0_143], %462 {strides = array<i32>} : memref<1x1x16x128xf32, #tpu.memory_space<vmem>>, vector<1x1x16x128xf32>,
    return
  }
  func.func @transform_0(%arg0: i32, %arg1: i32) -> (i32, i32, i32) {
    %c0_i32 = arith.constant 0 : i32
    %c0_i32_0 = arith.constant 0 : i32
    return %arg0, %c0_i32, %arg1 : i32, i32, i32
  }
  func.func @transform_1(%arg0: i32, %arg1: i32) -> (i32, i32, i32) {
    %c0_i32 = arith.constant 0 : i32
    %c0_i32_0 = arith.constant 0 : i32
    %c0_i32_1 = arith.constant 0 : i32
    return %arg0, %c0_i32, %c0_i32_0 : i32, i32, i32
  }
  func.func @transform_2(%arg0: i32, %arg1: i32) -> (i32, i32, i32) {
    %c0_i32 = arith.constant 0 : i32
    %c0_i32_0 = arith.constant 0 : i32
    %c0_i32_1 = arith.constant 0 : i32
    return %arg0, %c0_i32, %c0_i32_0 : i32, i32, i32
  }
  func.func @transform_3(%arg0: i32, %arg1: i32) -> (i32, i32) {
    %c0_i32 = arith.constant 0 : i32
    %c0_i32_0 = arith.constant 0 : i32
    %c0_i32_1 = arith.constant 0 : i32
    return %c0_i32, %c0_i32_0 : i32, i32
  }
  func.func @transform_4(%arg0: i32, %arg1: i32) -> (i32, i32) {
    %c0_i32 = arith.constant 0 : i32
    %c0_i32_0 = arith.constant 0 : i32
    %c0_i32_1 = arith.constant 0 : i32
    return %c0_i32, %c0_i32_0 : i32, i32
  }
  func.func @transform_5(%arg0: i32, %arg1: i32) -> (i32, i32, i32, i32) {
    %c0_i32 = arith.constant 0 : i32
    %c0_i32_0 = arith.constant 0 : i32
    %c0_i32_1 = arith.constant 0 : i32
    return %arg0, %arg1, %c0_i32, %c0_i32_0 : i32, i32, i32, i32
  }
}

module attributes {stable_mosaic.version = 11 : i64} {
  func.func @readout_kernel(%arg0: i32, %arg1: memref<1x1x16x128xf32, #tpu.memory_space<vmem>>, %arg2: memref<128x128xf32, #tpu.memory_space<vmem>>, %arg3: memref<1x128xf32, #tpu.memory_space<vmem>>, %arg4: memref<128x128xf32, #tpu.memory_space<vmem>>, %arg5: memref<1x128xf32, #tpu.memory_space<vmem>>, %arg6: memref<1x1x128xf32, #tpu.memory_space<vmem>>) attributes {dimension_semantics = [#tpu.dimension_semantics<parallel>], iteration_bounds = array<i64: 2>, scalar_prefetch = 0 : i64, scratch_operands = 0 : i64, tpu.core_type = #tpu.core_type<tc>, window_params = [{transform_indices = @transform_0, window_bounds = array<i64: 1, 1, 16, 128>}, {pipeline_mode = #tpu.pipeline_mode<synchronous>, transform_indices = @transform_1, window_bounds = array<i64: 128, 128>}, {pipeline_mode = #tpu.pipeline_mode<synchronous>, transform_indices = @transform_2, window_bounds = array<i64: 1, 128>}, {pipeline_mode = #tpu.pipeline_mode<synchronous>, transform_indices = @transform_3, window_bounds = array<i64: 128, 128>}, {pipeline_mode = #tpu.pipeline_mode<synchronous>, transform_indices = @transform_4, window_bounds = array<i64: 1, 128>}, {transform_indices = @transform_5, window_bounds = array<i64: 1, 1, 128>}]} {
    %c0 = arith.constant 0 : index
    %c0_0 = arith.constant 0 : index
    %c0_1 = arith.constant 0 : index
    %c0_2 = arith.constant 0 : index
    %0 = vector.load %arg1[%c0, %c0_0, %c0_1, %c0_2] : memref<1x1x16x128xf32, #tpu.memory_space<vmem>>, vector<1x1x16x128xf32>
    %1 = vector.shape_cast %0 : vector<1x1x16x128xf32> to vector<1x16x128xf32>
    %cst = arith.constant dense<0.000000e+00> : vector<16x128xf32>
    %2 = vector.multi_reduction <add>, %1, %cst [0] : vector<1x16x128xf32> to vector<16x128xf32>
    %3 = tpu.iota {dimensions = array<i32: 0>} : vector<16x128xi32>
    %c16_i32 = arith.constant 16 : i32
    %4 = vector.broadcast %c16_i32 : i32 to vector<16x128xi32>
    %5 = arith.cmpi slt, %3, %4 : vector<16x128xi32>
    %cst_3 = arith.constant 0.000000e+00 : f32
    %6 = vector.broadcast %cst_3 : f32 to vector<16x128xf32>
    %7 = arith.select %5, %2, %6 : vector<16x128xi1>, vector<16x128xf32>
    %cst_4 = arith.constant dense<0.000000e+00> : vector<128xf32>
    %8 = vector.multi_reduction <add>, %7, %cst_4 [0] : vector<16x128xf32> to vector<128xf32>
    %9 = vector.shape_cast %8 : vector<128xf32> to vector<1x128xf32>
    %cst_5 = arith.constant 3.906250e-03 : f32
    %10 = vector.broadcast %cst_5 : f32 to vector<1x128xf32>
    %11 = arith.mulf %9, %10 : vector<1x128xf32>
    %c0_6 = arith.constant 0 : index
    %c0_7 = arith.constant 0 : index
    %12 = vector.load %arg2[%c0_6, %c0_7] : memref<128x128xf32, #tpu.memory_space<vmem>>, vector<128x128xf32>
    %cst_8 = arith.constant dense<0.000000e+00> : vector<1x128xf32>
    %13 = tpu.matmul %11, %12, %cst_8 {dimension_numbers = #tpu.dot_dimension_numbers<[1], [0], [0], [1], [0, 0, 1, 1], [], []>} : vector<1x128xf32>, vector<128x128xf32>, vector<1x128xf32> -> vector<1x128xf32>
    %c0_9 = arith.constant 0 : index
    %c0_10 = arith.constant 0 : index
    %14 = vector.load %arg3[%c0_9, %c0_10] : memref<1x128xf32, #tpu.memory_space<vmem>>, vector<1x128xf32>
    %15 = arith.addf %13, %14 : vector<1x128xf32>
    %cst_11 = arith.constant 0.000000e+00 : f32
    %16 = vector.broadcast %cst_11 : f32 to vector<1x128xf32>
    %17 = arith.maximumf %15, %16 : vector<1x128xf32>
    %c0_12 = arith.constant 0 : index
    %c0_13 = arith.constant 0 : index
    %18 = vector.load %arg4[%c0_12, %c0_13] : memref<128x128xf32, #tpu.memory_space<vmem>>, vector<128x128xf32>
    %cst_14 = arith.constant dense<0.000000e+00> : vector<1x128xf32>
    %19 = tpu.matmul %17, %18, %cst_14 {dimension_numbers = #tpu.dot_dimension_numbers<[1], [0], [0], [1], [0, 0, 1, 1], [], []>} : vector<1x128xf32>, vector<128x128xf32>, vector<1x128xf32> -> vector<1x128xf32>
    %c0_15 = arith.constant 0 : index
    %c0_16 = arith.constant 0 : index
    %20 = vector.load %arg5[%c0_15, %c0_16] : memref<1x128xf32, #tpu.memory_space<vmem>>, vector<1x128xf32>
    %21 = arith.addf %19, %20 : vector<1x128xf32>
    %22 = tpu.iota {dimensions = array<i32: 1>} : vector<1x128xi32>
    %c4_i32 = arith.constant 4 : i32
    %23 = vector.broadcast %c4_i32 : i32 to vector<1x128xi32>
    %24 = arith.cmpi slt, %22, %23 : vector<1x128xi32>
    %cst_17 = arith.constant -1.000000e+30 : f32
    %25 = vector.broadcast %cst_17 : f32 to vector<1x128xf32>
    %26 = arith.select %24, %21, %25 : vector<1x128xi1>, vector<1x128xf32>
    %cst_18 = arith.constant dense<0xFF800000> : vector<1xf32>
    %27 = vector.multi_reduction <maximumf>, %26, %cst_18 [1] : vector<1x128xf32> to vector<1xf32>
    %28 = vector.shape_cast %27 : vector<1xf32> to vector<1x1xf32>
    %29 = vector.broadcast %28 : vector<1x1xf32> to vector<1x128xf32>
    %30 = arith.subf %26, %29 : vector<1x128xf32>
    %31 = math.exp %30 : vector<1x128xf32>
    %cst_19 = arith.constant dense<0.000000e+00> : vector<1xf32>
    %32 = vector.multi_reduction <add>, %31, %cst_19 [1] : vector<1x128xf32> to vector<1xf32>
    %33 = vector.shape_cast %32 : vector<1xf32> to vector<1x1xf32>
    %34 = math.log %33 : vector<1x1xf32>
    %35 = vector.broadcast %34 : vector<1x1xf32> to vector<1x128xf32>
    %36 = arith.subf %30, %35 : vector<1x128xf32>
    %c0_20 = arith.constant 0 : index
    %c0_21 = arith.constant 0 : index
    %c0_22 = arith.constant 0 : index
    %37 = vector.load %arg6[%c0_20, %c0_21, %c0_22] : memref<1x1x128xf32, #tpu.memory_space<vmem>>, vector<1x1x128xf32>
    %38 = vector.shape_cast %37 : vector<1x1x128xf32> to vector<1x128xf32>
    %39 = vector.shape_cast %36 : vector<1x128xf32> to vector<1x1x128xf32>
    tpu.vector_store %arg6[%c0_20, %c0_21, %c0_22], %39 {strides = array<i32>} : memref<1x1x128xf32, #tpu.memory_space<vmem>>, vector<1x1x128xf32>,
    return
  }
  func.func @transform_0(%arg0: i32) -> (i32, i32, i32, i32) {
    %c0_i32 = arith.constant 0 : i32
    %c0_i32_0 = arith.constant 0 : i32
    %c0_i32_1 = arith.constant 0 : i32
    %c0_i32_2 = arith.constant 0 : i32
    return %arg0, %c0_i32, %c0_i32_0, %c0_i32_1 : i32, i32, i32, i32
  }
  func.func @transform_1(%arg0: i32) -> (i32, i32) {
    %c0_i32 = arith.constant 0 : i32
    %c0_i32_0 = arith.constant 0 : i32
    %c0_i32_1 = arith.constant 0 : i32
    return %c0_i32, %c0_i32_0 : i32, i32
  }
  func.func @transform_2(%arg0: i32) -> (i32, i32) {
    %c0_i32 = arith.constant 0 : i32
    %c0_i32_0 = arith.constant 0 : i32
    %c0_i32_1 = arith.constant 0 : i32
    return %c0_i32, %c0_i32_0 : i32, i32
  }
  func.func @transform_3(%arg0: i32) -> (i32, i32) {
    %c0_i32 = arith.constant 0 : i32
    %c0_i32_0 = arith.constant 0 : i32
    %c0_i32_1 = arith.constant 0 : i32
    return %c0_i32, %c0_i32_0 : i32, i32
  }
  func.func @transform_4(%arg0: i32) -> (i32, i32) {
    %c0_i32 = arith.constant 0 : i32
    %c0_i32_0 = arith.constant 0 : i32
    %c0_i32_1 = arith.constant 0 : i32
    return %c0_i32, %c0_i32_0 : i32, i32
  }
  func.func @transform_5(%arg0: i32) -> (i32, i32, i32) {
    %c0_i32 = arith.constant 0 : i32
    %c0_i32_0 = arith.constant 0 : i32
    %c0_i32_1 = arith.constant 0 : i32
    return %arg0, %c0_i32, %c0_i32_0 : i32, i32, i32
  }
}

</mosaic_0001>

<bundles_post_ra>
// kernel: dss_forward.7
= control target key start
LH: loop header
LB: loop body
LE: loop exit
PB: predicated region body
PF: predicated region fallthrough
CT: control target
= control target key end

     0   :  { %9 = vsyncpa [#allocation3], 0  ;;  %s720_s15 = smov 0   ;;  %s754_s0 = inlined_call_operand.vmem [shape: f32[2,1,16,128], index: 0, kind: input, shape index: {}]   ;;  %s755_s1 = inlined_call_operand.vmem [shape: bf16[2,16,16], index: 1, kind: input, shape index: {}]   ;;  %s756_s2 = inlined_call_operand.hbm [shape: bf16[256,128], index: 2, kind: input, shape index: {}]   ;;  %s757_s3 = inlined_call_operand.vmem [shape: f32[1,128], index: 3, kind: input, shape index: {}]   ;;  %s758_s4 = inlined_call_operand.vmem [shape: f32[2,16,128], index: 4, kind: output, shape index: {}]  }
   0x1 LB: > { %s151_s18 = sshll.u32 %s756_s2, 4  ;;  %s524_s19 = sadd.s32 4294967295, %s690_s15   ;;  %s690_s15 = sphi %s720_s15, %s15_s15   ;;  %s152_s18 = int_to_ptr.hbm [resolvable:$true] %s151_s18 }
   0x2   : > { %p526_p0 = scmp.ge.s32.totalorder %s690_s15, 1  ;;  %p140_p1 = scmp.lt.s32.totalorder %s690_s15, 3 }
   0x3   : > { %p636_p2 = scmp.eq.s32.totalorder %s524_s19, 0  ;;  %s692_s20 = smov [#allocation2]  }
   0x4   : > { %p141_p3 = pnand %p526_p0, %p140_p1  ;;  %s153_s21 = sshll.u32 %s692_s20, 4  ;;  %s154_s21 = int_to_ptr.vmem [resolvable:$true] %s153_s21 }
   0x5   : > { %s693_s22 = smov 64   ;;  %s694_s23 = smov 4  }
   0x6   : > { %p632_p4 = pneg %p141_p3  ;;  %188 = sbr.rel (%p141_p3) target bundleno = 308 (0x134), region = 36 }
   0x8   : > { %p633_p5 = pnand %p636_p2, %p632_p4 }
   0xa   : > { %635 = dma.hbm_to_vmem [thread:$0]  (!%p633_p5), %s152_s18, 2048, %s154_s21, [#allocation3], %s693_s22, %s693_s22, %s694_s23  }
   0xb   : > { %685 = dma.done.wait (%p636_p2), [#allocation3], 2048  }
   0xc   : > { %687 = vsyncadd (%p636_p2), [#allocation3], 4294965248  ;;  %p220_p6 = scmp.lt.s32.totalorder %s524_s19, 1  ;;  %v627_v4 = vld [vmem:[#allocation2 + $0x78] sm:$0xff]  ;;  %v626_v8 = vld [vmem:[#allocation2 + $0x70] sm:$0xff]  ;;  %vm257_vm0 = vcmask 130048  }
   0xd   : > { %v619_v5 = vld [vmem:[#allocation2 + $0x38] sm:$0xff]  ;;  %429 = vmatpush.bf16.msra.mxu2 %v627_v4  ;;  %v618_v9 = vld [vmem:[#allocation2 + $0x30] sm:$0xff]  ;;  %v625_v13 = vld [vmem:[#allocation2 + $0x68] sm:$0xff] }
   0xe   : > { %s760_s19 = smov (!%p220_p6, %s524_s19), 1  ;;  %415 = vmatpush.bf16.msra.mxu1 %v619_v5  ;;  %v617_v15 = vld [vmem:[#allocation2 + $0x28] sm:$0xff]  ;;  %v624_v16 = vld [vmem:[#allocation2 + $0x60] sm:$0xff]  ;;  %v623_v18 = vld [vmem:[#allocation2 + $0x58] sm:$0xff] }
   0xf   : > { %s608_s24 = sshll.u32 %s760_s19, 4  ;;  %s609_s28 = sshll.u32 %s760_s19, 3  ;;  %v616_v17 = vld [vmem:[#allocation2 + $0x20] sm:$0xff]  ;;  %v622_v19 = vld [vmem:[#allocation2 + $0x50] sm:$0xff]  ;;  %v621_v20 = vld [vmem:[#allocation2 + $0x48] sm:$0xff] }
  0x10   : > { %s224_s27 = scalar_lea.vmem %s754_s0, %s608_s24  ;;  %s229_s5 = scalar_lea.vmem %s755_s1, %s609_s28  ;;  %v615_v21 = vld [vmem:[#allocation2 + $0x18] sm:$0xff]  ;;  %v620_v22 = vld [vmem:[#allocation2 + $0x40] sm:$0xff]  ;;  %v614_v23 = vld [vmem:[#allocation2 + $0x10] sm:$0xff] }
  0x11   : > { %v236_v0 = vld [vmem:[%s224_s27] sm:$0xff]  ;;  %v237_v1 = vld [vmem:[%s224_s27 + $0x8] sm:$0xff]  ;;  %430 = vmatpush.bf16.msra.mxu2 %v626_v8  ;;  %s234_s10 = scalar_lea.vmem %s758_s4, %s608_s24 }
  0x12   : > { %v240_v2 = vmul.f32 0.0625, %v236_v0  ;;  %v241_v3 = vmul.f32 0.0625, %v237_v1  ;;  %v611_v14 = vld [vmem:[%s229_s5] sm:$0xff]  ;;  %416 = vmatpush.bf16.msra.mxu1 %v618_v9  ;;  %v613_v24 = vld [vmem:[#allocation2 + $0x8] sm:$0xff] }
  0x13   : > { %v612_v25 = vld [vmem:[#allocation2] sm:$0xff] }
  0x14   : > { %v242_v6 = vpack.c.bf16 %v240_v2, %v240_v2  ;;  %v243_v7 = vpack.c.bf16 %v241_v3, %v241_v3  ;;  %v649_v33 = vld [vmem:[%s757_s3] ss:$0 sm:$0xff] }
  0x15   : > { %431 = vmatpush.bf16.msra.mxu2 %v625_v13 }
  0x16   : > { %v253_v10 = vunpack.c.l.b16 %v242_v6  ;;  %v254_v11 = vunpack.c.l.b16 %v243_v7  ;;  %417 = vmatpush.bf16.msra.mxu1 %v617_v15 }
  0x18   : > { %v255_v12 = vpack.c.b16 %v254_v11, %v253_v10 }
  0x19   : > { %432 = vmatpush.bf16.msra.mxu2 %v624_v16 }
  0x1a   : > { %268 = vmatpush.bf16.msra.mxu0 %v255_v12  ;;  %418 = vmatpush.bf16.msra.mxu1 %v616_v17 }
  0x1d   : > { %541 = vmatmul.msk.bf16.vlgmr.msra.gmra.mxu0 %vm257_vm0, %v611_v14  ;;  %433 = vmatpush.bf16.msra.mxu2 %v623_v18 }
  0x1e   : > { %419 = vmatpush.bf16.msra.mxu1 %v615_v21 }
  0x21   : > { %434 = vmatpush.bf16.msra.mxu2 %v622_v19 }
  0x22   : > { %420 = vmatpush.bf16.msra.mxu1 %v614_v23 }
  0x25   : > { %435 = vmatpush.bf16.msra.mxu2 %v621_v20 }
  0x26   : > { %421 = vmatpush.bf16.msra.mxu1 %v613_v24 }
  0x29   : > { %436 = vmatpush.bf16.msra.mxu2 %v620_v22 }
  0x2a   : > { %422 = vmatpush.bf16.msra.mxu1 %v612_v25 }
  0x2c   : > { %437 = vmatmul.bf16.vlgmr.msra.gmra.mxu2 %v255_v12 }
  0x9a   : > { %v270_v26 = vpop.f32.mrf.mxu0 }
  0x9b   : > { %v275_v27 = vpack.c.bf16 %v270_v26, %v270_v26 }
  0x9d   : > { %v279_v30 = vunpack.c.l.b16 %v275_v27 }
  0xa2   : > { %v272_v28 = vpop.f32.mrf.mxu0 }
  0xa3   : > { %v276_v29 = vpack.c.bf16 %v272_v28, %v272_v28 }
  0xa5   : > { %v280_v31 = vunpack.c.l.b16 %v276_v29 }
  0xa7   : > { %v281_v32 = vpack.c.b16 %v280_v31, %v279_v30 }
  0xa9   : > { %423 = vmatmul.bf16.vlgmr.msra.gmra.mxu1 %v281_v32 }
  0xaf   : > { %v438_v34 = vpop.f32.mrf.mxu2 }
  0xb7   : > { %v440_v40 = vpop.f32.mrf.mxu2 }
 0x126   : > { %v424_v35 = vpop.f32.mrf.mxu1 }
 0x127   : > { %v425_v36 = vadd.f32 %v649_v33, %v424_v35 }
 0x129   : > { %v439_v37 = vadd.f32 %v438_v34, %v425_v36 }
 0x12b   : > { %443 = vst [vmem:[%s234_s10] sm:$0xff] %v439_v37 }
 0x12e   : > { %v426_v38 = vpop.f32.mrf.mxu1 }
 0x12f   : > { %v427_v39 = vadd.f32 %v649_v33, %v426_v38 }
 0x131   : > { %v441_v41 = vadd.f32 %v440_v40, %v427_v39 }
 0x133   : > { %444 = vst [vmem:[%s234_s10 + $0x8] sm:$0xff] %v441_v41 }
 0x134 PF: > { %s15_s15 = sadd.s32 1, %s690_s15  }
 0x135   : > { %p12_p7 = scmp.ge.s32.totalorder %s15_s15, 4  }
 0x137   :  { %14 = sbr.rel (!%p12_p7) target bundleno = 1 (0x1), region = 74 }
 0x13c   :  { %466 = vsyncpa [#allocation3], 1 }
 0x13d   :  { %468 = vsyncpa [#allocation3 + $0x1], 1 }

// kernel: dss_forward.5
= control target key start
LH: loop header
LB: loop body
LE: loop exit
PB: predicated region body
PF: predicated region fallthrough
CT: control target
= control target key end

     0   :  { %s637_s15 = smov 0   ;;  %s716_s0 = inlined_call_operand.vmem [shape: f32[2,1,16,128], index: 0, kind: input, shape index: {}]   ;;  %s717_s1 = inlined_call_operand.vmem [shape: bf16[2,16,16], index: 1, kind: input, shape index: {}]   ;;  %s718_s2 = inlined_call_operand.vmem [shape: bf16[256,128], index: 2, kind: input, shape index: {}]   ;;  %s719_s3 = inlined_call_operand.vmem [shape: f32[1,128], index: 3, kind: input, shape index: {}]   ;;  %s720_s4 = inlined_call_operand.vmem [shape: f32[2,16,128], index: 4, kind: output, shape index: {}]  }
   0x1 LB: > { %s493_s16 = sadd.s32 4294967295, %s610_s15   ;;  %p497_p0 = scmp.ge.s32.totalorder %s610_s15, 1  ;;  %s610_s15 = sphi %s637_s15, %s14_s15  }
   0x2   : > { %p172_p1 = scmp.lt.s32.totalorder %s610_s15, 3 }
   0x4   : > { %p173_p2 = pnand %p497_p0, %p172_p1 }
   0x5   : > { %p203_p3 = scmp.lt.s32.totalorder (!%p173_p2), %s493_s16, 1 }
   0x6   : > { %176 = sbr.rel (%p173_p2) target bundleno = 303 (0x12f), region = 36 }
   0xb   : > { %v594_v0 = vld [vmem:[%s718_s2 + $0x78] sm:$0xff]  ;;  %s722_s16 = smov (!%p203_p3, %s493_s16), 1  ;;  %v593_v2 = vld [vmem:[%s718_s2 + $0x70] sm:$0xff]  ;;  %v592_v6 = vld [vmem:[%s718_s2 + $0x68] sm:$0xff]  ;;  %vm238_vm0 = vcmask 130048  }
   0xc   : > { %v586_v1 = vld [vmem:[%s718_s2 + $0x38] sm:$0xff]  ;;  %410 = vmatpush.bf16.msra.mxu2 %v594_v0  ;;  %v585_v3 = vld [vmem:[%s718_s2 + $0x30] sm:$0xff]  ;;  %s575_s25 = sshll.u32 %s722_s16, 4  ;;  %s576_s29 = sshll.u32 %s722_s16, 3  ;;  %v584_v9 = vld [vmem:[%s718_s2 + $0x28] sm:$0xff] }
   0xd   : > { %396 = vmatpush.bf16.msra.mxu1 %v586_v1  ;;  %s207_s28 = scalar_lea.vmem %s716_s0, %s575_s25  ;;  %s212_s10 = scalar_lea.vmem %s717_s1, %s576_s29  ;;  %v591_v12 = vld [vmem:[%s718_s2 + $0x60] sm:$0xff]  ;;  %v590_v16 = vld [vmem:[%s718_s2 + $0x58] sm:$0xff]  ;;  %v589_v17 = vld [vmem:[%s718_s2 + $0x50] sm:$0xff] }
   0xe   : > { %v219_v4 = vld [vmem:[%s207_s28] sm:$0xff]  ;;  %v220_v5 = vld [vmem:[%s207_s28 + $0x8] sm:$0xff]  ;;  %v582_v19 = vld [vmem:[%s718_s2 + $0x18] sm:$0xff]  ;;  %s217_s12 = scalar_lea.vmem %s720_s4, %s575_s25 }
   0xf   : > { %v223_v7 = vpack.c.bf16 %v219_v4, %v219_v4  ;;  %v224_v8 = vpack.c.bf16 %v220_v5, %v220_v5  ;;  %v583_v14 = vld [vmem:[%s718_s2 + $0x20] sm:$0xff]  ;;  %v588_v18 = vld [vmem:[%s718_s2 + $0x48] sm:$0xff]  ;;  %v581_v21 = vld [vmem:[%s718_s2 + $0x10] sm:$0xff] }
  0x10   : > { %411 = vmatpush.bf16.msra.mxu2 %v593_v2  ;;  %v578_v15 = vld [vmem:[%s212_s10] sm:$0xff]  ;;  %v580_v22 = vld [vmem:[%s718_s2 + $0x8] sm:$0xff] }
  0x11   : > { %397 = vmatpush.bf16.msra.mxu1 %v585_v3  ;;  %v234_v10 = vunpack.c.l.b16 %v223_v7  ;;  %v235_v11 = vunpack.c.l.b16 %v224_v8  ;;  %v587_v20 = vld [vmem:[%s718_s2 + $0x40] sm:$0xff] }
  0x12   : > { %v579_v23 = vld [vmem:[%s718_s2] sm:$0xff] }
  0x13   : > { %v236_v13 = vpack.c.b16 %v235_v11, %v234_v10  ;;  %v603_v31 = vld [vmem:[%s719_s3] ss:$0 sm:$0xff] }
  0x14   : > { %412 = vmatpush.bf16.msra.mxu2 %v592_v6 }
  0x15   : > { %398 = vmatpush.bf16.msra.mxu1 %v584_v9  ;;  %249 = vmatpush.bf16.msra.mxu0 %v236_v13 }
  0x18   : > { %413 = vmatpush.bf16.msra.mxu2 %v591_v12  ;;  %508 = vmatmul.msk.bf16.vlgmr.msra.gmra.mxu0 %vm238_vm0, %v578_v15 }
  0x19   : > { %399 = vmatpush.bf16.msra.mxu1 %v583_v14 }
  0x1c   : > { %414 = vmatpush.bf16.msra.mxu2 %v590_v16 }
  0x1d   : > { %400 = vmatpush.bf16.msra.mxu1 %v582_v19 }
  0x20   : > { %415 = vmatpush.bf16.msra.mxu2 %v589_v17 }
  0x21   : > { %401 = vmatpush.bf16.msra.mxu1 %v581_v21 }
  0x24   : > { %416 = vmatpush.bf16.msra.mxu2 %v588_v18 }
  0x25   : > { %402 = vmatpush.bf16.msra.mxu1 %v580_v22 }
  0x28   : > { %417 = vmatpush.bf16.msra.mxu2 %v587_v20 }
  0x29   : > { %403 = vmatpush.bf16.msra.mxu1 %v579_v23 }
  0x2b   : > { %418 = vmatmul.bf16.vlgmr.msra.gmra.mxu2 %v236_v13 }
  0x95   : > { %v251_v24 = vpop.f32.mrf.mxu0 }
  0x96   : > { %v256_v25 = vpack.c.bf16 %v251_v24, %v251_v24 }
  0x98   : > { %v260_v28 = vunpack.c.l.b16 %v256_v25 }
  0x9d   : > { %v253_v26 = vpop.f32.mrf.mxu0 }
  0x9e   : > { %v257_v27 = vpack.c.bf16 %v253_v26, %v253_v26 }
  0xa0   : > { %v261_v29 = vunpack.c.l.b16 %v257_v27 }
  0xa2   : > { %v262_v30 = vpack.c.b16 %v261_v29, %v260_v28 }
  0xa4   : > { %404 = vmatmul.bf16.vlgmr.msra.gmra.mxu1 %v262_v30 }
  0xae   : > { %v419_v32 = vpop.f32.mrf.mxu2 }
  0xb6   : > { %v421_v38 = vpop.f32.mrf.mxu2 }
 0x121   : > { %v405_v33 = vpop.f32.mrf.mxu1 }
 0x122   : > { %v406_v34 = vadd.f32 %v603_v31, %v405_v33 }
 0x124   : > { %v420_v35 = vadd.f32 %v419_v32, %v406_v34 }
 0x126   : > { %424 = vst [vmem:[%s217_s12] sm:$0xff] %v420_v35 }
 0x129   : > { %v407_v36 = vpop.f32.mrf.mxu1 }
 0x12a   : > { %v408_v37 = vadd.f32 %v603_v31, %v407_v36 }
 0x12c   : > { %v422_v39 = vadd.f32 %v421_v38, %v408_v37 }
 0x12e   : > { %425 = vst [vmem:[%s217_s12 + $0x8] sm:$0xff] %v422_v39 }
 0x12f PF: > { %s14_s15 = sadd.s32 1, %s610_s15  }
 0x130   : > { %p11_p4 = scmp.ge.s32.totalorder %s14_s15, 4  }
 0x132   :  { %13 = sbr.rel (!%p11_p4) target bundleno = 1 (0x1), region = 69 }

// kernel: dss_forward.9
= control target key start
LH: loop header
LB: loop body
LE: loop exit
PB: predicated region body
PF: predicated region fallthrough
CT: control target
= control target key end

     0   :  { %10 = vsyncpa [#allocation3], 0  ;;  %s819_s0 = inlined_call_operand.vmem [shape: f32[2,1,16,128], index: 0, kind: input, shape index: {}]   ;;  %s820_s1 = inlined_call_operand.hbm [shape: f32[128,128], index: 1, kind: input, shape index: {}]   ;;  %s821_s2 = inlined_call_operand.vmem [shape: f32[1,128], index: 2, kind: input, shape index: {}]   ;;  %s822_s3 = inlined_call_operand.hbm [shape: f32[128,128], index: 3, kind: input, shape index: {}]   ;;  %s823_s4 = inlined_call_operand.vmem [shape: f32[1,128], index: 4, kind: input, shape index: {}]   ;;  %s824_s5 = inlined_call_operand.hbm [shape: f32[2,1,128], index: 5, kind: output, shape index: {}]  }
   0x1   :  { %11 = vsyncpa [#allocation6], 0 }
   0x2   :  { %12 = vsyncpa [#allocation4], 0 }
   0x3   :  { %14 = vsyncpa [#allocation4 + $0x1], 0  ;;  %s703_s18 = smov 0   ;;  %s705_s19 = smov 0  }
   0x4   :  { %s707_s20 = smov 0   ;;  %s709_s21 = smov 0  }
   0x5 LB: > { %s724_s22 = sadd.s32 4294967295, %s667_s21   ;;  %s458_s23 = sadd.s32 4294967294, %s667_s21   ;;  %s667_s21 = sphi %s709_s21, %s831_s21   ;;  %s663_s20 = sphi %s707_s20, %s830_s20   ;;  %s659_s19 = sphi %s705_s19, %s829_s19   ;;  %s655_s18 = sphi %s703_s18, %s828_s18  }
   0x6   : > { %s728_s24 = sadd.s32 1, %s667_s21   ;;  %s137_s25 = sadd.s32 1, %s663_s20 }
   0x7   : > { %s134_s26 = ssub.s32 %s667_s21, %s728_s24  ;;  %p147_p0 = scmp.ne.s32.totalorder %s663_s20, %s659_s19 }
   0x8   : > { %p135_p1 = scmp.eq.s32.totalorder %s134_s26, 0  ;;  %p148_p2 = scmp.eq.s32.totalorder %s724_s22, 1 }
   0x9   : > { %p153_p3 = scmp.ne.s32.totalorder %s659_s19, %s655_s18  ;;  %p154_p4 = scmp.eq.s32.totalorder %s458_s23, 1 }
   0xa   : > { %s739_s27 = scalar_select %p135_p1, %s663_s20, %s137_s25  }
   0xb   : > { %p741_p5 = por %p148_p2, %p147_p0  ;;  %p745_p6 = por %p154_p4, %p153_p3 }
   0xc   : > { %p459_p7 = scmp.ge.s32.totalorder %s667_s21, 1  ;;  %p161_p8 = scmp.lt.s32.totalorder %s667_s21, 3 }
   0xd   : > { %p492_p9 = scmp.eq.s32.totalorder %s724_s22, 0  ;;  %s172_s8 = sshll.u32 %s820_s1, 4  ;;  %s173_s8 = int_to_ptr.hbm [resolvable:$true] %s172_s8 }
   0xe   : > { %p752_p10 = pnand %p459_p7, %p161_p8  ;;  %s669_s9 = smov [#allocation2]  }
   0xf   : > { %s174_s10 = sshll.u32 %s669_s9, 4  ;;  %s189_s13 = sshll.u32 %s822_s3, 4  ;;  %s175_s10 = int_to_ptr.vmem [resolvable:$true] %s174_s10  ;;  %s190_s13 = int_to_ptr.hbm [resolvable:$true] %s189_s13 }
  0x10   : > { %p481_p11 = pneg %p752_p10  ;;  %s670_s14 = smov 128  }
  0x11   : > { %s671_s15 = smov 8   ;;  %s672_s16 = smov [#allocation5]  }
  0x12   : > { %p482_p12 = pnand %p492_p9, %p481_p11  ;;  %s191_s17 = sshll.u32 %s672_s16, 4  ;;  %s192_s17 = int_to_ptr.vmem [resolvable:$true] %s191_s17 }
  0x13   : > { %218 = sbr.rel (%p752_p10) target bundleno = 577 (0x241), region = 40 }
  0x14   : > { %484 = dma.hbm_to_vmem [thread:$0]  (!%p482_p12), %s173_s8, 2048, %s175_s10, [#allocation3], %s670_s14, %s670_s14, %s671_s15  }
  0x15   : > { %487 = dma.hbm_to_vmem [thread:$0]  (!%p482_p12), %s190_s13, 2048, %s192_s17, [#allocation6], %s670_s14, %s670_s14, %s671_s15  }
  0x18   : > { %642 = dma.done.wait (%p492_p9), [#allocation3], 2048  }
  0x19   : > { %644 = vsyncadd (%p492_p9), [#allocation3], 4294965248 }
  0x1a   : > { %646 = dma.done.wait (%p492_p9), [#allocation6], 2048  }
  0x1b   : > { %648 = vsyncadd (%p492_p9), [#allocation6], 4294965248  ;;  %p251_p13 = scmp.lt.s32.totalorder %s724_s22, 1  ;;  %v290_v0 = vld [vmem:[#allocation2 + $0x78] sm:$0xff]  ;;  %v289_v1 = vld [vmem:[#allocation2 + $0x70] sm:$0xff]  ;;  %v350_v46 = vlaneseq  ;;  %vm354_vm1 = vcmask 1040384   ;;  %s377_s14 = scalar_lea.hbm %s824_s5, %s724_s22 }
  0x1c   : > { %292 = vmatpush.msra.mxu0 %v290_v0  ;;  %v288_v2 = vld [vmem:[#allocation2 + $0x68] sm:$0xff]  ;;  %v287_v3 = vld [vmem:[#allocation2 + $0x60] sm:$0xff]  ;;  %v286_v6 = vld [vmem:[#allocation2 + $0x58] sm:$0xff]  ;;  %s249_s11 = sand.u32 1, %s659_s19   ;;  %s381_s17 = sshll.u32 %s377_s14, 4  ;;  %s382_s17 = int_to_ptr.hbm [resolvable:$true] %s381_s17 }
  0x1d   : > { %s252_s23 = scalar_select %p251_p13, %s724_s22, 1  ;;  %v328_v8 = vld [vmem:[#allocation5 + $0x78] sm:$0xff]  ;;  %v327_v9 = vld [vmem:[#allocation5 + $0x70] sm:$0xff]  ;;  %v326_v12 = vld [vmem:[#allocation5 + $0x68] sm:$0xff]  ;;  %v351_v47 = vand.u32 127, %v350_v46 }
  0x1e   : > { %293 = vmatpush.msra.mxu0 %v289_v1  ;;  %330 = vmatpush.msra.mxu1 %v328_v8  ;;  %v285_v10 = vld [vmem:[#allocation2 + $0x50] sm:$0xff]  ;;  %v284_v13 = vld [vmem:[#allocation2 + $0x48] sm:$0xff]  ;;  %v325_v15 = vld [vmem:[#allocation5 + $0x60] sm:$0xff]  ;;  %s250_s15 = scalar_lea.vmem [#allocation7], %s249_s11  ;;  %s617_s22 = scalar_lea.hbm %s824_s5, 2 }
  0x1f   : > { %s470_s25 = sshll.u32 %s252_s23, 4  ;;  %v283_v16 = vld [vmem:[#allocation2 + $0x40] sm:$0xff]  ;;  %v324_v18 = vld [vmem:[#allocation5 + $0x58] sm:$0xff]  ;;  %v323_v20 = vld [vmem:[#allocation5 + $0x50] sm:$0xff]  ;;  %vm352_vm0 = vcmp.lt.s32.totalorder %v351_v47, 4  ;;  %s379_s16 = sshll.u32 %s250_s15, 4  ;;  %s380_s16 = int_to_ptr.vmem [resolvable:$true] %s379_s16 }
  0x20   : > { %s255_s6 = scalar_lea.vmem %s819_s0, %s470_s25  ;;  %294 = vmatpush.msra.mxu0 %v288_v2  ;;  %331 = vmatpush.msra.mxu1 %v327_v9  ;;  %v282_v19 = vld [vmem:[#allocation2 + $0x38] sm:$0xff]  ;;  %v281_v21 = vld [vmem:[#allocation2 + $0x30] sm:$0xff]  ;;  %v322_v23 = vld [vmem:[#allocation5 + $0x48] sm:$0xff]  ;;  %s369_s23 = scalar_lea.sflag [#allocation4], %s249_s11 }
  0x21   : > { %v256_v4 = vld [vmem:[%s255_s6] sm:$0xff]  ;;  %v257_v5 = vld [vmem:[%s255_s6 + $0x8] sm:$0xff]  ;;  %v320_v28 = vld [vmem:[#allocation5 + $0x38] sm:$0xff]  ;;  %s611_s25 = sshra.s32 %s382_s17, 4  ;;  %s612_s25 = int_to_ptr.hbm [resolvable:$true] %s611_s25 }
  0x22   : > { %v267_v7 = vadd.f32 %v257_v5, %v256_v4  ;;  %295 = vmatpush.msra.mxu0 %v287_v3  ;;  %332 = vmatpush.msra.mxu1 %v326_v12  ;;  %v280_v24 = vld [vmem:[#allocation2 + $0x28] sm:$0xff]  ;;  %v321_v25 = vld [vmem:[#allocation5 + $0x40] sm:$0xff]  ;;  %v278_v29 = vld [vmem:[#allocation2 + $0x18] sm:$0xff]  ;;  %s613_s26 = scalar_lea.hbm %s612_s25, 1  ;;  %p618_p3 = scmp.lt.s32.totalorder %s612_s25, %s824_s5 }
  0x23   : > { %v279_v26 = vld [vmem:[#allocation2 + $0x20] sm:$0xff]  ;;  %v319_v30 = vld [vmem:[#allocation5 + $0x30] sm:$0xff]  ;;  %v318_v33 = vld [vmem:[#allocation5 + $0x28] sm:$0xff]  ;;  %p614_p0 = scmp.ne.s32.totalorder %s612_s25, %s613_s26  ;;  %p619_p4 = scmp.lt.s32.totalorder %s617_s22, %s613_s26 }
  0x24   : > { %v268_v11 = vrot.slane %v267_v7, 4  ;;  %296 = vmatpush.msra.mxu0 %v286_v6  ;;  %333 = vmatpush.msra.mxu1 %v325_v15  ;;  %v277_v31 = vld [vmem:[#allocation2 + $0x10] sm:$0xff]  ;;  %v276_v34 = vld [vmem:[#allocation2 + $0x8] sm:$0xff]  ;;  %v317_v35 = vld [vmem:[#allocation5 + $0x20] sm:$0xff] }
  0x25   : > { %v275_v36 = vld [vmem:[#allocation2] sm:$0xff]  ;;  %v316_v38 = vld [vmem:[#allocation5 + $0x18] sm:$0xff]  ;;  %v315_v39 = vld [vmem:[#allocation5 + $0x10] sm:$0xff]  ;;  %p615_p1 = pnand %p614_p0, %p741_p5  ;;  %p620_p7 = por %p619_p4, %p618_p3 }
  0x26   : > { %v269_v14 = vadd.f32 %v268_v11, %v267_v7  ;;  %297 = vmatpush.msra.mxu0 %v285_v10  ;;  %334 = vmatpush.msra.mxu1 %v324_v18  ;;  %v314_v40 = vld [vmem:[#allocation5 + $0x8] sm:$0xff]  ;;  %v313_v41 = vld [vmem:[#allocation5] sm:$0xff] }
  0x27   : > { %v291_v42 = vld [vmem:[%s821_s2] sm:$0x1]  ;;  %p616_p2 = pneg %p615_p1 }
  0x28   : > { %v270_v17 = vrot.slane %v269_v14, 2  ;;  %298 = vmatpush.msra.mxu0 %v284_v13  ;;  %335 = vmatpush.msra.mxu1 %v323_v20  ;;  %v329_v48 = vld [vmem:[%s823_s4] sm:$0x1] }
  0x29   : > { %p621_p8 = pnand %p620_p7, %p616_p2 }
  0x2a   : > { %299 = vmatpush.msra.mxu0 %v283_v16  ;;  %v271_v22 = vadd.f32 %v270_v17, %v269_v14  ;;  %336 = vmatpush.msra.mxu1 %v322_v23 }
  0x2c   : > { %300 = vmatpush.msra.mxu0 %v282_v19  ;;  %v272_v27 = vrot.slane %v271_v22, 1  ;;  %337 = vmatpush.msra.mxu1 %v321_v25 }
  0x2e   : > { %301 = vmatpush.msra.mxu0 %v281_v21  ;;  %338 = vmatpush.msra.mxu1 %v320_v28  ;;  %v273_v32 = vadd.f32 %v272_v27, %v271_v22 }
  0x30   : > { %302 = vmatpush.msra.mxu0 %v280_v24  ;;  %339 = vmatpush.msra.mxu1 %v319_v30  ;;  %v274_v37 = vmul.f32 0.00390625, %v273_v32 }
  0x32   : > { %303 = vmatpush.msra.mxu0 %v279_v26  ;;  %340 = vmatpush.msra.mxu1 %v318_v33 }
  0x34   : > { %304 = vmatpush.msra.mxu0 %v278_v29  ;;  %341 = vmatpush.msra.mxu1 %v317_v35 }
  0x36   : > { %305 = vmatpush.msra.mxu0 %v277_v31  ;;  %342 = vmatpush.msra.mxu1 %v316_v38 }
  0x38   : > { %306 = vmatpush.msra.mxu0 %v276_v34  ;;  %343 = vmatpush.msra.mxu1 %v315_v39 }
  0x3a   : > { %307 = vmatpush.msra.mxu0 %v275_v36  ;;  %344 = vmatpush.msra.mxu1 %v314_v40 }
  0x3b   : > { %308 = vmatmul.f32.vlgmr.msra.gmra.mxu0 %v274_v37 }
  0x3c   : > { %345 = vmatpush.msra.mxu1 %v313_v41 }
  0xb8   : > { %v309_v43 = vpop.f32.mrf.mxu0 }
  0xb9   : > { %v310_v44 = vadd.f32 %v309_v43, %v291_v42 }
  0xbb   : > { %v312_v45 = vmax.f32 %v310_v44, 0.0 }
  0xbd   : > { %346 = vmatmul.f32.vlgmr.msra.gmra.mxu1 %v312_v45 }
 0x13a   : > { %v347_v49 = vpop.f32.mrf.mxu1 }
 0x13b   : > { %v348_v50 = vadd.f32 %v347_v49, %v329_v48 }
 0x13d   : > { %v353_v51 = vsel %vm352_vm0, %v348_v50, -1e+30 }
 0x13e   : > { %v355_v52 = vsel %vm354_vm1, %v353_v51, -inf }
 0x13f   : > { %356 = vmax.xlane.f32.xlu0 %v355_v52 }
 0x1b2   : > { %v357_v53 = vpop.xlane.xlu0 %356 }
 0x1b3   : > { %v358_v54 = vsub.f32 %v353_v51, %v357_v53 }
 0x1b5   : > { %v359_v55 = vmul.f32 1.442695, %v358_v54 }
 0x1b7   : > { %533 = vpow2.f32 %v359_v55 }
 0x1bd   : > { %v534_v56 = vpop.eup %533 }
 0x1be   : > { %v361_v57 = vsel %vm354_vm1, %v534_v56, 0.0 }
 0x1bf   : > { %362 = vadd.xlane.f32.xlu0 %v361_v57 }
 0x232   : > { %v363_v58 = vpop.xlane.xlu0 %362 }
 0x233   : > { %535 = vlog2.f32 %v363_v58 }
 0x239   : > { %v536_v59 = vpop.eup %535 }
 0x23a   : > { %v365_v60 = vmul.f32 0.6931472, %v536_v59 }
 0x23c   : > { %v366_v61 = vsub.f32 %v358_v54, %v365_v60 }
 0x23e   : > { %367 = vst [vmem:[%s250_s15] sm:$0x1] %v366_v61 }
 0x23f   : > { %624 = shalt.err (!%p621_p8)
}
 0x240   : > { %479 = dma.vmem_to_hbm [thread:$0]  (%p741_p5), %s380_s16, 16, %s382_s17, %s369_s23  }
 0x241 PF: > { %p496_p9 = scmp.ge.s32.totalorder %s667_s21, 2  ;;  %s393_s9 = sand.u32 1, %s655_s18  }
 0x242   : > { %s394_s10 = scalar_lea.sflag [#allocation4], %s393_s9 }
 0x243   : > { %p489_p10 = pnand %p496_p9, %p745_p6 }
 0x245   : > { %p490_p11 = pneg %p489_p10 }
 0x247   : > { %650 = dma.done.wait (%p490_p11), %s394_s10, 16  }
 0x248   : > { %652 = vsyncadd (%p490_p11), %s394_s10, 4294967280  ;;  %p17_p12 = scmp.ge.s32.totalorder %s728_s24, 4   ;;  %s828_s18 = smov %s659_s19 }
 0x249   : > { %s829_s19 = smov %s663_s20  ;;  %s830_s20 = smov %s739_s27 }
 0x24a   : > { %s831_s21 = smov %s728_s24  ;;  %19 = sbr.rel (!%p17_p12) target bundleno = 5 (0x5), region = 84 }
 0x24f   :  { %399 = vsyncpa [#allocation3], 1 }
 0x250   :  { %401 = vsyncpa [#allocation3 + $0x1], 1 }
 0x251   :  { %402 = vsyncpa [#allocation6], 1 }
 0x252   :  { %403 = vsyncpa [#allocation4], 1 }
 0x253   :  { %405 = vsyncpa [#allocation4 + $0x1], 1 }

// kernel: dss_forward.6
= control target key start
LH: loop header
LB: loop body
LE: loop exit
PB: predicated region body
PF: predicated region fallthrough
CT: control target
= control target key end

     0   :  { %12 = vsyncpa [#allocation3], 0  ;;  %s2342_s21 = smov 0   ;;  %s2344_s22 = smov 0   ;;  %s3035_s0 = inlined_call_operand.vmem [shape: bf16[2,16,128], index: 0, kind: input, shape index: {}]   ;;  %s3036_s1 = inlined_call_operand.vmem [shape: bf16[2,16,16], index: 1, kind: input, shape index: {}]   ;;  %s3037_s2 = inlined_call_operand.vmem [shape: f32[2,16,128], index: 2, kind: input, shape index: {}]   ;;  %s3038_s3 = inlined_call_operand.hbm [shape: bf16[256,128], index: 3, kind: input, shape index: {}]   ;;  %s3039_s4 = inlined_call_operand.vmem [shape: f32[1,128], index: 4, kind: input, shape index: {}]   ;;  %s3040_s5 = inlined_call_operand.vmem [shape: bf16[2,16,2048], index: 5, kind: output, shape index: {0}]   ;;  %s3041_s6 = inlined_call_operand.vmem [shape: f32[2,1,16,128], index: 6, kind: output, shape index: {1}]  }
   0x1   :  { %s2346_s23 = smov 0  }
   0x2 LB: > { %s2076_s24 = sadd.s32 4294967295, %s2301_s23   ;;  %s30_s25 = sadd.s32 1, %s2297_s22  ;;  %s2301_s23 = sphi %s2346_s23, %s18_s23   ;;  %s2297_s22 = sphi %s2344_s22, %s3061_s22   ;;  %s2293_s21 = sphi %s2342_s21, %s3060_s21  }
   0x3   : > { %p32_p0 = scmp.ge.s32.totalorder %s30_s25, 2  ;;  %p2078_p1 = scmp.ge.s32.totalorder %s2301_s23, 1 }
   0x4   : > { %p211_p2 = scmp.lt.s32.totalorder %s2301_s23, 3  ;;  %p2214_p4 = scmp.eq.s32.totalorder %s2076_s24, 0 }
   0x5   : > { %s3063_s25 = smov (%p32_p0, %s30_s25), 0  ;;  %s222_s28 = sshll.u32 %s3038_s3, 4  ;;  %s223_s28 = int_to_ptr.hbm [resolvable:$true] %s222_s28 }
   0x6   : > { %p212_p3 = pnand %p2078_p1, %p211_p2  ;;  %s2303_s29 = smov [#allocation2]  }
   0x7   : > { %s224_s30 = sshll.u32 %s2303_s29, 4  ;;  %s2304_s7 = smov 64   ;;  %s225_s30 = int_to_ptr.vmem [resolvable:$true] %s224_s30 }
   0x8   : > { %p2210_p5 = pneg %p212_p3  ;;  %s2305_s8 = smov 4  }
   0x9   : > { %267 = sbr.rel (%p212_p3) target bundleno = 518 (0x206), region = 40 }
   0xa   : > { %p2211_p6 = pnand %p2214_p4, %p2210_p5 }
   0xc   : > { %2213 = dma.hbm_to_vmem [thread:$0]  (!%p2211_p6), %s223_s28, 2048, %s225_s30, [#allocation3], %s2304_s7, %s2304_s7, %s2305_s8  }
   0xe   : > { %2288 = dma.done.wait (%p2214_p4), [#allocation3], 2048  }
   0xf   : > { %2290 = vsyncadd (%p2214_p4), [#allocation3], 4294965248  ;;  %p321_p7 = scmp.lt.s32.totalorder %s2293_s21, 1  ;;  %v395_v0 = vlaneseq  ;;  %vm2306_vm1 = vmmov 0   ;;  %v2517_v63 = vld [vmem:[#allocation2 + $0x38] sm:$0xff]  ;;  %v2527_v2 = vld [vmem:[#allocation2 + $0x30] sm:$0xff] }
  0x10   : > { %vm2370_vm2 = vmpackc.low %vm2306_vm1, %vm2306_vm1  ;;  %v2587_v15 = vld [vmem:[#allocation2] sm:$0xff] }
  0x11   : > { %s3065_s21 = smov (!%p321_p7, %s2293_s21), 1  ;;  %v2366_v1 = vshrl.u32 %v395_v0, 7  ;;  %v2519_v0 = vld [vmem:[#allocation2 + $0x78] sm:$0xff] }
  0x12   : > { %s2183_s9 = sshll.u32 %s3065_s21, 3  ;;  %s2185_s16 = sshll.u32 %s3065_s21, 4 }
  0x13   : > { %vm400_vm0 = vcmp.eq.s32.totalorder %v2366_v1, 0  ;;  %vm408_vm3 = vcmp.eq.s32.totalorder %v2366_v1, 1  ;;  %s2378_s12 = scalar_lea.vmem %s3035_s0, %s2183_s9  ;;  %vm416_vm5 = vcmp.eq.s32.totalorder %v2366_v1, 2  ;;  %vm424_vm7 = vcmp.eq.s32.totalorder %v2366_v1, 3  ;;  %s330_s15 = scalar_lea.vmem %s3036_s1, %s2183_s9 }
  0x14   : > { %vm402_vm4 = vmpackc.low %vm400_vm0, %vm400_vm0  ;;  %v2389_v3 = vadd.s32 8, %v2366_v1  ;;  %v393_v4 = vld [vmem:[%s2378_s12] sm:$0xf]  ;;  %v2393_v5 = vld [vmem:[%s2378_s12 + $0x4] sm:$0xf]  ;;  %vm432_vm8 = vcmp.eq.s32.totalorder %v2366_v1, 4  ;;  %s335_s24 = scalar_lea.vmem %s3037_s2, %s2185_s16  ;;  %s354_s8 = scalar_lea.vmem %s3041_s6, %s2185_s16 }
  0x15   : > { %vm410_vm6 = vmpackc.low %vm408_vm3, %vm408_vm3  ;;  %vm440_vm9 = vcmp.eq.s32.totalorder %v2366_v1, 5  ;;  %v404_v6 = vsel %vm402_vm4, 0, %v393_v4  ;;  %v405_v7 = vsel %vm2370_vm2, 0, %v2393_v5  ;;  %vm448_vm11 = vcmp.eq.s32.totalorder %v2366_v1, 6  ;;  %v2424_v20 = vld [vmem:[%s330_s15] sm:$0xff]  ;;  %s2186_s26 = sshll.u32 %s3065_s21, 7 }
  0x16   : > { %v412_v8 = vsel %vm410_vm6, 0, %v393_v4  ;;  %vm418_vm10 = vmpackc.low %vm416_vm5, %vm416_vm5  ;;  %v528_v9 = vunpack.c.l.b16 %v404_v6  ;;  %v529_v10 = vunpack.c.l.b16 %v405_v7  ;;  %vm456_vm13 = vcmp.eq.s32.totalorder %v2366_v1, 7  ;;  %v2542_v6 = vld [vmem:[#allocation2 + $0x68] sm:$0xff]  ;;  %v2547_v7 = vld [vmem:[#allocation2 + $0x20] sm:$0xff]  ;;  %s2893_s29 = scalar_lea.vmem %s3040_s5, %s2186_s26 }
  0x17   : > { %v534_v11 = vunpack.c.l.b16 %v412_v8  ;;  %vm426_vm12 = vmpackc.low %vm424_vm7, %vm424_vm7  ;;  %v468_v12 = vsel %vm2370_vm2, 0, %v393_v4  ;;  %v420_v13 = vsel %vm418_vm10, 0, %v393_v4  ;;  %vm3044_vm15 = vcmp.eq.s32.totalorder %v2389_v3, 10  ;;  %v2550_v8 = vld [vmem:[#allocation2 + $0x60] sm:$0xff] }
  0x18   : > { %v428_v14 = vsel %vm426_vm12, 0, %v393_v4  ;;  %vm2416_vm14 = vmpackc.low %vm432_vm8, %vm432_vm8  ;;  %v530_v16 = vpack.c.b16 %v529_v10, %v528_v9  ;;  %v540_v18 = vunpack.c.l.b16 %v420_v13  ;;  %vm627_vm2 = vcmask 130048   ;;  %v2555_v9 = vld [vmem:[#allocation2 + $0x18] sm:$0xff]  ;;  %v2579_v13 = vld [vmem:[#allocation2 + $0x8] sm:$0xff] }
  0x19   : > { %v536_v17 = vpack.c.b16 %v529_v10, %v534_v11  ;;  %v546_v19 = vunpack.c.l.b16 %v428_v14  ;;  %vm442_vm1 = vmpackc.low %vm440_vm9, %vm440_vm9  ;;  %v436_v21 = vsel %vm2416_vm14, 0, %v393_v4  ;;  %vm3042_vm6 = vcmp.eq.s32.totalorder %v2389_v3, 11  ;;  %v2567_v11 = vld [vmem:[#allocation2 + $0x10] sm:$0xff]  ;;  %v2582_v14 = vld [vmem:[#allocation2 + $0x48] sm:$0xff] }
  0x1a   : > { %v444_v22 = vsel %vm442_vm1, 0, %v393_v4  ;;  %vm2431_vm4 = vmpackc.low %vm448_vm11, %vm448_vm11  ;;  %638 = vmatpush.bf16.msra.mxu0 %v530_v16  ;;  %v542_v24 = vpack.c.b16 %v529_v10, %v540_v18  ;;  %v552_v26 = vunpack.c.l.b16 %v436_v21  ;;  %v2439_v28 = vunpack.c.l.b16 %v468_v12  ;;  %v2574_v12 = vld [vmem:[#allocation2 + $0x50] sm:$0xff]  ;;  %v2590_v16 = vld [vmem:[#allocation2 + $0x40] sm:$0xff] }
  0x1b   : > { %652 = vmatpush.bf16.msra.mxu1 %v536_v17  ;;  %v548_v25 = vpack.c.b16 %v529_v10, %v546_v19  ;;  %v558_v27 = vunpack.c.l.b16 %v444_v22  ;;  %vm458_vm10 = vmpackc.low %vm456_vm13, %vm456_vm13  ;;  %v452_v29 = vsel %vm2431_vm4, 0, %v393_v4  ;;  %vm3043_vm1 = vcmp.eq.s32.totalorder %v2389_v3, 15  ;;  %v2598_v17 = vld [vmem:[%s2378_s12] sm:$0xff] }
  0x1c   : > { %v460_v30 = vsel %vm458_vm10, 0, %v393_v4  ;;  %vm2446_vm12 = vmpackc.low %vm3044_vm15, %vm3044_vm15  ;;  %666 = vmatpush.bf16.msra.mxu2 %v542_v24  ;;  %v554_v32 = vpack.c.b16 %v529_v10, %v552_v26  ;;  %v564_v34 = vunpack.c.l.b16 %v452_v29  ;;  %vm465_vm4 = vcmp.eq.s32.totalorder %v2389_v3, 8  ;;  %v2534_v4 = vld [vmem:[#allocation2 + $0x70] sm:$0xff] }
  0x1d   : > { %680 = vmatpush.bf16.msra.mxu3 %v548_v25  ;;  %v560_v33 = vpack.c.b16 %v529_v10, %v558_v27  ;;  %v570_v35 = vunpack.c.l.b16 %v460_v30  ;;  %vm491_vm14 = vmpackc.low %vm3042_vm6, %vm3042_vm6  ;;  %2097 = vmatmul.msk.bf16.vlgmr.msra.gmra.mxu0 %vm627_vm2, %v2424_v20  ;;  %v485_v36 = vsel %vm2446_vm12, 0, %v2393_v5  ;;  %vm3045_vm12 = vcmp.eq.s32.totalorder %v2389_v3, 9 }
  0x1e   : > { %2098 = vmatmul.msk.bf16.vlgmr.msra.gmra.mxu1 %vm627_vm2, %v2424_v20  ;;  %v493_v37 = vsel %vm491_vm14, 0, %v2393_v5  ;;  %694 = vmatpush.bf16.msrb.mxu0 %v554_v32  ;;  %v566_v38 = vpack.c.b16 %v529_v10, %v564_v34  ;;  %v589_v40 = vunpack.c.l.b16 %v485_v36  ;;  %vm2472_vm10 = vmpackc.low %vm3043_vm1, %vm3043_vm1  ;;  %vm497_vm1 = vcmp.eq.s32.totalorder %v2389_v3, 12 }
  0x1f   : > { %708 = vmatpush.bf16.msrb.mxu1 %v560_v33  ;;  %v572_v39 = vpack.c.b16 %v529_v10, %v570_v35  ;;  %v595_v41 = vunpack.c.l.b16 %v493_v37  ;;  %2099 = vmatmul.msk.bf16.vlgmr.msra.gmra.mxu2 %vm627_vm2, %v2424_v20  ;;  %vm467_vm14 = vmpackc.low %vm465_vm4, %vm465_vm4  ;;  %vm505_vm15 = vcmp.eq.s32.totalorder %v2389_v3, 13  ;;  %v525_v49 = vsel %vm2472_vm10, 0, %v2393_v5  ;;  %v2558_v10 = vld [vmem:[#allocation2 + $0x58] sm:$0xff] }
  0x20   : > { %2100 = vmatmul.msk.bf16.vlgmr.msra.gmra.mxu3 %vm627_vm2, %v2424_v20  ;;  %722 = vmatpush.bf16.msrb.mxu2 %v566_v38  ;;  %v590_v42 = vpack.c.b16 %v589_v40, %v2439_v28  ;;  %v469_v45 = vsel %vm467_vm14, 0, %v2393_v5  ;;  %vm475_vm6 = vmpackc.low %vm3045_vm12, %vm3045_vm12  ;;  %vm513_vm12 = vcmp.eq.s32.totalorder %v2389_v3, 14  ;;  %v619_v55 = vunpack.c.l.b16 %v525_v49 }
  0x21   : > { %736 = vmatpush.bf16.msrb.mxu3 %v572_v39  ;;  %v596_v43 = vpack.c.b16 %v595_v41, %v2439_v28  ;;  %v577_v46 = vunpack.c.l.b16 %v469_v45  ;;  %v477_v47 = vsel %vm475_vm6, 0, %v2393_v5  ;;  %vm499_vm14 = vmpackc.low %vm497_vm1, %vm497_vm1 }
  0x22   : > { %v583_v48 = vunpack.c.l.b16 %v477_v47  ;;  %v501_v52 = vsel %vm499_vm14, 0, %v2393_v5  ;;  %vm507_vm6 = vmpackc.low %vm505_vm15, %vm505_vm15  ;;  %v620_v61 = vpack.c.b16 %v619_v55, %v2439_v28 }
  0x23   : > { %v578_v50 = vpack.c.b16 %v577_v46, %v2439_v28  ;;  %v601_v53 = vunpack.c.l.b16 %v501_v52  ;;  %v509_v54 = vsel %vm507_vm6, 0, %v2393_v5  ;;  %vm515_vm10 = vmpackc.low %vm513_vm12, %vm513_vm12 }
  0x24   : > { %778 = vmatpush.bf16.msra.mxu2 %v590_v42  ;;  %v584_v51 = vpack.c.b16 %v583_v48, %v2439_v28  ;;  %v607_v56 = vunpack.c.l.b16 %v509_v54  ;;  %v517_v57 = vsel %vm515_vm10, 0, %v2393_v5  ;;  %v2539_v5 = vld [vmem:[#allocation2 + $0x28] sm:$0xff] }
  0x25   : > { %792 = vmatpush.bf16.msra.mxu3 %v596_v43  ;;  %750 = vmatpush.bf16.msra.mxu0 %v578_v50  ;;  %v613_v58 = vunpack.c.l.b16 %v517_v57  ;;  %v602_v59 = vpack.c.b16 %v601_v53, %v2439_v28 }
  0x26   : > { %764 = vmatpush.bf16.msra.mxu1 %v584_v51  ;;  %v608_v60 = vpack.c.b16 %v607_v56, %v2439_v28 }
  0x27   : > { %v614_v62 = vpack.c.b16 %v613_v58, %v2439_v28 }
  0x2d   : > { %2101 = vmatmul.msk.bf16.vlgmr.msrb.gmra.mxu0 %vm627_vm2, %v2424_v20 }
  0x2e   : > { %2102 = vmatmul.msk.bf16.vlgmr.msrb.gmra.mxu1 %vm627_vm2, %v2424_v20  ;;  %806 = vmatpush.bf16.msrb.mxu0 %v602_v59 }
  0x2f   : > { %820 = vmatpush.bf16.msrb.mxu1 %v608_v60  ;;  %2103 = vmatmul.msk.bf16.vlgmr.msrb.gmra.mxu2 %vm627_vm2, %v2424_v20 }
  0x30   : > { %2104 = vmatmul.msk.bf16.vlgmr.msrb.gmra.mxu3 %vm627_vm2, %v2424_v20  ;;  %834 = vmatpush.bf16.msrb.mxu2 %v614_v62 }
  0x31   : > { %848 = vmatpush.bf16.msrb.mxu3 %v620_v61 }
  0x3d   : > { %2105 = vmatmul.msk.bf16.vlgmr.msra.gmra.mxu0 %vm627_vm2, %v2424_v20 }
  0x3e   : > { %2106 = vmatmul.msk.bf16.vlgmr.msra.gmra.mxu1 %vm627_vm2, %v2424_v20  ;;  %970 = vmatpush.bf16.msra.mxu0 %v2517_v63 }
  0x3f   : > { %984 = vmatpush.bf16.msra.mxu1 %v2519_v0  ;;  %2107 = vmatmul.msk.bf16.vlgmr.msra.gmra.mxu2 %vm627_vm2, %v2424_v20 }
  0x40   : > { %2108 = vmatmul.msk.bf16.vlgmr.msra.gmra.mxu3 %vm627_vm2, %v2424_v20  ;;  %1022 = vmatpush.bf16.msra.mxu2 %v2517_v63 }
  0x41   : > { %1036 = vmatpush.bf16.msra.mxu3 %v2519_v0 }
  0x42   : > { %971 = vmatpush.bf16.msra.mxu0 %v2527_v2 }
  0x43   : > { %985 = vmatpush.bf16.msra.mxu1 %v2534_v4 }
  0x44   : > { %1023 = vmatpush.bf16.msra.mxu2 %v2527_v2 }
  0x45   : > { %1037 = vmatpush.bf16.msra.mxu3 %v2534_v4 }
  0x46   : > { %972 = vmatpush.bf16.msra.mxu0 %v2539_v5 }
  0x47   : > { %986 = vmatpush.bf16.msra.mxu1 %v2542_v6 }
  0x48   : > { %1024 = vmatpush.bf16.msra.mxu2 %v2539_v5 }
  0x49   : > { %1038 = vmatpush.bf16.msra.mxu3 %v2542_v6 }
  0x4a   : > { %973 = vmatpush.bf16.msra.mxu0 %v2547_v7 }
  0x4b   : > { %987 = vmatpush.bf16.msra.mxu1 %v2550_v8 }
  0x4c   : > { %1025 = vmatpush.bf16.msra.mxu2 %v2547_v7 }
  0x4d   : > { %1039 = vmatpush.bf16.msra.mxu3 %v2550_v8  ;;  %2109 = vmatmul.msk.bf16.vlgmr.msrb.gmra.mxu0 %vm627_vm2, %v2424_v20 }
  0x4e   : > { %2110 = vmatmul.msk.bf16.vlgmr.msrb.gmra.mxu1 %vm627_vm2, %v2424_v20  ;;  %974 = vmatpush.bf16.msra.mxu0 %v2555_v9 }
  0x4f   : > { %988 = vmatpush.bf16.msra.mxu1 %v2558_v10  ;;  %2111 = vmatmul.msk.bf16.vlgmr.msrb.gmra.mxu2 %vm627_vm2, %v2424_v20 }
  0x50   : > { %2112 = vmatmul.msk.bf16.vlgmr.msrb.gmra.mxu3 %vm627_vm2, %v2424_v20  ;;  %1026 = vmatpush.bf16.msra.mxu2 %v2555_v9 }
  0x51   : > { %1040 = vmatpush.bf16.msra.mxu3 %v2558_v10 }
  0x52   : > { %975 = vmatpush.bf16.msra.mxu0 %v2567_v11 }
  0x53   : > { %989 = vmatpush.bf16.msra.mxu1 %v2574_v12 }
  0x54   : > { %1027 = vmatpush.bf16.msra.mxu2 %v2567_v11 }
  0x55   : > { %1041 = vmatpush.bf16.msra.mxu3 %v2574_v12 }
  0x56   : > { %976 = vmatpush.bf16.msra.mxu0 %v2579_v13 }
  0x57   : > { %990 = vmatpush.bf16.msra.mxu1 %v2582_v14 }
  0x58   : > { %1028 = vmatpush.bf16.msra.mxu2 %v2579_v13 }
  0x59   : > { %1042 = vmatpush.bf16.msra.mxu3 %v2582_v14 }
  0x5a   : > { %977 = vmatpush.bf16.msra.mxu0 %v2587_v15 }
  0x5b   : > { %991 = vmatpush.bf16.msra.mxu1 %v2590_v16 }
  0x5c   : > { %1029 = vmatpush.bf16.msra.mxu2 %v2587_v15 }
  0x5d   : > { %1043 = vmatpush.bf16.msra.mxu3 %v2590_v16 }
  0x5e   : > { %1074 = vmatpush.bf16.msrb.mxu0 %v2517_v63  ;;  %992 = vmatmul.bf16.vlgmr.msra.gmra.mxu1 %v2598_v17 }
  0x5f   : > { %1088 = vmatpush.bf16.msrb.mxu1 %v2519_v0 }
  0x60   : > { %1126 = vmatpush.bf16.msrb.mxu2 %v2517_v63  ;;  %1044 = vmatmul.bf16.vlgmr.msra.gmra.mxu3 %v2598_v17 }
  0x61   : > { %1140 = vmatpush.bf16.msrb.mxu3 %v2519_v0 }
  0x62   : > { %1075 = vmatpush.bf16.msrb.mxu0 %v2527_v2 }
  0x63   : > { %1089 = vmatpush.bf16.msrb.mxu1 %v2534_v4 }
  0x64   : > { %1127 = vmatpush.bf16.msrb.mxu2 %v2527_v2 }
  0x65   : > { %1141 = vmatpush.bf16.msrb.mxu3 %v2534_v4 }
  0x66   : > { %1076 = vmatpush.bf16.msrb.mxu0 %v2539_v5 }
  0x67   : > { %1090 = vmatpush.bf16.msrb.mxu1 %v2542_v6 }
  0x68   : > { %1128 = vmatpush.bf16.msrb.mxu2 %v2539_v5 }
  0x69   : > { %1142 = vmatpush.bf16.msrb.mxu3 %v2542_v6 }
  0x6a   : > { %1077 = vmatpush.bf16.msrb.mxu0 %v2547_v7 }
  0x6b   : > { %1091 = vmatpush.bf16.msrb.mxu1 %v2550_v8 }
  0x6c   : > { %1129 = vmatpush.bf16.msrb.mxu2 %v2547_v7 }
  0x6d   : > { %1143 = vmatpush.bf16.msrb.mxu3 %v2550_v8 }
  0x6e   : > { %1078 = vmatpush.bf16.msrb.mxu0 %v2555_v9 }
  0x6f   : > { %1092 = vmatpush.bf16.msrb.mxu1 %v2558_v10 }
  0x70   : > { %1130 = vmatpush.bf16.msrb.mxu2 %v2555_v9 }
  0x71   : > { %1144 = vmatpush.bf16.msrb.mxu3 %v2558_v10 }
  0x72   : > { %1079 = vmatpush.bf16.msrb.mxu0 %v2567_v11 }
  0x73   : > { %1093 = vmatpush.bf16.msrb.mxu1 %v2574_v12 }
  0x74   : > { %1131 = vmatpush.bf16.msrb.mxu2 %v2567_v11 }
  0x75   : > { %1145 = vmatpush.bf16.msrb.mxu3 %v2574_v12 }
  0x76   : > { %1080 = vmatpush.bf16.msrb.mxu0 %v2579_v13 }
  0x77   : > { %1094 = vmatpush.bf16.msrb.mxu1 %v2582_v14 }
  0x78   : > { %1132 = vmatpush.bf16.msrb.mxu2 %v2579_v13 }
  0x79   : > { %1146 = vmatpush.bf16.msrb.mxu3 %v2582_v14 }
  0x7a   : > { %1081 = vmatpush.bf16.msrb.mxu0 %v2587_v15 }
  0x7b   : > { %1095 = vmatpush.bf16.msrb.mxu1 %v2590_v16 }
  0x7c   : > { %1133 = vmatpush.bf16.msrb.mxu2 %v2587_v15 }
  0x7d   : > { %1147 = vmatpush.bf16.msrb.mxu3 %v2590_v16 }
  0x7e   : > { %1096 = vmatmul.bf16.vlgmr.msrb.gmra.mxu1 %v2598_v17 }
  0x7f   : > { %1192 = vmatpush.bf16.msra.mxu1 %v2519_v0 }
  0x80   : > { %1148 = vmatmul.bf16.vlgmr.msrb.gmra.mxu3 %v2598_v17 }
  0x81   : > { %1244 = vmatpush.bf16.msra.mxu3 %v2519_v0 }
  0x83   : > { %1193 = vmatpush.bf16.msra.mxu1 %v2534_v4 }
  0x85   : > { %1245 = vmatpush.bf16.msra.mxu3 %v2534_v4 }
  0x87   : > { %1194 = vmatpush.bf16.msra.mxu1 %v2542_v6 }
  0x89   : > { %1246 = vmatpush.bf16.msra.mxu3 %v2542_v6 }
  0x8b   : > { %1195 = vmatpush.bf16.msra.mxu1 %v2550_v8 }
  0x8d   : > { %1247 = vmatpush.bf16.msra.mxu3 %v2550_v8 }
  0x8f   : > { %1196 = vmatpush.bf16.msra.mxu1 %v2558_v10 }
  0x91   : > { %1248 = vmatpush.bf16.msra.mxu3 %v2558_v10 }
  0x93   : > { %1197 = vmatpush.bf16.msra.mxu1 %v2574_v12 }
  0x95   : > { %1249 = vmatpush.bf16.msra.mxu3 %v2574_v12 }
  0x97   : > { %1198 = vmatpush.bf16.msra.mxu1 %v2582_v14 }
  0x99   : > { %1250 = vmatpush.bf16.msra.mxu3 %v2582_v14 }
  0x9a   : > { %v640_v18 = vpop.f32.mrf.mxu0 }
  0x9b   : > { %1199 = vmatpush.bf16.msra.mxu1 %v2590_v16  ;;  %v654_v19 = vpop.f32.mrf.mxu1  ;;  %v855_v20 = vsel %vm400_vm0, 0.0, %v640_v18  ;;  %vm3056_vm0 = vcmp.eq.s32.totalorder %v2389_v3, 9 }
  0x9c   : > { %v1012_v21 = vsel %vm408_vm3, 0.0, %v654_v19  ;;  %v857_v22 = vpack.c.bf16 %v855_v20, %v855_v20  ;;  %vm3057_vm3 = vcmp.eq.s32.totalorder %v2389_v3, 10 }
  0x9d   : > { %1251 = vmatpush.bf16.msra.mxu3 %v2590_v16  ;;  %v1014_v23 = vpack.c.bf16 %v1012_v21, %v1012_v21 }
  0x9e   : > { %1200 = vmatmul.bf16.vlgmr.msra.gmra.mxu1 %v2598_v17  ;;  %v861_v26 = vunpack.c.l.b16 %v857_v22 }
  0x9f   : > { %1296 = vmatpush.bf16.msrb.mxu1 %v2519_v0  ;;  %v1018_v31 = vunpack.c.l.b16 %v1014_v23 }
  0xa0   : > { %1252 = vmatmul.bf16.vlgmr.msra.gmra.mxu3 %v2598_v17 }
  0xa1   : > { %1348 = vmatpush.bf16.msrb.mxu3 %v2519_v0 }
  0xa2   : > { %v642_v24 = vpop.f32.mrf.mxu0  ;;  %v668_v29 = vpop.f32.mrf.mxu2 }
  0xa3   : > { %1297 = vmatpush.bf16.msrb.mxu1 %v2534_v4  ;;  %v656_v25 = vpop.f32.mrf.mxu1  ;;  %v858_v27 = vpack.c.bf16 %v642_v24, %v642_v24  ;;  %v682_v30 = vpop.f32.mrf.mxu3  ;;  %v1064_v36 = vsel %vm416_vm5, 0.0, %v668_v29  ;;  %vm3058_vm5 = vcmp.eq.s32.totalorder %v2389_v3, 11 }
  0xa4   : > { %v1015_v28 = vpack.c.bf16 %v656_v25, %v656_v25  ;;  %v1116_v37 = vsel %vm424_vm7, 0.0, %v682_v30  ;;  %v1066_v40 = vpack.c.bf16 %v1064_v36, %v1064_v36  ;;  %vm3059_vm7 = vcmp.eq.s32.totalorder %v2389_v3, 15 }
  0xa5   : > { %1349 = vmatpush.bf16.msrb.mxu3 %v2534_v4  ;;  %v862_v32 = vunpack.c.l.b16 %v858_v27  ;;  %v1118_v41 = vpack.c.bf16 %v1116_v37, %v1116_v37 }
  0xa6   : > { %v1019_v33 = vunpack.c.l.b16 %v1015_v28  ;;  %v1070_v46 = vunpack.c.l.b16 %v1066_v40 }
  0xa7   : > { %1298 = vmatpush.bf16.msrb.mxu1 %v2542_v6  ;;  %v863_v34 = vpack.c.b16 %v862_v32, %v861_v26  ;;  %v1122_v47 = vunpack.c.l.b16 %v1118_v41 }
  0xa8   : > { %v1020_v35 = vpack.c.b16 %v1019_v33, %v1018_v31 }
  0xa9   : > { %1350 = vmatpush.bf16.msrb.mxu3 %v2542_v6  ;;  %978 = vmatmul.bf16.vlgmr.msra.gmra.mxu0 %v863_v34 }
  0xaa   : > { %1030 = vmatmul.bf16.vlgmr.msra.gmra.mxu2 %v1020_v35  ;;  %1178 = vmatpush.bf16.msra.mxu0 %v2517_v63  ;;  %v670_v38 = vpop.f32.mrf.mxu2  ;;  %v696_v44 = vpop.f32.mrf.mxu0 }
  0xab   : > { %1299 = vmatpush.bf16.msrb.mxu1 %v2550_v8  ;;  %1230 = vmatpush.bf16.msra.mxu2 %v2517_v63  ;;  %v684_v39 = vpop.f32.mrf.mxu3  ;;  %v1067_v42 = vpack.c.bf16 %v670_v38, %v670_v38  ;;  %v710_v45 = vpop.f32.mrf.mxu1  ;;  %v1168_v52 = vsel %vm432_vm8, 0.0, %v696_v44 }
  0xac   : > { %v1119_v43 = vpack.c.bf16 %v684_v39, %v684_v39  ;;  %v1220_v53 = vsel %vm440_vm9, 0.0, %v710_v45  ;;  %v1170_v56 = vpack.c.bf16 %v1168_v52, %v1168_v52 }
  0xad   : > { %1351 = vmatpush.bf16.msrb.mxu3 %v2550_v8  ;;  %v1071_v48 = vunpack.c.l.b16 %v1067_v42  ;;  %v1222_v57 = vpack.c.bf16 %v1220_v53, %v1220_v53 }
  0xae   : > { %1179 = vmatpush.bf16.msra.mxu0 %v2527_v2  ;;  %v1123_v49 = vunpack.c.l.b16 %v1119_v43  ;;  %v1174_v60 = vunpack.c.l.b16 %v1170_v56 }
  0xaf   : > { %1300 = vmatpush.bf16.msrb.mxu1 %v2558_v10  ;;  %1231 = vmatpush.bf16.msra.mxu2 %v2527_v2  ;;  %v1072_v50 = vpack.c.b16 %v1071_v48, %v1070_v46  ;;  %v1226_v61 = vunpack.c.l.b16 %v1222_v57 }
  0xb0   : > { %v1124_v51 = vpack.c.b16 %v1123_v49, %v1122_v47 }
  0xb1   : > { %1352 = vmatpush.bf16.msrb.mxu3 %v2558_v10 }
  0xb2   : > { %1180 = vmatpush.bf16.msra.mxu0 %v2539_v5  ;;  %v698_v54 = vpop.f32.mrf.mxu0  ;;  %v724_v21 = vpop.f32.mrf.mxu2 }
  0xb3   : > { %1301 = vmatpush.bf16.msrb.mxu1 %v2574_v12  ;;  %1232 = vmatpush.bf16.msra.mxu2 %v2539_v5  ;;  %v712_v55 = vpop.f32.mrf.mxu1  ;;  %v1171_v58 = vpack.c.bf16 %v698_v54, %v698_v54  ;;  %v738_v22 = vpop.f32.mrf.mxu3  ;;  %v1272_v23 = vsel %vm448_vm11, 0.0, %v724_v21 }
  0xb4   : > { %v1223_v59 = vpack.c.bf16 %v712_v55, %v712_v55  ;;  %v1324_v24 = vsel %vm456_vm13, 0.0, %v738_v22  ;;  %v1274_v27 = vpack.c.bf16 %v1272_v23, %v1272_v23 }
  0xb5   : > { %1353 = vmatpush.bf16.msrb.mxu3 %v2574_v12  ;;  %v1175_v62 = vunpack.c.l.b16 %v1171_v58  ;;  %v1326_v28 = vpack.c.bf16 %v1324_v24, %v1324_v24 }
  0xb6   : > { %1181 = vmatpush.bf16.msra.mxu0 %v2547_v7  ;;  %v1227_v18 = vunpack.c.l.b16 %v1223_v59  ;;  %v1278_v1 = vunpack.c.l.b16 %v1274_v27 }
  0xb7   : > { %1302 = vmatpush.bf16.msrb.mxu1 %v2582_v14  ;;  %1233 = vmatpush.bf16.msra.mxu2 %v2547_v7  ;;  %v1176_v19 = vpack.c.b16 %v1175_v62, %v1174_v60  ;;  %v1330_v31 = vunpack.c.l.b16 %v1326_v28 }
  0xb8   : > { %v1228_v20 = vpack.c.b16 %v1227_v18, %v1226_v61 }
  0xb9   : > { %1354 = vmatpush.bf16.msrb.mxu3 %v2582_v14  ;;  %1082 = vmatmul.bf16.vlgmr.msrb.gmra.mxu0 %v1072_v50 }
  0xba   : > { %1134 = vmatmul.bf16.vlgmr.msrb.gmra.mxu2 %v1124_v51  ;;  %1182 = vmatpush.bf16.msra.mxu0 %v2555_v9  ;;  %v726_v25 = vpop.f32.mrf.mxu2  ;;  %v752_v36 = vpop.f32.mrf.mxu0 }
  0xbb   : > { %1303 = vmatpush.bf16.msrb.mxu1 %v2590_v16  ;;  %1234 = vmatpush.bf16.msra.mxu2 %v2555_v9  ;;  %v740_v26 = vpop.f32.mrf.mxu3  ;;  %v1275_v29 = vpack.c.bf16 %v726_v25, %v726_v25  ;;  %v766_v37 = vpop.f32.mrf.mxu1  ;;  %v1378_v42 = vpack.c.bf16 %v752_v36, %v752_v36 }
  0xbc   : > { %v1327_v30 = vpack.c.bf16 %v740_v26, %v740_v26  ;;  %v1430_v43 = vpack.c.bf16 %v766_v37, %v766_v37 }
  0xbd   : > { %1355 = vmatpush.bf16.msrb.mxu3 %v2590_v16  ;;  %v1279_v32 = vunpack.c.l.b16 %v1275_v29  ;;  %v1382_v46 = vunpack.c.l.b16 %v1378_v42 }
  0xbe   : > { %1304 = vmatmul.bf16.vlgmr.msrb.gmra.mxu1 %v2598_v17  ;;  %1183 = vmatpush.bf16.msra.mxu0 %v2567_v11  ;;  %v1331_v33 = vunpack.c.l.b16 %v1327_v30  ;;  %v1434_v47 = vunpack.c.l.b16 %v1430_v43 }
  0xbf   : > { %1400 = vmatpush.bf16.msra.mxu1 %v2519_v0  ;;  %1235 = vmatpush.bf16.msra.mxu2 %v2567_v11  ;;  %v1280_v34 = vpack.c.b16 %v1279_v32, %v1278_v1 }
  0xc0   : > { %1356 = vmatmul.bf16.vlgmr.msrb.gmra.mxu3 %v2598_v17  ;;  %v1332_v35 = vpack.c.b16 %v1331_v33, %v1330_v31 }
  0xc1   : > { %1452 = vmatpush.bf16.msra.mxu3 %v2519_v0 }
  0xc2   : > { %1184 = vmatpush.bf16.msra.mxu0 %v2579_v13  ;;  %v754_v38 = vpop.f32.mrf.mxu0  ;;  %v780_v53 = vpop.f32.mrf.mxu2 }
  0xc3   : > { %1401 = vmatpush.bf16.msra.mxu1 %v2534_v4  ;;  %1236 = vmatpush.bf16.msra.mxu2 %v2579_v13  ;;  %v768_v39 = vpop.f32.mrf.mxu1  ;;  %v1377_v40 = vsel %vm465_vm4, 0.0, %v754_v38  ;;  %v794_v50 = vpop.f32.mrf.mxu3 }
  0xc4   : > { %v1429_v41 = vsel %vm3056_vm0, 0.0, %v768_v39  ;;  %v1379_v44 = vpack.c.bf16 %v1377_v40, %v1377_v40  ;;  %v1534_v60 = vpack.c.bf16 %v794_v50, %v794_v50 }
  0xc5   : > { %1453 = vmatpush.bf16.msra.mxu3 %v2534_v4  ;;  %v1431_v45 = vpack.c.bf16 %v1429_v41, %v1429_v41 }
  0xc6   : > { %1185 = vmatpush.bf16.msra.mxu0 %v2587_v15  ;;  %v1383_v48 = vunpack.c.l.b16 %v1379_v44 }
  0xc7   : > { %1402 = vmatpush.bf16.msra.mxu1 %v2542_v6  ;;  %1237 = vmatpush.bf16.msra.mxu2 %v2587_v15  ;;  %v1435_v49 = vunpack.c.l.b16 %v1431_v45 }
  0xc8   : > { %v1384_v51 = vpack.c.b16 %v1383_v48, %v1382_v46 }
  0xc9   : > { %1454 = vmatpush.bf16.msra.mxu3 %v2542_v6  ;;  %1186 = vmatmul.bf16.vlgmr.msra.gmra.mxu0 %v1176_v19  ;;  %v1436_v52 = vpack.c.b16 %v1435_v49, %v1434_v47  ;;  %v1538_v19 = vunpack.c.l.b16 %v1534_v60 }
  0xca   : > { %1282 = vmatpush.bf16.msrb.mxu0 %v2517_v63  ;;  %1238 = vmatmul.bf16.vlgmr.msra.gmra.mxu2 %v1228_v20  ;;  %v782_v56 = vpop.f32.mrf.mxu2  ;;  %v2818_v59 = vpop.f32.mrf.mxu0 }
  0xcb   : > { %1403 = vmatpush.bf16.msra.mxu1 %v2550_v8  ;;  %1334 = vmatpush.bf16.msrb.mxu2 %v2517_v63  ;;  %v796_v54 = vpop.f32.mrf.mxu3  ;;  %v2800_v55 = vpop.f32.mrf.mxu1  ;;  %v1481_v57 = vsel %vm3057_vm3, 0.0, %v782_v56  ;;  %v1586_v41 = vpack.c.bf16 %v2818_v59, %v2818_v59 }
  0xcc   : > { %v1533_v58 = vsel %vm3058_vm5, 0.0, %v796_v54  ;;  %v1483_v61 = vpack.c.bf16 %v1481_v57, %v1481_v57  ;;  %v1638_v42 = vpack.c.bf16 %v2800_v55, %v2800_v55 }
  0xcd   : > { %1455 = vmatpush.bf16.msra.mxu3 %v2550_v8  ;;  %v1535_v62 = vpack.c.bf16 %v1533_v58, %v1533_v58 }
  0xce   : > { %1283 = vmatpush.bf16.msrb.mxu0 %v2527_v2  ;;  %v1487_v20 = vunpack.c.l.b16 %v1483_v61  ;;  %v1642_v55 = vunpack.c.l.b16 %v1638_v42 }
  0xcf   : > { %1404 = vmatpush.bf16.msra.mxu1 %v2558_v10  ;;  %1335 = vmatpush.bf16.msrb.mxu2 %v2527_v2  ;;  %v1539_v21 = vunpack.c.l.b16 %v1535_v62 }
  0xd1   : > { %1456 = vmatpush.bf16.msra.mxu3 %v2558_v10  ;;  %v1540_v24 = vpack.c.b16 %v1539_v21, %v1538_v19 }
  0xd2   : > { %1284 = vmatpush.bf16.msrb.mxu0 %v2539_v5  ;;  %v2826_v22 = vpop.f32.mrf.mxu2  ;;  %v810_v25 = vpop.f32.mrf.mxu0 }
  0xd3   : > { %1405 = vmatpush.bf16.msra.mxu1 %v2574_v12  ;;  %1336 = vmatpush.bf16.msrb.mxu2 %v2539_v5  ;;  %v824_v18 = vpop.f32.mrf.mxu1  ;;  %v1585_v36 = vsel %vm497_vm1, 0.0, %v810_v25 }
  0xd4   : > { %v1637_v37 = vsel %vm505_vm15, 0.0, %v824_v18  ;;  %v1587_v45 = vpack.c.bf16 %v1585_v36, %v1585_v36 }
  0xd5   : > { %1457 = vmatpush.bf16.msra.mxu3 %v2574_v12  ;;  %v1639_v46 = vpack.c.bf16 %v1637_v37, %v1637_v37 }
  0xd6   : > { %1285 = vmatpush.bf16.msrb.mxu0 %v2547_v7  ;;  %v1591_v56 = vunpack.c.l.b16 %v1587_v45 }
  0xd7   : > { %1406 = vmatpush.bf16.msra.mxu1 %v2582_v14  ;;  %1337 = vmatpush.bf16.msrb.mxu2 %v2547_v7  ;;  %v1643_v57 = vunpack.c.l.b16 %v1639_v46 }
  0xd9   : > { %1458 = vmatpush.bf16.msra.mxu3 %v2582_v14 }
  0xda   : > { %1286 = vmatpush.bf16.msrb.mxu0 %v2555_v9  ;;  %v2848_v27 = vpop.f32.mrf.mxu2 }
  0xdb   : > { %1407 = vmatpush.bf16.msra.mxu1 %v2590_v16  ;;  %1338 = vmatpush.bf16.msrb.mxu2 %v2555_v9  ;;  %v993_v26 = vpop.f32.mrf.mxu1 }
  0xdd   : > { %1459 = vmatpush.bf16.msra.mxu3 %v2590_v16 }
  0xde   : > { %1408 = vmatmul.bf16.vlgmr.msra.gmra.mxu1 %v2598_v17  ;;  %1287 = vmatpush.bf16.msrb.mxu0 %v2567_v11 }
  0xdf   : > { %1504 = vmatpush.bf16.msrb.mxu1 %v2519_v0  ;;  %1339 = vmatpush.bf16.msrb.mxu2 %v2567_v11 }
  0xe0   : > { %1460 = vmatmul.bf16.vlgmr.msra.gmra.mxu3 %v2598_v17 }
  0xe1   : > { %1556 = vmatpush.bf16.msrb.mxu3 %v2519_v0 }
  0xe2   : > { %1288 = vmatpush.bf16.msrb.mxu0 %v2579_v13 }
  0xe3   : > { %1505 = vmatpush.bf16.msrb.mxu1 %v2534_v4  ;;  %1340 = vmatpush.bf16.msrb.mxu2 %v2579_v13  ;;  %v995_v30 = vpop.f32.mrf.mxu1 }
  0xe5   : > { %1557 = vmatpush.bf16.msrb.mxu3 %v2534_v4 }
  0xe6   : > { %1289 = vmatpush.bf16.msrb.mxu0 %v2587_v15 }
  0xe7   : > { %1506 = vmatpush.bf16.msrb.mxu1 %v2542_v6  ;;  %1341 = vmatpush.bf16.msrb.mxu2 %v2587_v15 }
  0xe9   : > { %1558 = vmatpush.bf16.msrb.mxu3 %v2542_v6  ;;  %1290 = vmatmul.bf16.vlgmr.msrb.gmra.mxu0 %v1280_v34 }
  0xea   : > { %1386 = vmatpush.bf16.msra.mxu0 %v2517_v63  ;;  %1342 = vmatmul.bf16.vlgmr.msrb.gmra.mxu2 %v1332_v35 }
  0xeb   : > { %1507 = vmatpush.bf16.msrb.mxu1 %v2550_v8  ;;  %1438 = vmatpush.bf16.msra.mxu2 %v2517_v63 }
  0xed   : > { %1559 = vmatpush.bf16.msrb.mxu3 %v2550_v8 }
  0xee   : > { %1387 = vmatpush.bf16.msra.mxu0 %v2527_v2 }
  0xef   : > { %1508 = vmatpush.bf16.msrb.mxu1 %v2558_v10  ;;  %1439 = vmatpush.bf16.msra.mxu2 %v2527_v2 }
  0xf1   : > { %1560 = vmatpush.bf16.msrb.mxu3 %v2558_v10 }
  0xf2   : > { %1388 = vmatpush.bf16.msra.mxu0 %v2539_v5 }
  0xf3   : > { %1509 = vmatpush.bf16.msrb.mxu1 %v2574_v12  ;;  %1440 = vmatpush.bf16.msra.mxu2 %v2539_v5 }
  0xf5   : > { %1561 = vmatpush.bf16.msrb.mxu3 %v2574_v12 }
  0xf6   : > { %1389 = vmatpush.bf16.msra.mxu0 %v2547_v7 }
  0xf7   : > { %1510 = vmatpush.bf16.msrb.mxu1 %v2582_v14  ;;  %1441 = vmatpush.bf16.msra.mxu2 %v2547_v7 }
  0xf9   : > { %1562 = vmatpush.bf16.msrb.mxu3 %v2582_v14 }
  0xfa   : > { %1390 = vmatpush.bf16.msra.mxu0 %v2555_v9 }
  0xfb   : > { %1511 = vmatpush.bf16.msrb.mxu1 %v2590_v16  ;;  %1442 = vmatpush.bf16.msra.mxu2 %v2555_v9  ;;  %v1097_v40 = vpop.f32.mrf.mxu1 }
  0xfd   : > { %1563 = vmatpush.bf16.msrb.mxu3 %v2590_v16 }
  0xfe   : > { %1512 = vmatmul.bf16.vlgmr.msrb.gmra.mxu1 %v2598_v17  ;;  %1391 = vmatpush.bf16.msra.mxu0 %v2567_v11 }
  0xff   : > { %1608 = vmatpush.bf16.msra.mxu1 %v2519_v0  ;;  %1443 = vmatpush.bf16.msra.mxu2 %v2567_v11 }
 0x100   : > { %1564 = vmatmul.bf16.vlgmr.msrb.gmra.mxu3 %v2598_v17 }
 0x101   : > { %1660 = vmatpush.bf16.msra.mxu3 %v2519_v0 }
 0x102   : > { %1392 = vmatpush.bf16.msra.mxu0 %v2579_v13 }
 0x103   : > { %1609 = vmatpush.bf16.msra.mxu1 %v2534_v4  ;;  %1444 = vmatpush.bf16.msra.mxu2 %v2579_v13 }
 0x105   : > { %1661 = vmatpush.bf16.msra.mxu3 %v2534_v4 }
 0x106   : > { %1393 = vmatpush.bf16.msra.mxu0 %v2587_v15 }
 0x107   : > { %1610 = vmatpush.bf16.msra.mxu1 %v2542_v6  ;;  %1445 = vmatpush.bf16.msra.mxu2 %v2587_v15 }
 0x109   : > { %1662 = vmatpush.bf16.msra.mxu3 %v2542_v6  ;;  %1394 = vmatmul.bf16.vlgmr.msra.gmra.mxu0 %v1384_v51  ;;  %v1590_v51 = vunpack.c.l.b16 %v1586_v41 }
 0x10a   : > { %1490 = vmatpush.bf16.msrb.mxu0 %v2517_v63  ;;  %1446 = vmatmul.bf16.vlgmr.msra.gmra.mxu2 %v1436_v52 }
 0x10b   : > { %1611 = vmatpush.bf16.msra.mxu1 %v2550_v8  ;;  %1542 = vmatpush.bf16.msrb.mxu2 %v2517_v63  ;;  %v1592_v21 = vpack.c.b16 %v1591_v56, %v1590_v51 }
 0x10d   : > { %1663 = vmatpush.bf16.msra.mxu3 %v2550_v8 }
 0x10e   : > { %1491 = vmatpush.bf16.msrb.mxu0 %v2527_v2 }
 0x10f   : > { %1612 = vmatpush.bf16.msra.mxu1 %v2558_v10  ;;  %1543 = vmatpush.bf16.msrb.mxu2 %v2527_v2 }
 0x111   : > { %1664 = vmatpush.bf16.msra.mxu3 %v2558_v10 }
 0x112   : > { %1492 = vmatpush.bf16.msrb.mxu0 %v2539_v5 }
 0x113   : > { %1613 = vmatpush.bf16.msra.mxu1 %v2574_v12  ;;  %1544 = vmatpush.bf16.msrb.mxu2 %v2539_v5 }
 0x115   : > { %1665 = vmatpush.bf16.msra.mxu3 %v2574_v12 }
 0x116   : > { %1493 = vmatpush.bf16.msrb.mxu0 %v2547_v7 }
 0x117   : > { %1614 = vmatpush.bf16.msra.mxu1 %v2582_v14  ;;  %1545 = vmatpush.bf16.msrb.mxu2 %v2547_v7 }
 0x119   : > { %1666 = vmatpush.bf16.msra.mxu3 %v2582_v14 }
 0x11a   : > { %1494 = vmatpush.bf16.msrb.mxu0 %v2555_v9 }
 0x11b   : > { %1615 = vmatpush.bf16.msra.mxu1 %v2590_v16  ;;  %1546 = vmatpush.bf16.msrb.mxu2 %v2555_v9 }
 0x11d   : > { %1667 = vmatpush.bf16.msra.mxu3 %v2590_v16 }
 0x11e   : > { %1616 = vmatmul.bf16.vlgmr.msra.gmra.mxu1 %v2598_v17  ;;  %1495 = vmatpush.bf16.msrb.mxu0 %v2567_v11 }
 0x11f   : > { %1712 = vmatpush.bf16.msrb.mxu1 %v2519_v0  ;;  %1547 = vmatpush.bf16.msrb.mxu2 %v2567_v11 }
 0x120   : > { %1668 = vmatmul.bf16.vlgmr.msra.gmra.mxu3 %v2598_v17 }
 0x121   : > { %1764 = vmatpush.bf16.msrb.mxu3 %v2519_v0  ;;  %v2810_v0 = vpop.f32.mrf.mxu3 }
 0x122   : > { %1496 = vmatpush.bf16.msrb.mxu0 %v2579_v13  ;;  %v1742_v3 = vpack.c.bf16 %v2810_v0, %v2810_v0 }
 0x123   : > { %1713 = vmatpush.bf16.msrb.mxu1 %v2534_v4  ;;  %1548 = vmatpush.bf16.msrb.mxu2 %v2579_v13 }
 0x125   : > { %1765 = vmatpush.bf16.msrb.mxu3 %v2534_v4  ;;  %v1482_v4 = vpack.c.bf16 %v780_v53, %v780_v53 }
 0x126   : > { %1497 = vmatpush.bf16.msrb.mxu0 %v2587_v15 }
 0x127   : > { %1714 = vmatpush.bf16.msrb.mxu1 %v2542_v6  ;;  %1549 = vmatpush.bf16.msrb.mxu2 %v2587_v15 }
 0x129   : > { %1766 = vmatpush.bf16.msrb.mxu3 %v2542_v6  ;;  %v1486_v6 = vunpack.c.l.b16 %v1482_v4  ;;  %v2830_v23 = vpop.f32.mrf.mxu3 }
 0x12a   : > { %1594 = vmatpush.bf16.msra.mxu0 %v2517_v63  ;;  %1550 = vmatmul.bf16.vlgmr.msrb.gmra.mxu2 %v1540_v24  ;;  %v1099_v24 = vpop.f32.mrf.mxu1 }
 0x12b   : > { %1715 = vmatpush.bf16.msrb.mxu1 %v2550_v8  ;;  %1646 = vmatpush.bf16.msra.mxu2 %v2517_v63 }
 0x12d   : > { %1767 = vmatpush.bf16.msrb.mxu3 %v2550_v8  ;;  %v1488_v8 = vpack.c.b16 %v1487_v20, %v1486_v6  ;;  %v1031_v32 = vpop.f32.mrf.mxu2 }
 0x12e   : > { %1595 = vmatpush.bf16.msra.mxu0 %v2527_v2 }
 0x12f   : > { %1716 = vmatpush.bf16.msrb.mxu1 %v2558_v10  ;;  %1498 = vmatmul.bf16.vlgmr.msrb.gmra.mxu0 %v1488_v8  ;;  %v1644_v8 = vpack.c.b16 %v1643_v57, %v1642_v55 }
 0x130   : > { %1647 = vmatpush.bf16.msra.mxu2 %v2527_v2 }
 0x131   : > { %1768 = vmatpush.bf16.msrb.mxu3 %v2558_v10  ;;  %v2844_v10 = vld [vmem:[%s3039_s4] ss:$0 sm:$0xff]  ;;  %v1045_v28 = vpop.f32.mrf.mxu3 }
 0x132   : > { %1596 = vmatpush.bf16.msra.mxu0 %v2539_v5  ;;  %v1032_v33 = vadd.f32 %v2844_v10, %v1031_v32 }
 0x133   : > { %1717 = vmatpush.bf16.msrb.mxu1 %v2574_v12 }
 0x134   : > { %1648 = vmatpush.bf16.msra.mxu2 %v2539_v5  ;;  %v1046_v38 = vadd.f32 %v1045_v28, %v1032_v33 }
 0x135   : > { %1769 = vmatpush.bf16.msrb.mxu3 %v2574_v12  ;;  %v979_v12 = vpop.f32.mrf.mxu0  ;;  %v1033_v50 = vpop.f32.mrf.mxu2 }
 0x136   : > { %v980_v29 = vadd.f32 %v2844_v10, %v979_v12  ;;  %1597 = vmatpush.bf16.msra.mxu0 %v2547_v7  ;;  %v1034_v53 = vadd.f32 %v2844_v10, %v1033_v50 }
 0x137   : > { %1718 = vmatpush.bf16.msrb.mxu1 %v2582_v14 }
 0x138   : > { %v994_v1 = vadd.f32 %v993_v26, %v980_v29  ;;  %1649 = vmatpush.bf16.msra.mxu2 %v2547_v7 }
 0x139   : > { %1770 = vmatpush.bf16.msrb.mxu3 %v2582_v14  ;;  %v2860_v14 = vld [vmem:[%s335_s24] sm:$0xff]  ;;  %v1047_v35 = vpop.f32.mrf.mxu3 }
 0x13a   : > { %v998_v31 = vadd.f32 %v994_v1, %v2860_v14  ;;  %1598 = vmatpush.bf16.msra.mxu0 %v2555_v9  ;;  %v1050_v43 = vadd.f32 %v1046_v38, %v2860_v14  ;;  %v1048_v62 = vadd.f32 %v1047_v35, %v1034_v53 }
 0x13b   : > { %1719 = vmatpush.bf16.msrb.mxu1 %v2590_v16 }
 0x13c   : > { %v1000_v34 = vmax.f32 %v998_v31, 0.0  ;;  %1650 = vmatpush.bf16.msra.mxu2 %v2555_v9  ;;  %v1052_v48 = vmax.f32 %v1050_v43, 0.0 }
 0x13d   : > { %1771 = vmatpush.bf16.msrb.mxu3 %v2590_v16  ;;  %v981_v16 = vpop.f32.mrf.mxu0  ;;  %v1135_v12 = vpop.f32.mrf.mxu2 }
 0x13e   : > { %1720 = vmatmul.bf16.vlgmr.msrb.gmra.mxu1 %v2598_v17  ;;  %v982_v39 = vadd.f32 %v2844_v10, %v981_v16  ;;  %v1002_v47 = vpack.c.bf16 %v1000_v34, %v1000_v34  ;;  %1599 = vmatpush.bf16.msra.mxu0 %v2567_v11  ;;  %v1054_v52 = vpack.c.bf16 %v1052_v48, %v1052_v48 }
 0x13f   : > { %v1062_v54 = vadd.f32 %v1052_v48, %v1000_v34  ;;  %v1136_v1 = vadd.f32 %v2844_v10, %v1135_v12 }
 0x140   : > { %1772 = vmatmul.bf16.vlgmr.msrb.gmra.mxu3 %v2598_v17  ;;  %v2875_v17 = vld [vmem:[%s335_s24 + $0x8] sm:$0xff]  ;;  %v996_v44 = vadd.f32 %v995_v30, %v982_v39  ;;  %1651 = vmatpush.bf16.msra.mxu2 %v2567_v11  ;;  %v1794_v58 = vunpack.c.l.b16 %v1002_v47  ;;  %v1798_v60 = vunpack.c.l.b16 %v1054_v52 }
 0x141   : > { %v1149_v4 = vpop.f32.mrf.mxu3  ;;  %v1051_v19 = vadd.f32 %v1048_v62, %v2875_v17 }
 0x142   : > { %v999_v49 = vadd.f32 %v996_v44, %v2875_v17  ;;  %1600 = vmatpush.bf16.msra.mxu0 %v2579_v13  ;;  %v1856_v6 = vpack.c.b16 %v1798_v60, %v1794_v58  ;;  %v1201_v44 = vpop.f32.mrf.mxu1 }
 0x143   : > { %v1053_v26 = vmax.f32 %v1051_v19, 0.0 }
 0x144   : > { %1652 = vmatpush.bf16.msra.mxu2 %v2579_v13  ;;  %v1001_v61 = vmax.f32 %v999_v49, 0.0  ;;  %1888 = vst [vmem:[%s2893_s29] sm:$0xff] %v1856_v6  ;;  %v1741_v6 = vsel %vm3059_vm7, 0.0, %v2830_v23 }
 0x145   : > { %v1083_v59 = vpop.f32.mrf.mxu0  ;;  %v1055_v29 = vpack.c.bf16 %v1053_v26, %v1053_v26  ;;  %v1137_v43 = vpop.f32.mrf.mxu2  ;;  %v1743_v23 = vpack.c.bf16 %v1741_v6, %v1741_v6 }
 0x146   : > { %v1084_v18 = vadd.f32 %v2844_v10, %v1083_v59  ;;  %1601 = vmatpush.bf16.msra.mxu0 %v2587_v15  ;;  %v1003_v25 = vpack.c.bf16 %v1001_v61, %v1001_v61  ;;  %v1063_v31 = vadd.f32 %v1053_v26, %v1001_v61 }
 0x147   : > { %v1799_v34 = vunpack.c.l.b16 %v1055_v29  ;;  %v1747_v0 = vunpack.c.l.b16 %v1743_v23 }
 0x148   : > { %v1098_v20 = vadd.f32 %v1097_v40, %v1084_v18  ;;  %1653 = vmatpush.bf16.msra.mxu2 %v2587_v15  ;;  %v1795_v33 = vunpack.c.l.b16 %v1003_v25 }
 0x149   : > { %1602 = vmatmul.bf16.vlgmr.msra.gmra.mxu0 %v1592_v21  ;;  %v1151_v36 = vpop.f32.mrf.mxu3 }
 0x14a   : > { %v1102_v28 = vadd.f32 %v1098_v20, %v2860_v14  ;;  %1698 = vmatpush.bf16.msrb.mxu0 %v2517_v63  ;;  %v1864_v37 = vpack.c.b16 %v1799_v34, %v1795_v33  ;;  %v1203_v20 = vpop.f32.mrf.mxu1  ;;  %v1746_v34 = vunpack.c.l.b16 %v1742_v3 }
 0x14b   : > { %1654 = vmatmul.bf16.vlgmr.msra.gmra.mxu2 %v1644_v8 }
 0x14c   : > { %1750 = vmatpush.bf16.msrb.mxu2 %v2517_v63  ;;  %v1104_v30 = vmax.f32 %v1102_v28, 0.0  ;;  %v1150_v63 = vadd.f32 %v1149_v4, %v1136_v1  ;;  %1896 = vst [vmem:[%s2893_s29 + $0x40] sm:$0xff] %v1864_v37  ;;  %v1689_v4 = vsel %vm513_vm12, 0.0, %v2848_v27 }
 0x14d   : > { %v1085_v32 = vpop.f32.mrf.mxu0  ;;  %v1239_v60 = vpop.f32.mrf.mxu2  ;;  %v1691_v25 = vpack.c.bf16 %v1689_v4, %v1689_v4 }
 0x14e   : > { %v1114_v16 = vadd.f32 %v1104_v30, %v1062_v54  ;;  %v1086_v35 = vadd.f32 %v2844_v10, %v1085_v32  ;;  %1699 = vmatpush.bf16.msrb.mxu0 %v2527_v2  ;;  %v1106_v39 = vpack.c.bf16 %v1104_v30, %v1104_v30  ;;  %v1154_v40 = vadd.f32 %v1150_v63, %v2860_v14 }
 0x14f   : > { %v1240_v18 = vadd.f32 %v2844_v10, %v1239_v60 }
 0x150   : > { %1751 = vmatpush.bf16.msrb.mxu2 %v2527_v2  ;;  %v1100_v38 = vadd.f32 %v1099_v24, %v1086_v35  ;;  %v1156_v42 = vmax.f32 %v1154_v40, 0.0  ;;  %v1138_v2 = vadd.f32 %v2844_v10, %v1137_v43  ;;  %v1802_v46 = vunpack.c.l.b16 %v1106_v39 }
 0x151   : > { %v1253_v56 = vpop.f32.mrf.mxu3 }
 0x152   : > { %v1103_v41 = vadd.f32 %v1100_v38, %v2875_v17  ;;  %1700 = vmatpush.bf16.msrb.mxu0 %v2539_v5  ;;  %v1158_v47 = vpack.c.bf16 %v1156_v42, %v1156_v42  ;;  %v1166_v48 = vadd.f32 %v1156_v42, %v1114_v16  ;;  %v1152_v51 = vadd.f32 %v1151_v36, %v1138_v2 }
 0x153   : > { %v1254_v26 = vadd.f32 %v1253_v56, %v1240_v18 }
 0x154   : > { %1752 = vmatpush.bf16.msrb.mxu2 %v2539_v5  ;;  %v1105_v45 = vmax.f32 %v1103_v41, 0.0  ;;  %v1806_v53 = vunpack.c.l.b16 %v1158_v47  ;;  %v1155_v5 = vadd.f32 %v1152_v51, %v2875_v17 }
 0x155   : > { %v1187_v49 = vpop.f32.mrf.mxu0  ;;  %v1258_v30 = vadd.f32 %v1254_v26, %v2860_v14 }
 0x156   : > { %v1115_v50 = vadd.f32 %v1105_v45, %v1063_v31  ;;  %v1188_v52 = vadd.f32 %v2844_v10, %v1187_v49  ;;  %1701 = vmatpush.bf16.msrb.mxu0 %v2547_v7  ;;  %v1857_v55 = vpack.c.b16 %v1806_v53, %v1802_v46  ;;  %v1107_v57 = vpack.c.bf16 %v1105_v45, %v1105_v45 }
 0x157   : > { %v1157_v58 = vmax.f32 %v1155_v5, 0.0  ;;  %v1260_v32 = vmax.f32 %v1258_v30, 0.0 }
 0x158   : > { %1753 = vmatpush.bf16.msrb.mxu2 %v2547_v7  ;;  %v1202_v54 = vadd.f32 %v1201_v44, %v1188_v52  ;;  %1889 = vst [vmem:[%s2893_s29 + $0x8] sm:$0xff] %v1857_v55  ;;  %v1803_v21 = vunpack.c.l.b16 %v1107_v57 }
 0x159   : > { %v1159_v7 = vpack.c.bf16 %v1157_v58, %v1157_v58  ;;  %v1167_v61 = vadd.f32 %v1157_v58, %v1115_v50  ;;  %v1255_v33 = vpop.f32.mrf.mxu3  ;;  %v1262_v36 = vpack.c.bf16 %v1260_v32, %v1260_v32  ;;  %v1305_v50 = vpop.f32.mrf.mxu1 }
 0x15a   : > { %v1206_v59 = vadd.f32 %v1202_v54, %v2860_v14  ;;  %1702 = vmatpush.bf16.msrb.mxu0 %v2555_v9 }
 0x15b   : > { %v1807_v8 = vunpack.c.l.b16 %v1159_v7  ;;  %v1814_v41 = vunpack.c.l.b16 %v1262_v36 }
 0x15c   : > { %1754 = vmatpush.bf16.msrb.mxu2 %v2555_v9  ;;  %v1208_v62 = vmax.f32 %v1206_v59, 0.0  ;;  %v1690_v9 = vpack.c.bf16 %v2826_v22, %v2826_v22  ;;  %v1695_v22 = vunpack.c.l.b16 %v1691_v25 }
 0x15d   : > { %v1189_v19 = vpop.f32.mrf.mxu0  ;;  %v1865_v28 = vpack.c.b16 %v1807_v8, %v1803_v21 }
 0x15e   : > { %v1218_v24 = vadd.f32 %v1208_v62, %v1166_v48  ;;  %v1190_v27 = vadd.f32 %v2844_v10, %v1189_v19  ;;  %1703 = vmatpush.bf16.msrb.mxu0 %v2567_v11  ;;  %v1210_v29 = vpack.c.bf16 %v1208_v62, %v1208_v62  ;;  %v1694_v31 = vunpack.c.l.b16 %v1690_v9 }
 0x15f   : > { %1897 = vst [vmem:[%s2893_s29 + $0x48] sm:$0xff] %v1865_v28 }
 0x160   : > { %1755 = vmatpush.bf16.msrb.mxu2 %v2567_v11  ;;  %v1204_v12 = vadd.f32 %v1203_v20, %v1190_v27  ;;  %v1241_v11 = vpop.f32.mrf.mxu2  ;;  %v1810_v63 = vunpack.c.l.b16 %v1210_v29  ;;  %v1270_v37 = vadd.f32 %v1260_v32, %v1218_v24  ;;  %v1696_v40 = vpack.c.b16 %v1695_v22, %v1694_v31 }
 0x161   : > { %v1242_v35 = vadd.f32 %v2844_v10, %v1241_v11  ;;  %v1357_v53 = vpop.f32.mrf.mxu3  ;;  %v1307_v58 = vpop.f32.mrf.mxu1 }
 0x162   : > { %v1207_v1 = vadd.f32 %v1204_v12, %v2875_v17  ;;  %1704 = vmatpush.bf16.msrb.mxu0 %v2579_v13  ;;  %v1858_v44 = vpack.c.b16 %v1814_v41, %v1810_v63 }
 0x163   : > { %v1256_v39 = vadd.f32 %v1255_v33, %v1242_v35 }
 0x164   : > { %1756 = vmatpush.bf16.msrb.mxu2 %v2579_v13  ;;  %v1209_v16 = vmax.f32 %v1207_v1, 0.0  ;;  %v1748_v13 = vpack.c.b16 %v1747_v0, %v1746_v34  ;;  %1890 = vst [vmem:[%s2893_s29 + $0x10] sm:$0xff] %v1858_v44 }
 0x165   : > { %v1259_v43 = vadd.f32 %v1256_v39, %v2875_v17 }
 0x166   : > { %v1219_v38 = vadd.f32 %v1209_v16, %v1167_v61  ;;  %1705 = vmatpush.bf16.msrb.mxu0 %v2587_v15  ;;  %v1211_v42 = vpack.c.bf16 %v1209_v16, %v1209_v16  ;;  %v1291_v51 = vpop.f32.mrf.mxu0 }
 0x167   : > { %v1261_v45 = vmax.f32 %v1259_v43, 0.0  ;;  %v1292_v52 = vadd.f32 %v2844_v10, %v1291_v51 }
 0x168   : > { %1757 = vmatpush.bf16.msrb.mxu2 %v2587_v15  ;;  %v1811_v2 = vunpack.c.l.b16 %v1211_v42 }
 0x169   : > { %1706 = vmatmul.bf16.vlgmr.msrb.gmra.mxu0 %v1696_v40  ;;  %v1263_v46 = vpack.c.bf16 %v1261_v45, %v1261_v45  ;;  %v1271_v47 = vadd.f32 %v1261_v45, %v1219_v38  ;;  %v1306_v15 = vadd.f32 %v1305_v50, %v1292_v52  ;;  %v1359_v20 = vpop.f32.mrf.mxu3  ;;  %v1409_v11 = vpop.f32.mrf.mxu1 }
 0x16b   : > { %1758 = vmatmul.bf16.vlgmr.msrb.gmra.mxu2 %v1748_v13  ;;  %v1815_v48 = vunpack.c.l.b16 %v1263_v46  ;;  %v1310_v5 = vadd.f32 %v1306_v15, %v2860_v14 }
 0x16d   : > { %v1866_v49 = vpack.c.b16 %v1815_v48, %v1811_v2  ;;  %v1343_v54 = vpop.f32.mrf.mxu2  ;;  %v1312_v55 = vmax.f32 %v1310_v5, 0.0 }
 0x16e   : > { %v1344_v56 = vadd.f32 %v2844_v10, %v1343_v54  ;;  %v1293_v57 = vpop.f32.mrf.mxu0 }
 0x16f   : > { %1898 = vst [vmem:[%s2893_s29 + $0x50] sm:$0xff] %v1866_v49  ;;  %v1322_v59 = vadd.f32 %v1312_v55, %v1270_v37  ;;  %v1294_v4 = vadd.f32 %v2844_v10, %v1293_v57  ;;  %v1314_v62 = vpack.c.bf16 %v1312_v55, %v1312_v55 }
 0x170   : > { %v1358_v60 = vadd.f32 %v1357_v53, %v1344_v56 }
 0x171   : > { %v1308_v61 = vadd.f32 %v1307_v58, %v1294_v4  ;;  %v1818_v9 = vunpack.c.l.b16 %v1314_v62  ;;  %v1461_v16 = vpop.f32.mrf.mxu3  ;;  %v1411_v39 = vpop.f32.mrf.mxu1 }
 0x172   : > { %v1362_v7 = vadd.f32 %v1358_v60, %v2860_v14 }
 0x173   : > { %v1311_v6 = vadd.f32 %v1308_v61, %v2875_v17 }
 0x174   : > { %v1364_v18 = vmax.f32 %v1362_v7, 0.0 }
 0x175   : > { %v1345_v19 = vpop.f32.mrf.mxu2  ;;  %v1313_v24 = vmax.f32 %v1311_v6, 0.0 }
 0x176   : > { %v1366_v21 = vpack.c.bf16 %v1364_v18, %v1364_v18  ;;  %v1374_v8 = vadd.f32 %v1364_v18, %v1322_v59  ;;  %v1346_v27 = vadd.f32 %v2844_v10, %v1345_v19 }
 0x177   : > { %v1323_v26 = vadd.f32 %v1313_v24, %v1271_v47  ;;  %v1315_v12 = vpack.c.bf16 %v1313_v24, %v1313_v24 }
 0x178   : > { %v1822_v25 = vunpack.c.l.b16 %v1366_v21  ;;  %v1360_v3 = vadd.f32 %v1359_v20, %v1346_v27 }
 0x179   : > { %v1819_v31 = vunpack.c.l.b16 %v1315_v12  ;;  %v1463_v47 = vpop.f32.mrf.mxu3 }
 0x17a   : > { %v1859_v23 = vpack.c.b16 %v1822_v25, %v1818_v9  ;;  %v1363_v28 = vadd.f32 %v1360_v3, %v2875_v17 }
 0x17b   : > { %v1513_v61 = vpop.f32.mrf.mxu1 }
 0x17c   : > { %1891 = vst [vmem:[%s2893_s29 + $0x18] sm:$0xff] %v1859_v23  ;;  %v1365_v29 = vmax.f32 %v1363_v28, 0.0 }
 0x17e   : > { %v1367_v30 = vpack.c.bf16 %v1365_v29, %v1365_v29  ;;  %v1375_v1 = vadd.f32 %v1365_v29, %v1323_v26 }
 0x180   : > { %v1823_v22 = vunpack.c.l.b16 %v1367_v30 }
 0x182   : > { %v1867_v32 = vpack.c.b16 %v1823_v22, %v1819_v31 }
 0x183   : > { %v1565_v19 = vpop.f32.mrf.mxu3  ;;  %v1515_v27 = vpop.f32.mrf.mxu1 }
 0x184   : > { %1899 = vst [vmem:[%s2893_s29 + $0x58] sm:$0xff] %v1867_v32 }
 0x186   : > { %v1395_v33 = vpop.f32.mrf.mxu0 }
 0x187   : > { %v1396_v34 = vadd.f32 %v2844_v10, %v1395_v33 }
 0x189   : > { %v1410_v0 = vadd.f32 %v1409_v11, %v1396_v34 }
 0x18b   : > { %v1414_v35 = vadd.f32 %v1410_v0, %v2860_v14 }
 0x18d   : > { %v1447_v63 = vpop.f32.mrf.mxu2  ;;  %v1416_v36 = vmax.f32 %v1414_v35, 0.0 }
 0x18e   : > { %v1448_v37 = vadd.f32 %v2844_v10, %v1447_v63  ;;  %v1397_v38 = vpop.f32.mrf.mxu0 }
 0x18f   : > { %v1426_v40 = vadd.f32 %v1416_v36, %v1374_v8  ;;  %v1398_v41 = vadd.f32 %v2844_v10, %v1397_v38  ;;  %v1418_v44 = vpack.c.bf16 %v1416_v36, %v1416_v36 }
 0x190   : > { %v1462_v13 = vadd.f32 %v1461_v16, %v1448_v37 }
 0x191   : > { %v1412_v43 = vadd.f32 %v1411_v39, %v1398_v41  ;;  %v1826_v52 = vunpack.c.l.b16 %v1418_v44 }
 0x192   : > { %v1466_v42 = vadd.f32 %v1462_v13, %v2860_v14 }
 0x193   : > { %v1415_v2 = vadd.f32 %v1412_v43, %v2875_v17 }
 0x194   : > { %v1468_v45 = vmax.f32 %v1466_v42, 0.0 }
 0x195   : > { %v1449_v46 = vpop.f32.mrf.mxu2  ;;  %v1417_v50 = vmax.f32 %v1415_v2, 0.0 }
 0x196   : > { %v1470_v48 = vpack.c.bf16 %v1468_v45, %v1468_v45  ;;  %v2961_v49 = vadd.f32 %v1468_v45, %v1426_v40  ;;  %v1450_v51 = vadd.f32 %v2844_v10, %v1449_v46 }
 0x197   : > { %v1427_v53 = vadd.f32 %v1417_v50, %v1375_v1  ;;  %v1419_v56 = vpack.c.bf16 %v1417_v50, %v1417_v50  ;;  %v1567_v1 = vpop.f32.mrf.mxu3 }
 0x198   : > { %v1830_v15 = vunpack.c.l.b16 %v1470_v48  ;;  %v1464_v5 = vadd.f32 %v1463_v47, %v1450_v51 }
 0x199   : > { %v1827_v4 = vunpack.c.l.b16 %v1419_v56 }
 0x19a   : > { %v1860_v54 = vpack.c.b16 %v1830_v15, %v1826_v52  ;;  %v1467_v55 = vadd.f32 %v1464_v5, %v2875_v17 }
 0x19b   : > { %v1617_v40 = vpop.f32.mrf.mxu1 }
 0x19c   : > { %1892 = vst [vmem:[%s2893_s29 + $0x20] sm:$0xff] %v1860_v54  ;;  %v1469_v57 = vmax.f32 %v1467_v55, 0.0 }
 0x19e   : > { %v1471_v58 = vpack.c.bf16 %v1469_v57, %v1469_v57  ;;  %v2966_v59 = vadd.f32 %v1469_v57, %v1427_v53 }
 0x1a0   : > { %v1831_v60 = vunpack.c.l.b16 %v1471_v58 }
 0x1a2   : > { %v1868_v7 = vpack.c.b16 %v1831_v60, %v1827_v4 }
 0x1a3   : > { %v1669_v43 = vpop.f32.mrf.mxu3  ;;  %v1619_v47 = vpop.f32.mrf.mxu1 }
 0x1a4   : > { %1900 = vst [vmem:[%s2893_s29 + $0x60] sm:$0xff] %v1868_v7 }
 0x1ab   : > { %v1671_v56 = vpop.f32.mrf.mxu3 }
 0x1ac   : > { %v1499_v62 = vpop.f32.mrf.mxu0 }
 0x1ad   : > { %v1500_v18 = vadd.f32 %v2844_v10, %v1499_v62  ;;  %v1551_v21 = vpop.f32.mrf.mxu2 }
 0x1ae   : > { %v1552_v8 = vadd.f32 %v2844_v10, %v1551_v21 }
 0x1af   : > { %v1514_v6 = vadd.f32 %v1513_v61, %v1500_v18 }
 0x1b0   : > { %v1566_v26 = vadd.f32 %v1565_v19, %v1552_v8 }
 0x1b1   : > { %v1518_v20 = vadd.f32 %v1514_v6, %v2860_v14 }
 0x1b2   : > { %v1570_v3 = vadd.f32 %v1566_v26, %v2860_v14 }
 0x1b3   : > { %v2972_v9 = vmax.f32 %v1518_v20, 0.0 }
 0x1b4   : > { %v1501_v24 = vpop.f32.mrf.mxu0  ;;  %v2978_v12 = vmax.f32 %v1570_v3, 0.0 }
 0x1b5   : > { %v1502_v25 = vadd.f32 %v2844_v10, %v1501_v24  ;;  %v1522_v28 = vpack.c.bf16 %v2972_v9, %v2972_v9  ;;  %v1553_v30 = vpop.f32.mrf.mxu2 }
 0x1b6   : > { %v1574_v31 = vpack.c.bf16 %v2978_v12, %v2978_v12  ;;  %v1554_v22 = vadd.f32 %v2844_v10, %v1553_v30 }
 0x1b7   : > { %v1516_v23 = vadd.f32 %v1515_v27, %v1502_v25  ;;  %v1834_v32 = vunpack.c.l.b16 %v1522_v28 }
 0x1b8   : > { %v1838_v11 = vunpack.c.l.b16 %v1574_v31  ;;  %v1568_v34 = vadd.f32 %v1567_v1, %v1554_v22 }
 0x1b9   : > { %v1519_v29 = vadd.f32 %v1516_v23, %v2875_v17  ;;  %v1530_v23 = vadd.f32 %v2972_v9, %v2961_v49 }
 0x1ba   : > { %v1861_v0 = vpack.c.b16 %v1838_v11, %v1834_v32  ;;  %v1571_v16 = vadd.f32 %v1568_v34, %v2875_v17 }
 0x1bb   : > { %v2984_v33 = vmax.f32 %v1519_v29, 0.0  ;;  %v1721_v25 = vpop.f32.mrf.mxu1  ;;  %v1582_v1 = vadd.f32 %v2978_v12, %v1530_v23 }
 0x1bc   : > { %1893 = vst [vmem:[%s2893_s29 + $0x28] sm:$0xff] %v1861_v0  ;;  %v2990_v63 = vmax.f32 %v1571_v16, 0.0 }
 0x1bd   : > { %v1523_v35 = vpack.c.bf16 %v2984_v33, %v2984_v33  ;;  %v1531_v9 = vadd.f32 %v2984_v33, %v2966_v59 }
 0x1be   : > { %v1575_v36 = vpack.c.bf16 %v2990_v63, %v2990_v63 }
 0x1bf   : > { %v1835_v37 = vunpack.c.l.b16 %v1523_v35 }
 0x1c0   : > { %v1839_v38 = vunpack.c.l.b16 %v1575_v36 }
 0x1c2   : > { %v1869_v39 = vpack.c.b16 %v1839_v38, %v1835_v37 }
 0x1c3   : > { %v1773_v29 = vpop.f32.mrf.mxu3  ;;  %v1723_v16 = vpop.f32.mrf.mxu1 }
 0x1c4   : > { %1901 = vst [vmem:[%s2893_s29 + $0x68] sm:$0xff] %v1869_v39 }
 0x1c6   : > { %v1603_v41 = vpop.f32.mrf.mxu0 }
 0x1c7   : > { %v1604_v13 = vadd.f32 %v2844_v10, %v1603_v41 }
 0x1c9   : > { %v1618_v42 = vadd.f32 %v1617_v40, %v1604_v13  ;;  %v1583_v40 = vadd.f32 %v2990_v63, %v1531_v9 }
 0x1cb   : > { %v1622_v44 = vadd.f32 %v1618_v42, %v2860_v14  ;;  %v1775_v59 = vpop.f32.mrf.mxu3 }
 0x1cd   : > { %v1624_v48 = vmax.f32 %v1622_v44, 0.0 }
 0x1ce   : > { %v1655_v45 = vpop.f32.mrf.mxu2  ;;  %v1605_v46 = vpop.f32.mrf.mxu0 }
 0x1cf   : > { %v1656_v2 = vadd.f32 %v2844_v10, %v1655_v45  ;;  %v1606_v50 = vadd.f32 %v2844_v10, %v1605_v46  ;;  %v1626_v53 = vpack.c.bf16 %v1624_v48, %v1624_v48  ;;  %v1634_v11 = vadd.f32 %v1624_v48, %v1582_v1 }
 0x1d1   : > { %v1670_v51 = vadd.f32 %v1669_v43, %v1656_v2  ;;  %v1620_v15 = vadd.f32 %v1619_v47, %v1606_v50  ;;  %v1842_v4 = vunpack.c.l.b16 %v1626_v53 }
 0x1d3   : > { %v1674_v52 = vadd.f32 %v1670_v51, %v2860_v14  ;;  %v1623_v54 = vadd.f32 %v1620_v15, %v2875_v17 }
 0x1d5   : > { %v1676_v5 = vmax.f32 %v1674_v52, 0.0  ;;  %v1625_v7 = vmax.f32 %v1623_v54, 0.0 }
 0x1d6   : > { %v1657_v55 = vpop.f32.mrf.mxu2 }
 0x1d7   : > { %v1678_v57 = vpack.c.bf16 %v1676_v5, %v1676_v5  ;;  %v1658_v58 = vadd.f32 %v2844_v10, %v1657_v55  ;;  %v1627_v6 = vpack.c.bf16 %v1625_v7, %v1625_v7  ;;  %v1686_v36 = vadd.f32 %v1676_v5, %v1634_v11 }
 0x1d8   : > { %v1635_v43 = vadd.f32 %v1625_v7, %v1583_v40 }
 0x1d9   : > { %v1846_v60 = vunpack.c.l.b16 %v1678_v57  ;;  %v1672_v61 = vadd.f32 %v1671_v56, %v1658_v58  ;;  %v1843_v21 = vunpack.c.l.b16 %v1627_v6 }
 0x1db   : > { %v1862_v62 = vpack.c.b16 %v1846_v60, %v1842_v4  ;;  %v1675_v18 = vadd.f32 %v1672_v61, %v2875_v17 }
 0x1dd   : > { %1894 = vst [vmem:[%s2893_s29 + $0x30] sm:$0xff] %v1862_v62  ;;  %v1677_v19 = vmax.f32 %v1675_v18, 0.0 }
 0x1df   : > { %v1679_v20 = vpack.c.bf16 %v1677_v19, %v1677_v19  ;;  %v1687_v63 = vadd.f32 %v1677_v19, %v1635_v43 }
 0x1e1   : > { %v1847_v8 = vunpack.c.l.b16 %v1679_v20 }
 0x1e3   : > { %v1870_v24 = vpack.c.b16 %v1847_v8, %v1843_v21 }
 0x1e5   : > { %1902 = vst [vmem:[%s2893_s29 + $0x70] sm:$0xff] %v1870_v24 }
 0x1e6   : > { %v1707_v27 = vpop.f32.mrf.mxu0 }
 0x1e7   : > { %v1708_v26 = vadd.f32 %v2844_v10, %v1707_v27 }
 0x1e9   : > { %v1722_v3 = vadd.f32 %v1721_v25, %v1708_v26 }
 0x1eb   : > { %v1726_v28 = vadd.f32 %v1722_v3, %v2860_v14 }
 0x1ed   : > { %v1728_v34 = vmax.f32 %v1726_v28, 0.0 }
 0x1ee   : > { %v1759_v30 = vpop.f32.mrf.mxu2  ;;  %v1709_v22 = vpop.f32.mrf.mxu0 }
 0x1ef   : > { %v1760_v31 = vadd.f32 %v2844_v10, %v1759_v30  ;;  %v1710_v32 = vadd.f32 %v2844_v10, %v1709_v22  ;;  %v1730_v37 = vpack.c.bf16 %v1728_v34, %v1728_v34  ;;  %v1738_v38 = vadd.f32 %v1728_v34, %v1686_v36 }
 0x1f1   : > { %v1774_v0 = vadd.f32 %v1773_v29, %v1760_v31  ;;  %v1724_v35 = vadd.f32 %v1723_v16, %v1710_v32  ;;  %v1850_v33 = vunpack.c.l.b16 %v1730_v37 }
 0x1f3   : > { %v1778_v49 = vadd.f32 %v1774_v0, %v2860_v14  ;;  %v1727_v39 = vadd.f32 %v1724_v35, %v2875_v17 }
 0x1f5   : > { %v1780_v12 = vmax.f32 %v1778_v49, 0.0  ;;  %v1729_v45 = vmax.f32 %v1727_v39, 0.0 }
 0x1f6   : > { %v1761_v41 = vpop.f32.mrf.mxu2 }
 0x1f7   : > { %v1782_v13 = vpack.c.bf16 %v1780_v12, %v1780_v12  ;;  %v1790_v42 = vadd.f32 %v1780_v12, %v1738_v38  ;;  %v1762_v14 = vadd.f32 %v2844_v10, %v1761_v41  ;;  %v1731_v48 = vpack.c.bf16 %v1729_v45, %v1729_v45 }
 0x1f8   : > { %v1739_v50 = vadd.f32 %v1729_v45, %v1687_v63 }
 0x1f9   : > { %v1854_v44 = vunpack.c.l.b16 %v1782_v13  ;;  %1904 = vst [vmem:[%s354_s8] sm:$0xff] %v1790_v42  ;;  %v1776_v2 = vadd.f32 %v1775_v59, %v1762_v14  ;;  %v1851_v53 = vunpack.c.l.b16 %v1731_v48 }
 0x1fb   : > { %v1863_v46 = vpack.c.b16 %v1854_v44, %v1850_v33  ;;  %v1779_v47 = vadd.f32 %v1776_v2, %v2875_v17 }
 0x1fd   : > { %1895 = vst [vmem:[%s2893_s29 + $0x38] sm:$0xff] %v1863_v46  ;;  %v1781_v51 = vmax.f32 %v1779_v47, 0.0 }
 0x1ff   : > { %v1783_v52 = vpack.c.bf16 %v1781_v51, %v1781_v51  ;;  %v1791_v15 = vadd.f32 %v1781_v51, %v1739_v50 }
 0x201   : > { %v1855_v10 = vunpack.c.l.b16 %v1783_v52  ;;  %1905 = vst [vmem:[%s354_s8 + $0x8] sm:$0xff] %v1791_v15 }
 0x203   : > { %v1871_v5 = vpack.c.b16 %v1855_v10, %v1851_v53 }
 0x205   : > { %1903 = vst [vmem:[%s2893_s29 + $0x78] sm:$0xff] %v1871_v5 }
 0x206 PF: > { %s18_s23 = sadd.s32 1, %s2301_s23   ;;  %s3060_s21 = smov %s2297_s22 }
 0x207   : > { %p15_p8 = scmp.ge.s32.totalorder %s18_s23, 4   ;;  %s3061_s22 = smov %s3063_s25 }
 0x209   :  { %17 = sbr.rel (!%p15_p8) target bundleno = 2 (0x2), region = 93 }
 0x20e   :  { %1960 = vsyncpa [#allocation3], 1 }
 0x20f   :  { %1962 = vsyncpa [#allocation3 + $0x1], 1 }

// kernel: dss_forward.8
= control target key start
LH: loop header
LB: loop body
LE: loop exit
PB: predicated region body
PF: predicated region fallthrough
CT: control target
= control target key end

     0   :  { %10 = vsyncpa [#allocation3], 0  ;;  %s2306_s18 = smov 0   ;;  %s2308_s19 = smov 0   ;;  %s3035_s0 = inlined_call_operand.vmem [shape: bf16[2,16,2048], index: 0, kind: input, shape index: {}]   ;;  %s3036_s1 = inlined_call_operand.vmem [shape: bf16[2,16,16], index: 1, kind: input, shape index: {}]   ;;  %s3037_s2 = inlined_call_operand.vmem [shape: f32[2,16,128], index: 2, kind: input, shape index: {}]   ;;  %s3038_s3 = inlined_call_operand.hbm [shape: bf16[256,128], index: 3, kind: input, shape index: {}]   ;;  %s3039_s4 = inlined_call_operand.vmem [shape: f32[1,128], index: 4, kind: input, shape index: {}]   ;;  %s3040_s5 = inlined_call_operand.vmem [shape: f32[2,1,16,128], index: 5, kind: output, shape index: {}]  }
   0x1   :  { %s2310_s20 = smov 0  }
   0x2 LB: > { %s1973_s21 = sadd.s32 4294967295, %s2270_s20   ;;  %s28_s22 = sadd.s32 1, %s2266_s19  ;;  %s2270_s20 = sphi %s2310_s20, %s16_s20   ;;  %s2266_s19 = sphi %s2308_s19, %s3072_s19   ;;  %s2262_s18 = sphi %s2306_s18, %s3071_s18  }
   0x3   : > { %p30_p0 = scmp.ge.s32.totalorder %s28_s22, 2  ;;  %p1975_p1 = scmp.ge.s32.totalorder %s2270_s20, 1 }
   0x4   : > { %p183_p2 = scmp.lt.s32.totalorder %s2270_s20, 3  ;;  %p2183_p4 = scmp.eq.s32.totalorder %s1973_s21, 0 }
   0x5   : > { %s3074_s22 = smov (%p30_p0, %s28_s22), 0  ;;  %s194_s25 = sshll.u32 %s3038_s3, 4  ;;  %s195_s25 = int_to_ptr.hbm [resolvable:$true] %s194_s25 }
   0x6   : > { %p184_p3 = pnand %p1975_p1, %p183_p2  ;;  %s2272_s26 = smov [#allocation2]  }
   0x7   : > { %s196_s27 = sshll.u32 %s2272_s26, 4  ;;  %s2273_s28 = smov 64   ;;  %s197_s27 = int_to_ptr.vmem [resolvable:$true] %s196_s27 }
   0x8   : > { %p2179_p5 = pneg %p184_p3  ;;  %s2274_s29 = smov 4  }
   0x9   : > { %244 = sbr.rel (%p184_p3) target bundleno = 515 (0x203), region = 40 }
   0xa   : > { %p2180_p6 = pnand %p2183_p4, %p2179_p5 }
   0xc   : > { %2182 = dma.hbm_to_vmem [thread:$0]  (!%p2180_p6), %s195_s25, 2048, %s197_s27, [#allocation3], %s2273_s28, %s2273_s28, %s2274_s29  }
   0xe   : > { %2257 = dma.done.wait (%p2183_p4), [#allocation3], 2048  }
   0xf   : > { %2259 = vsyncadd (%p2183_p4), [#allocation3], 4294965248  ;;  %p292_p7 = scmp.lt.s32.totalorder %s2262_s18, 1  ;;  %v374_v0 = vlaneseq  ;;  %vm2275_vm1 = vmmov 0   ;;  %vm654_vm6 = vcmask 130048   ;;  %v2527_v2 = vld [vmem:[#allocation2 + $0x38] sm:$0xff] }
  0x10   : > { %vm2334_vm2 = vmpackc.low %vm2275_vm1, %vm2275_vm1 }
  0x11   : > { %s3076_s18 = smov (!%p292_p7, %s2262_s18), 1  ;;  %v2330_v1 = vshrl.u32 %v374_v0, 7 }
  0x12   : > { %s2138_s30 = sshll.u32 %s3076_s18, 7  ;;  %s2139_s9 = sshll.u32 %s3076_s18, 3 }
  0x13   : > { %vm379_vm0 = vcmp.eq.s32.totalorder %v2330_v1, 0  ;;  %vm387_vm3 = vcmp.eq.s32.totalorder %v2330_v1, 1  ;;  %s2342_s8 = scalar_lea.vmem %s3035_s0, %s2138_s30  ;;  %vm401_vm5 = vcmp.eq.s32.totalorder %v2330_v1, 2  ;;  %vm409_vm7 = vcmp.eq.s32.totalorder %v2330_v1, 3  ;;  %s305_s12 = scalar_lea.vmem %s3036_s1, %s2139_s9 }
  0x14   : > { %vm2347_vm4 = vmpackc.low %vm379_vm0, %vm379_vm0  ;;  %vm423_vm8 = vcmp.eq.s32.totalorder %v2330_v1, 4  ;;  %v358_v4 = vld [vmem:[%s2342_s8] sm:$0xff]  ;;  %vm431_vm10 = vcmp.eq.s32.totalorder %v2330_v1, 5  ;;  %vm445_vm11 = vcmp.eq.s32.totalorder %v2330_v1, 6  ;;  %vm453_vm12 = vcmp.eq.s32.totalorder %v2330_v1, 7  ;;  %v359_v12 = vld [vmem:[%s2342_s8 + $0x8] sm:$0xff] }
  0x15   : > { %v366_v5 = vld [vmem:[%s2342_s8 + $0x40] sm:$0xff]  ;;  %vm2360_vm9 = vmpackc.low %vm387_vm3, %vm387_vm3  ;;  %v2368_v7 = vadd.s32 8, %v2330_v1  ;;  %v383_v8 = vsel %vm2347_vm4, 0, %v358_v4  ;;  %v393_v10 = vrot.slane %v358_v4, 4  ;;  %v367_v13 = vld [vmem:[%s2342_s8 + $0x48] sm:$0xff]  ;;  %v415_v30 = vrot.slane %v359_v12, 4 }
  0x16   : > { %v384_v9 = vsel %vm2334_vm2, 0, %v366_v5  ;;  %v394_v11 = vrot.slane %v366_v5, 4  ;;  %vm403_vm13 = vmpackc.low %vm401_vm5, %vm401_vm5  ;;  %v555_v14 = vunpack.c.l.b16 %v383_v8  ;;  %v406_v17 = vsel %vm2334_vm2, 0, %v367_v13  ;;  %v360_v19 = vld [vmem:[%s2342_s8 + $0x10] sm:$0xff]  ;;  %v2404_v29 = vld [vmem:[%s305_s12] sm:$0xff]  ;;  %s2140_s15 = sshll.u32 %s3076_s18, 4 }
  0x17   : > { %v556_v15 = vunpack.c.l.b16 %v384_v9  ;;  %v405_v16 = vsel %vm403_vm13, 0, %v359_v12  ;;  %vm2387_vm14 = vmpackc.low %vm409_vm7, %vm409_vm7  ;;  %v368_v20 = vld [vmem:[%s2342_s8 + $0x50] sm:$0xff]  ;;  %v397_v21 = vsel %vm2360_vm9, 0, %v393_v10  ;;  %v568_v24 = vunpack.c.l.b16 %v406_v17  ;;  %v361_v31 = vld [vmem:[%s2342_s8 + $0x18] sm:$0xff]  ;;  %s2875_s21 = scalar_lea.vmem %s3037_s2, %s2140_s15  ;;  %s319_s25 = scalar_lea.vmem %s3040_s5, %s2140_s15 }
  0x18   : > { %v398_v22 = vsel %vm2334_vm2, 0, %v394_v11  ;;  %v567_v23 = vunpack.c.l.b16 %v405_v16  ;;  %vm2400_vm15 = vmpackc.low %vm423_vm8, %vm423_vm8  ;;  %v561_v27 = vunpack.c.l.b16 %v397_v21  ;;  %v416_v33 = vrot.slane %v367_v13, 4  ;;  %v369_v36 = vld [vmem:[%s2342_s8 + $0x58] sm:$0xff]  ;;  %v363_v50 = vld [vmem:[%s2342_s8 + $0x28] sm:$0xff] }
  0x19   : > { %v557_v26 = vpack.c.b16 %v556_v15, %v555_v14  ;;  %v562_v28 = vunpack.c.l.b16 %v398_v22  ;;  %v427_v34 = vsel %vm2400_vm15, 0, %v360_v19  ;;  %v428_v35 = vsel %vm2334_vm2, 0, %v368_v20  ;;  %vm2415_vm1 = vmpackc.low %vm445_vm11, %vm445_vm11  ;;  %v371_v59 = vld [vmem:[%s2342_s8 + $0x68] sm:$0xff]  ;;  %v362_v4 = vld [vmem:[%s2342_s8 + $0x20] sm:$0xff] }
  0x1a   : > { %v569_v32 = vpack.c.b16 %v568_v24, %v567_v23  ;;  %v419_v39 = vsel %vm2387_vm14, 0, %v415_v30  ;;  %v579_v40 = vunpack.c.l.b16 %v427_v34  ;;  %v580_v41 = vunpack.c.l.b16 %v428_v35  ;;  %vm433_vm4 = vmpackc.low %vm431_vm10, %vm431_vm10  ;;  %v370_v14 = vld [vmem:[%s2342_s8 + $0x60] sm:$0xff]  ;;  %v365_v18 = vld [vmem:[%s2342_s8 + $0x38] sm:$0xff] }
  0x1b   : > { %665 = vmatpush.bf16.msra.mxu0 %v557_v26  ;;  %v563_v38 = vpack.c.b16 %v562_v28, %v561_v27  ;;  %v420_v42 = vsel %vm2334_vm2, 0, %v416_v33  ;;  %v573_v43 = vunpack.c.l.b16 %v419_v39  ;;  %v437_v44 = vrot.slane %v360_v19, 4  ;;  %vm455_vm9 = vmpackc.low %vm453_vm12, %vm453_vm12  ;;  %v373_v19 = vld [vmem:[%s2342_s8 + $0x78] sm:$0xff]  ;;  %v364_v34 = vld [vmem:[%s2342_s8 + $0x30] sm:$0xff] }
  0x1c   : > { %693 = vmatpush.bf16.msra.mxu2 %v569_v32  ;;  %v438_v45 = vrot.slane %v368_v20, 4  ;;  %v574_v46 = vunpack.c.l.b16 %v420_v42  ;;  %v581_v47 = vpack.c.b16 %v580_v41, %v579_v40  ;;  %v449_v48 = vsel %vm2415_vm1, 0, %v361_v31  ;;  %v372_v40 = vld [vmem:[%s2342_s8 + $0x70] sm:$0xff]  ;;  %v2555_v9 = vld [vmem:[#allocation2 + $0x20] sm:$0xff]  ;;  %v2592_v16 = vld [vmem:[#allocation2 + $0x48] sm:$0xff] }
  0x1d   : > { %679 = vmatpush.bf16.msra.mxu1 %v563_v38  ;;  %v450_v49 = vsel %vm2334_vm2, 0, %v369_v36  ;;  %v441_v51 = vsel %vm433_vm4, 0, %v437_v44  ;;  %v591_v53 = vunpack.c.l.b16 %v449_v48  ;;  %v459_v58 = vrot.slane %v361_v31, 4 }
  0x1e   : > { %1992 = vmatmul.msk.bf16.vlgmr.msra.gmra.mxu0 %vm654_vm6, %v2404_v29  ;;  %v442_v52 = vsel %vm2334_vm2, 0, %v438_v45  ;;  %v592_v54 = vunpack.c.l.b16 %v450_v49  ;;  %v575_v55 = vpack.c.b16 %v574_v46, %v573_v43  ;;  %v585_v56 = vunpack.c.l.b16 %v441_v51 }
  0x1f   : > { %1994 = vmatmul.msk.bf16.vlgmr.msra.gmra.mxu2 %vm654_vm6, %v2404_v29  ;;  %721 = vmatpush.bf16.msrb.mxu0 %v581_v47  ;;  %v586_v57 = vunpack.c.l.b16 %v442_v52  ;;  %v460_v61 = vrot.slane %v369_v36, 4  ;;  %vm3042_vm13 = vcmp.eq.s32.totalorder %v2368_v7, 10  ;;  %v493_v62 = vsel %vm2334_vm2, 0, %v363_v50 }
  0x20   : > { %1993 = vmatmul.msk.bf16.vlgmr.msra.gmra.mxu1 %vm654_vm6, %v2404_v29  ;;  %v593_v60 = vpack.c.b16 %v592_v54, %v591_v53  ;;  %707 = vmatpush.bf16.msra.mxu3 %v575_v55  ;;  %v463_v0 = vsel %vm455_vm9, 0, %v459_v58  ;;  %vm492_vm14 = vmpackc.low %vm3042_vm13, %vm3042_vm13  ;;  %v615_v3 = vunpack.c.l.b16 %v493_v62  ;;  %vm3041_vm15 = vcmp.eq.s32.totalorder %v2368_v7, 11 }
  0x21   : > { %v587_v63 = vpack.c.b16 %v586_v57, %v585_v56  ;;  %v464_v5 = vsel %vm2334_vm2, 0, %v460_v61  ;;  %v597_v6 = vunpack.c.l.b16 %v463_v0  ;;  %v494_v8 = vsel %vm492_vm14, 0, %v371_v59  ;;  %vm2456_vm1 = vmpackc.low %vm3041_vm15, %vm3041_vm15 }
  0x22   : > { %749 = vmatpush.bf16.msrb.mxu2 %v593_v60  ;;  %v503_v10 = vrot.slane %v363_v50, 4  ;;  %v598_v11 = vunpack.c.l.b16 %v464_v5  ;;  %v616_v12 = vunpack.c.l.b16 %v494_v8  ;;  %v504_v13 = vrot.slane %v371_v59, 4  ;;  %v2542_v5 = vld [vmem:[#allocation2 + $0x70] sm:$0xff]  ;;  %v2552_v8 = vld [vmem:[#allocation2 + $0x68] sm:$0xff] }
  0x23   : > { %735 = vmatpush.bf16.msrb.mxu1 %v587_v63  ;;  %vm3045_vm4 = vcmp.eq.s32.totalorder %v2368_v7, 8  ;;  %1995 = vmatmul.msk.bf16.vlgmr.msra.gmra.mxu3 %vm654_vm6, %v2404_v29  ;;  %v471_v17 = vsel %vm2334_vm2, 0, %v362_v4  ;;  %vm3043_vm14 = vcmp.eq.s32.totalorder %v2368_v7, 15  ;;  %vm3044_vm15 = vcmp.eq.s32.totalorder %v2368_v7, 9 }
  0x24   : > { %v507_v15 = vsel %vm2334_vm2, 0, %v503_v10  ;;  %vm2469_vm9 = vmpackc.low %vm3045_vm4, %vm3045_vm4  ;;  %v599_v20 = vpack.c.b16 %v598_v11, %v597_v6  ;;  %v617_v21 = vpack.c.b16 %v616_v12, %v615_v3  ;;  %v508_v22 = vsel %vm2456_vm1, 0, %v504_v13  ;;  %v2533_v3 = vld [vmem:[#allocation2 + $0x78] sm:$0xff]  ;;  %v2545_v6 = vld [vmem:[#allocation2 + $0x28] sm:$0xff] }
  0x25   : > { %v621_v23 = vunpack.c.l.b16 %v507_v15  ;;  %v622_v24 = vunpack.c.l.b16 %v508_v22  ;;  %v472_v25 = vsel %vm2469_vm9, 0, %v370_v14  ;;  %v603_v26 = vunpack.c.l.b16 %v471_v17  ;;  %vm2486_vm13 = vmpackc.low %vm3043_vm14, %vm3043_vm14  ;;  %v2560_v10 = vld [vmem:[#allocation2 + $0x60] sm:$0xff]  ;;  %v2563_v11 = vld [vmem:[#allocation2 + $0x18] sm:$0xff] }
  0x26   : > { %v547_v28 = vrot.slane %v365_v18, 4  ;;  %763 = vmatpush.bf16.msrb.mxu3 %v599_v20  ;;  %805 = vmatpush.bf16.msra.mxu2 %v617_v21  ;;  %v604_v30 = vunpack.c.l.b16 %v472_v25  ;;  %v548_v31 = vrot.slane %v373_v19, 4  ;;  %vm478_vm1 = vmpackc.low %vm3044_vm15, %vm3044_vm15  ;;  %v481_v32 = vrot.slane %v362_v4, 4  ;;  %v2536_v4 = vld [vmem:[#allocation2 + $0x30] sm:$0xff]  ;;  %v2570_v12 = vld [vmem:[#allocation2 + $0x58] sm:$0xff] }
  0x27   : > { %v482_v33 = vrot.slane %v370_v14, 4  ;;  %v623_v35 = vpack.c.b16 %v622_v24, %v621_v23  ;;  %vm3046_vm9 = vcmp.eq.s32.totalorder %v2368_v7, 12  ;;  %v515_v36 = vsel %vm2334_vm2, 0, %v364_v34  ;;  %v2573_v13 = vld [vmem:[#allocation2 + $0x10] sm:$0xff]  ;;  %v2585_v15 = vld [vmem:[#allocation2 + $0x8] sm:$0xff]  ;;  %v2595_v17 = vld [vmem:[#allocation2] sm:$0xff] }
  0x28   : > { %v605_v37 = vpack.c.b16 %v604_v30, %v603_v26  ;;  %v551_v38 = vsel %vm2334_vm2, 0, %v547_v28  ;;  %v485_v39 = vsel %vm2334_vm2, 0, %v481_v32  ;;  %vm514_vm14 = vmpackc.low %vm3046_vm9, %vm3046_vm9  ;;  %v552_v41 = vsel %vm2486_vm13, 0, %v548_v31  ;;  %v2582_v14 = vld [vmem:[#allocation2 + $0x50] sm:$0xff]  ;;  %v2010_v21 = vld [vmem:[%s2342_s8] sm:$0xf] }
  0x29   : > { %v486_v42 = vsel %vm478_vm1, 0, %v482_v33  ;;  %v609_v43 = vunpack.c.l.b16 %v485_v39  ;;  %v516_v44 = vsel %vm514_vm14, 0, %v372_v40  ;;  %v627_v46 = vunpack.c.l.b16 %v515_v36  ;;  %v2167_v22 = vld [vmem:[%s2342_s8 + $0x3c] sm:$0xf0]  ;;  %v2082_v24 = vld [vmem:[%s2342_s8 + $0x8] sm:$0xf] }
  0x2a   : > { %819 = vmatpush.bf16.msra.mxu3 %v623_v35  ;;  %777 = vmatpush.bf16.msra.mxu0 %v605_v37  ;;  %v610_v45 = vunpack.c.l.b16 %v486_v42  ;;  %v628_v47 = vunpack.c.l.b16 %v516_v44  ;;  %vm520_vm15 = vcmp.eq.s32.totalorder %v2368_v7, 13  ;;  %v645_v48 = vunpack.c.l.b16 %v551_v38  ;;  %v2168_v25 = vld [vmem:[%s2342_s8 + $0x44] sm:$0xf0]  ;;  %v2160_v28 = vld [vmem:[%s2342_s8 + $0xc] sm:$0xf] }
  0x2b   : > { %vm522_vm4 = vmpackc.low %vm520_vm15, %vm520_vm15  ;;  %v525_v49 = vrot.slane %v364_v34, 4  ;;  %v526_v50 = vrot.slane %v372_v40, 4  ;;  %vm534_vm9 = vcmp.eq.s32.totalorder %v2368_v7, 14  ;;  %v646_v51 = vunpack.c.l.b16 %v552_v41  ;;  %v2084_v30 = vld [vmem:[%s2342_s8 + $0x48] sm:$0xf0] }
  0x2c   : > { %v611_v52 = vpack.c.b16 %v610_v45, %v609_v43  ;;  %v629_v53 = vpack.c.b16 %v628_v47, %v627_v46  ;;  %vm536_vm13 = vmpackc.low %vm534_vm9, %vm534_vm9  ;;  %v537_v54 = vsel %vm2334_vm2, 0, %v365_v18  ;;  %v2600_v18 = vld [vmem:[#allocation2 + $0x40] sm:$0xff]  ;;  %v2011_v23 = vor.u32 %v2167_v22, %v2010_v21 }
  0x2d   : > { %v529_v55 = vsel %vm2334_vm2, 0, %v525_v49  ;;  %v530_v56 = vsel %vm522_vm4, 0, %v526_v50  ;;  %v538_v57 = vsel %vm536_vm13, 0, %v373_v19  ;;  %v639_v58 = vunpack.c.l.b16 %v537_v54  ;;  %v2076_v19 = vld [vmem:[%s2342_s8 + $0x40] sm:$0xf0] }
  0x2e   : > { %1996 = vmatmul.msk.bf16.vlgmr.msrb.gmra.mxu0 %vm654_vm6, %v2404_v29  ;;  %791 = vmatpush.bf16.msra.mxu1 %v611_v52  ;;  %v633_v59 = vunpack.c.l.b16 %v529_v55  ;;  %v634_v60 = vunpack.c.l.b16 %v530_v56  ;;  %v640_v61 = vunpack.c.l.b16 %v538_v57  ;;  %v647_v62 = vpack.c.b16 %v646_v51, %v645_v48  ;;  %v2090_v49 = vld [vmem:[%s2342_s8 + $0x10] sm:$0xf]  ;;  %v2161_v54 = vld [vmem:[%s2342_s8 + $0x14] sm:$0xf] }
  0x2f   : > { %1998 = vmatmul.msk.bf16.vlgmr.msrb.gmra.mxu2 %vm654_vm6, %v2404_v29  ;;  %833 = vmatpush.bf16.msrb.mxu0 %v629_v53  ;;  %v2083_v27 = vor.u32 %v2168_v25, %v2082_v24  ;;  %v2087_v33 = vor.u32 %v2160_v28, %v2084_v30  ;;  %v2169_v50 = vld [vmem:[%s2342_s8 + $0x4c] sm:$0xf0]  ;;  %v2092_v55 = vld [vmem:[%s2342_s8 + $0x50] sm:$0xf0]  ;;  %vm3066_vm2 = vcmp.eq.s32.totalorder %v2368_v7, 9 }
  0x30   : > { %1997 = vmatmul.msk.bf16.vlgmr.msrb.gmra.mxu1 %vm654_vm6, %v2404_v29  ;;  %v635_v63 = vpack.c.b16 %v634_v60, %v633_v59  ;;  %v641_v0 = vpack.c.b16 %v640_v61, %v639_v58  ;;  %v2091_v53 = vor.u32 %v2169_v50, %v2090_v49  ;;  %v2095_v57 = vor.u32 %v2161_v54, %v2092_v55 }
  0x32   : > { %847 = vmatpush.bf16.msrb.mxu1 %v635_v63  ;;  %861 = vmatpush.bf16.msrb.mxu2 %v641_v0 }
  0x33   : > { %1999 = vmatmul.msk.bf16.vlgmr.msrb.gmra.mxu3 %vm654_vm6, %v2404_v29 }
  0x34   : > { %875 = vmatpush.bf16.msrb.mxu3 %v647_v62 }
  0x3e   : > { %2000 = vmatmul.msk.bf16.vlgmr.msra.gmra.mxu0 %vm654_vm6, %v2404_v29 }
  0x3f   : > { %2002 = vmatmul.msk.bf16.vlgmr.msra.gmra.mxu2 %vm654_vm6, %v2404_v29  ;;  %995 = vmatpush.bf16.msra.mxu0 %v2527_v2 }
  0x40   : > { %2001 = vmatmul.msk.bf16.vlgmr.msra.gmra.mxu1 %vm654_vm6, %v2404_v29  ;;  %1049 = vmatpush.bf16.msra.mxu2 %v2527_v2 }
  0x41   : > { %1009 = vmatpush.bf16.msra.mxu1 %v2533_v3 }
  0x43   : > { %996 = vmatpush.bf16.msra.mxu0 %v2536_v4  ;;  %2003 = vmatmul.msk.bf16.vlgmr.msra.gmra.mxu3 %vm654_vm6, %v2404_v29 }
  0x44   : > { %1050 = vmatpush.bf16.msra.mxu2 %v2536_v4  ;;  %1063 = vmatpush.bf16.msra.mxu3 %v2533_v3 }
  0x45   : > { %1010 = vmatpush.bf16.msra.mxu1 %v2542_v5 }
  0x47   : > { %997 = vmatpush.bf16.msra.mxu0 %v2545_v6 }
  0x48   : > { %1051 = vmatpush.bf16.msra.mxu2 %v2545_v6  ;;  %1064 = vmatpush.bf16.msra.mxu3 %v2542_v5 }
  0x49   : > { %1011 = vmatpush.bf16.msra.mxu1 %v2552_v8 }
  0x4b   : > { %998 = vmatpush.bf16.msra.mxu0 %v2555_v9 }
  0x4c   : > { %1052 = vmatpush.bf16.msra.mxu2 %v2555_v9  ;;  %1065 = vmatpush.bf16.msra.mxu3 %v2552_v8 }
  0x4d   : > { %1012 = vmatpush.bf16.msra.mxu1 %v2560_v10 }
  0x4e   : > { %2004 = vmatmul.msk.bf16.vlgmr.msrb.gmra.mxu0 %vm654_vm6, %v2404_v29 }
  0x4f   : > { %999 = vmatpush.bf16.msra.mxu0 %v2563_v11  ;;  %2006 = vmatmul.msk.bf16.vlgmr.msrb.gmra.mxu2 %vm654_vm6, %v2404_v29 }
  0x50   : > { %1053 = vmatpush.bf16.msra.mxu2 %v2563_v11  ;;  %2005 = vmatmul.msk.bf16.vlgmr.msrb.gmra.mxu1 %vm654_vm6, %v2404_v29 }
  0x51   : > { %1066 = vmatpush.bf16.msra.mxu3 %v2560_v10  ;;  %1013 = vmatpush.bf16.msra.mxu1 %v2570_v12 }
  0x53   : > { %1000 = vmatpush.bf16.msra.mxu0 %v2573_v13  ;;  %2007 = vmatmul.msk.bf16.vlgmr.msrb.gmra.mxu3 %vm654_vm6, %v2404_v29  ;;  %v2159_v29 = vld [vmem:[%s2342_s8 + $0x4] sm:$0xf]  ;;  %vm3069_vm6 = vcmp.eq.s32.totalorder %v2368_v7, 12 }
  0x54   : > { %1054 = vmatpush.bf16.msra.mxu2 %v2573_v13  ;;  %v2079_v20 = vor.u32 %v2159_v29, %v2076_v19 }
  0x55   : > { %1067 = vmatpush.bf16.msra.mxu3 %v2570_v12  ;;  %1014 = vmatpush.bf16.msra.mxu1 %v2582_v14 }
  0x57   : > { %1001 = vmatpush.bf16.msra.mxu0 %v2585_v15 }
  0x58   : > { %1055 = vmatpush.bf16.msra.mxu2 %v2585_v15 }
  0x59   : > { %1068 = vmatpush.bf16.msra.mxu3 %v2582_v14  ;;  %1015 = vmatpush.bf16.msra.mxu1 %v2592_v16 }
  0x5b   : > { %1002 = vmatpush.bf16.msra.mxu0 %v2595_v17 }
  0x5c   : > { %1056 = vmatpush.bf16.msra.mxu2 %v2595_v17 }
  0x5d   : > { %1069 = vmatpush.bf16.msra.mxu3 %v2592_v16  ;;  %1016 = vmatpush.bf16.msra.mxu1 %v2600_v18 }
  0x5f   : > { %1103 = vmatpush.bf16.msrb.mxu0 %v2527_v2 }
  0x60   : > { %1157 = vmatpush.bf16.msrb.mxu2 %v2527_v2  ;;  %1017 = vmatmul.bf16.vlgmr.msra.gmra.mxu1 %v2011_v23 }
  0x61   : > { %1117 = vmatpush.bf16.msrb.mxu1 %v2533_v3  ;;  %1070 = vmatpush.bf16.msra.mxu3 %v2600_v18 }
  0x63   : > { %1104 = vmatpush.bf16.msrb.mxu0 %v2536_v4 }
  0x64   : > { %1158 = vmatpush.bf16.msrb.mxu2 %v2536_v4  ;;  %1071 = vmatmul.bf16.vlgmr.msra.gmra.mxu3 %v2079_v20 }
  0x65   : > { %1171 = vmatpush.bf16.msrb.mxu3 %v2533_v3  ;;  %1118 = vmatpush.bf16.msrb.mxu1 %v2542_v5 }
  0x67   : > { %1105 = vmatpush.bf16.msrb.mxu0 %v2545_v6 }
  0x68   : > { %1159 = vmatpush.bf16.msrb.mxu2 %v2545_v6 }
  0x69   : > { %1172 = vmatpush.bf16.msrb.mxu3 %v2542_v5  ;;  %1119 = vmatpush.bf16.msrb.mxu1 %v2552_v8 }
  0x6b   : > { %1106 = vmatpush.bf16.msrb.mxu0 %v2555_v9 }
  0x6c   : > { %1160 = vmatpush.bf16.msrb.mxu2 %v2555_v9 }
  0x6d   : > { %1173 = vmatpush.bf16.msrb.mxu3 %v2552_v8  ;;  %1120 = vmatpush.bf16.msrb.mxu1 %v2560_v10 }
  0x6f   : > { %1107 = vmatpush.bf16.msrb.mxu0 %v2563_v11 }
  0x70   : > { %1161 = vmatpush.bf16.msrb.mxu2 %v2563_v11 }
  0x71   : > { %1174 = vmatpush.bf16.msrb.mxu3 %v2560_v10  ;;  %1121 = vmatpush.bf16.msrb.mxu1 %v2570_v12 }
  0x73   : > { %1108 = vmatpush.bf16.msrb.mxu0 %v2573_v13 }
  0x74   : > { %1162 = vmatpush.bf16.msrb.mxu2 %v2573_v13 }
  0x75   : > { %1175 = vmatpush.bf16.msrb.mxu3 %v2570_v12  ;;  %1122 = vmatpush.bf16.msrb.mxu1 %v2582_v14 }
  0x77   : > { %1109 = vmatpush.bf16.msrb.mxu0 %v2585_v15 }
  0x78   : > { %1163 = vmatpush.bf16.msrb.mxu2 %v2585_v15 }
  0x79   : > { %1176 = vmatpush.bf16.msrb.mxu3 %v2582_v14  ;;  %1123 = vmatpush.bf16.msrb.mxu1 %v2592_v16 }
  0x7b   : > { %1110 = vmatpush.bf16.msrb.mxu0 %v2595_v17 }
  0x7c   : > { %1164 = vmatpush.bf16.msrb.mxu2 %v2595_v17 }
  0x7d   : > { %1177 = vmatpush.bf16.msrb.mxu3 %v2592_v16  ;;  %1124 = vmatpush.bf16.msrb.mxu1 %v2600_v18 }
  0x80   : > { %1125 = vmatmul.bf16.vlgmr.msrb.gmra.mxu1 %v2083_v27 }
  0x81   : > { %1178 = vmatpush.bf16.msrb.mxu3 %v2600_v18  ;;  %1225 = vmatpush.bf16.msra.mxu1 %v2533_v3 }
  0x84   : > { %1179 = vmatmul.bf16.vlgmr.msrb.gmra.mxu3 %v2087_v33 }
  0x85   : > { %1279 = vmatpush.bf16.msra.mxu3 %v2533_v3  ;;  %1226 = vmatpush.bf16.msra.mxu1 %v2542_v5 }
  0x89   : > { %1280 = vmatpush.bf16.msra.mxu3 %v2542_v5  ;;  %1227 = vmatpush.bf16.msra.mxu1 %v2552_v8 }
  0x8d   : > { %1281 = vmatpush.bf16.msra.mxu3 %v2552_v8  ;;  %1228 = vmatpush.bf16.msra.mxu1 %v2560_v10 }
  0x91   : > { %1282 = vmatpush.bf16.msra.mxu3 %v2560_v10  ;;  %1229 = vmatpush.bf16.msra.mxu1 %v2570_v12 }
  0x95   : > { %1283 = vmatpush.bf16.msra.mxu3 %v2570_v12  ;;  %1230 = vmatpush.bf16.msra.mxu1 %v2582_v14 }
  0x99   : > { %1284 = vmatpush.bf16.msra.mxu3 %v2582_v14  ;;  %1231 = vmatpush.bf16.msra.mxu1 %v2592_v16 }
  0x9b   : > { %v667_v26 = vpop.f32.mrf.mxu0 }
  0x9c   : > { %v882_v31 = vsel %vm379_vm0, 0.0, %v667_v26  ;;  %vm3065_vm0 = vcmp.eq.s32.totalorder %v2368_v7, 8 }
  0x9d   : > { %v681_v32 = vpop.f32.mrf.mxu1  ;;  %v884_v34 = vpack.c.bf16 %v882_v31, %v882_v31  ;;  %1285 = vmatpush.bf16.msra.mxu3 %v2592_v16  ;;  %1232 = vmatpush.bf16.msra.mxu1 %v2600_v18 }
  0x9e   : > { %v1035_v35 = vsel %vm387_vm3, 0.0, %v681_v32  ;;  %vm3067_vm3 = vcmp.eq.s32.totalorder %v2368_v7, 10 }
  0x9f   : > { %v888_v38 = vunpack.c.l.b16 %v884_v34  ;;  %v1037_v39 = vpack.c.bf16 %v1035_v35, %v1035_v35 }
  0xa0   : > { %1233 = vmatmul.bf16.vlgmr.msra.gmra.mxu1 %v2091_v53 }
  0xa1   : > { %1286 = vmatpush.bf16.msra.mxu3 %v2600_v18  ;;  %v1041_v45 = vunpack.c.l.b16 %v1037_v39  ;;  %1333 = vmatpush.bf16.msrb.mxu1 %v2533_v3  ;;  %v2170_v39 = vld [vmem:[%s2342_s8 + $0x54] sm:$0xf0] }
  0xa2   : > { %v695_v36 = vpop.f32.mrf.mxu2 }
  0xa3   : > { %v669_v37 = vpop.f32.mrf.mxu0  ;;  %v1089_v51 = vsel %vm401_vm5, 0.0, %v695_v36  ;;  %vm3068_vm5 = vcmp.eq.s32.totalorder %v2368_v7, 11 }
  0xa4   : > { %v885_v40 = vpack.c.bf16 %v669_v37, %v669_v37  ;;  %v1091_v58 = vpack.c.bf16 %v1089_v51, %v1089_v51  ;;  %1287 = vmatmul.bf16.vlgmr.msra.gmra.mxu3 %v2095_v57 }
  0xa5   : > { %v683_v41 = vpop.f32.mrf.mxu1  ;;  %1387 = vmatpush.bf16.msrb.mxu3 %v2533_v3  ;;  %1334 = vmatpush.bf16.msrb.mxu1 %v2542_v5 }
  0xa6   : > { %v889_v42 = vunpack.c.l.b16 %v885_v40  ;;  %v1038_v43 = vpack.c.bf16 %v683_v41, %v683_v41  ;;  %v709_v44 = vpop.f32.mrf.mxu3  ;;  %v1095_v0 = vunpack.c.l.b16 %v1091_v58 }
  0xa7   : > { %v1143_v56 = vsel %vm409_vm7, 0.0, %v709_v44  ;;  %vm3070_vm7 = vcmp.eq.s32.totalorder %v2368_v7, 15 }
  0xa8   : > { %v890_v46 = vpack.c.b16 %v889_v42, %v888_v38  ;;  %v1042_v47 = vunpack.c.l.b16 %v1038_v43  ;;  %v1145_v61 = vpack.c.bf16 %v1143_v56, %v1143_v56  ;;  %v2098_v38 = vld [vmem:[%s2342_s8 + $0x18] sm:$0xf]  ;;  %v2162_v42 = vld [vmem:[%s2342_s8 + $0x1c] sm:$0xf] }
  0xa9   : > { %1388 = vmatpush.bf16.msrb.mxu3 %v2542_v5  ;;  %1335 = vmatpush.bf16.msrb.mxu1 %v2552_v8  ;;  %v2099_v40 = vor.u32 %v2170_v39, %v2098_v38  ;;  %v2100_v43 = vld [vmem:[%s2342_s8 + $0x58] sm:$0xf0]  ;;  %v2164_v38 = vld [vmem:[%s2342_s8 + $0x2c] sm:$0xf] }
  0xaa   : > { %v1043_v48 = vpack.c.b16 %v1042_v47, %v1041_v45  ;;  %1003 = vmatmul.bf16.vlgmr.msra.gmra.mxu0 %v890_v46  ;;  %v697_v52 = vpop.f32.mrf.mxu2  ;;  %v1149_v20 = vunpack.c.l.b16 %v1145_v61  ;;  %v2103_v44 = vor.u32 %v2162_v42, %v2100_v43  ;;  %v2116_v39 = vld [vmem:[%s2342_s8 + $0x68] sm:$0xf0] }
  0xab   : > { %1211 = vmatpush.bf16.msra.mxu0 %v2527_v2  ;;  %v1092_v59 = vpack.c.bf16 %v697_v52, %v697_v52  ;;  %v723_v63 = vpop.f32.mrf.mxu0 }
  0xac   : > { %1057 = vmatmul.bf16.vlgmr.msra.gmra.mxu2 %v1043_v48  ;;  %v1197_v24 = vsel %vm423_vm8, 0.0, %v723_v63  ;;  %v2163_v63 = vld [vmem:[%s2342_s8 + $0x24] sm:$0xf] }
  0xad   : > { %1265 = vmatpush.bf16.msra.mxu2 %v2527_v2  ;;  %1389 = vmatpush.bf16.msrb.mxu3 %v2552_v8  ;;  %v1096_v29 = vunpack.c.l.b16 %v1092_v59  ;;  %v737_v19 = vpop.f32.mrf.mxu1  ;;  %v1199_v28 = vpack.c.bf16 %v1197_v24, %v1197_v24  ;;  %v2106_v59 = vld [vmem:[%s2342_s8 + $0x20] sm:$0xf] }
  0xae   : > { %v711_v60 = vpop.f32.mrf.mxu3  ;;  %1336 = vmatpush.bf16.msrb.mxu1 %v2560_v10  ;;  %v1251_v26 = vsel %vm431_vm10, 0.0, %v737_v19 }
  0xaf   : > { %1212 = vmatpush.bf16.msra.mxu0 %v2536_v4  ;;  %v1146_v62 = vpack.c.bf16 %v711_v60, %v711_v60  ;;  %v1097_v22 = vpack.c.b16 %v1096_v29, %v1095_v0  ;;  %v1253_v31 = vpack.c.bf16 %v1251_v26, %v1251_v26  ;;  %v1203_v33 = vunpack.c.l.b16 %v1199_v28  ;;  %v2171_v60 = vld [vmem:[%s2342_s8 + $0x5c] sm:$0xf0]  ;;  %v2108_v0 = vld [vmem:[%s2342_s8 + $0x60] sm:$0xf0] }
  0xb0   : > { %v2107_v61 = vor.u32 %v2171_v60, %v2106_v59  ;;  %v2111_v29 = vor.u32 %v2163_v63, %v2108_v0  ;;  %v2122_v60 = vld [vmem:[%s2342_s8 + $0x30] sm:$0xf] }
  0xb1   : > { %1266 = vmatpush.bf16.msra.mxu2 %v2536_v4  ;;  %1390 = vmatpush.bf16.msrb.mxu3 %v2560_v10  ;;  %v1150_v21 = vunpack.c.l.b16 %v1146_v62  ;;  %v1257_v35 = vunpack.c.l.b16 %v1253_v31 }
  0xb2   : > { %1337 = vmatpush.bf16.msrb.mxu1 %v2570_v12  ;;  %v751_v45 = vpop.f32.mrf.mxu2 }
  0xb3   : > { %1213 = vmatpush.bf16.msra.mxu0 %v2545_v6  ;;  %v1151_v23 = vpack.c.b16 %v1150_v21, %v1149_v20  ;;  %v725_v25 = vpop.f32.mrf.mxu0  ;;  %v1305_v47 = vsel %vm445_vm11, 0.0, %v751_v45 }
  0xb4   : > { %v1200_v30 = vpack.c.bf16 %v725_v25, %v725_v25  ;;  %v1307_v51 = vpack.c.bf16 %v1305_v47, %v1305_v47 }
  0xb5   : > { %1267 = vmatpush.bf16.msra.mxu2 %v2545_v6  ;;  %1391 = vmatpush.bf16.msrb.mxu3 %v2570_v12  ;;  %v739_v27 = vpop.f32.mrf.mxu1 }
  0xb6   : > { %1338 = vmatpush.bf16.msrb.mxu1 %v2582_v14  ;;  %v1254_v32 = vpack.c.bf16 %v739_v27, %v739_v27  ;;  %v1204_v34 = vunpack.c.l.b16 %v1200_v30  ;;  %v765_v46 = vpop.f32.mrf.mxu3  ;;  %v1311_v55 = vunpack.c.l.b16 %v1307_v51 }
  0xb7   : > { %1214 = vmatpush.bf16.msra.mxu0 %v2555_v9  ;;  %v1359_v49 = vsel %vm453_vm12, 0.0, %v765_v46 }
  0xb8   : > { %v1258_v36 = vunpack.c.l.b16 %v1254_v32  ;;  %v1205_v37 = vpack.c.b16 %v1204_v34, %v1203_v33  ;;  %v1361_v53 = vpack.c.bf16 %v1359_v49, %v1359_v49  ;;  %v2114_v34 = vld [vmem:[%s2342_s8 + $0x28] sm:$0xf] }
  0xb9   : > { %1268 = vmatpush.bf16.msra.mxu2 %v2555_v9  ;;  %1392 = vmatpush.bf16.msrb.mxu3 %v2582_v14 }
  0xba   : > { %1111 = vmatmul.bf16.vlgmr.msrb.gmra.mxu0 %v1097_v22  ;;  %1339 = vmatpush.bf16.msrb.mxu1 %v2592_v16  ;;  %v1259_v41 = vpack.c.b16 %v1258_v36, %v1257_v35  ;;  %v753_v48 = vpop.f32.mrf.mxu2  ;;  %v1365_v56 = vunpack.c.l.b16 %v1361_v53  ;;  %v2172_v35 = vld [vmem:[%s2342_s8 + $0x64] sm:$0xf0] }
  0xbb   : > { %1215 = vmatpush.bf16.msra.mxu0 %v2563_v11  ;;  %v1308_v52 = vpack.c.bf16 %v753_v48, %v753_v48  ;;  %v779_v19 = vpop.f32.mrf.mxu0  ;;  %v2115_v36 = vor.u32 %v2172_v35, %v2114_v34 }
  0xbc   : > { %1165 = vmatmul.bf16.vlgmr.msrb.gmra.mxu2 %v1151_v23  ;;  %v1415_v25 = vpack.c.bf16 %v779_v19, %v779_v19  ;;  %v2124_v19 = vld [vmem:[%s2342_s8 + $0x70] sm:$0xf0] }
  0xbd   : > { %1269 = vmatpush.bf16.msra.mxu2 %v2563_v11  ;;  %1393 = vmatpush.bf16.msrb.mxu3 %v2592_v16  ;;  %v1312_v1 = vunpack.c.l.b16 %v1308_v52  ;;  %v793_v20 = vpop.f32.mrf.mxu1 }
  0xbe   : > { %1340 = vmatpush.bf16.msrb.mxu1 %v2600_v18  ;;  %v767_v50 = vpop.f32.mrf.mxu3  ;;  %v1469_v27 = vpack.c.bf16 %v793_v20, %v793_v20  ;;  %v1419_v30 = vunpack.c.l.b16 %v1415_v25 }
  0xbf   : > { %1216 = vmatpush.bf16.msra.mxu0 %v2573_v13  ;;  %v1362_v54 = vpack.c.bf16 %v767_v50, %v767_v50  ;;  %v1313_v58 = vpack.c.b16 %v1312_v1, %v1311_v55 }
  0xc0   : > { %v1473_v32 = vunpack.c.l.b16 %v1469_v27 }
  0xc1   : > { %1270 = vmatpush.bf16.msra.mxu2 %v2573_v13  ;;  %1394 = vmatpush.bf16.msrb.mxu3 %v2600_v18  ;;  %v1366_v57 = vunpack.c.l.b16 %v1362_v54 }
  0xc2   : > { %1441 = vmatpush.bf16.msra.mxu1 %v2533_v3  ;;  %v807_v42 = vpop.f32.mrf.mxu2 }
  0xc3   : > { %1217 = vmatpush.bf16.msra.mxu0 %v2585_v15  ;;  %1341 = vmatmul.bf16.vlgmr.msrb.gmra.mxu1 %v2099_v40  ;;  %v1367_v62 = vpack.c.b16 %v1366_v57, %v1365_v56  ;;  %v781_v21 = vpop.f32.mrf.mxu0  ;;  %v2119_v40 = vor.u32 %v2164_v38, %v2116_v39  ;;  %v1523_v50 = vpack.c.bf16 %v807_v42, %v807_v42 }
  0xc4   : > { %1395 = vmatmul.bf16.vlgmr.msrb.gmra.mxu3 %v2103_v44  ;;  %v1414_v23 = vsel %vm3065_vm0, 0.0, %v781_v21 }
  0xc5   : > { %1495 = vmatpush.bf16.msra.mxu3 %v2533_v3  ;;  %1271 = vmatpush.bf16.msra.mxu2 %v2585_v15  ;;  %v795_v22 = vpop.f32.mrf.mxu1  ;;  %v1416_v26 = vpack.c.bf16 %v1414_v23, %v1414_v23  ;;  %v1527_v1 = vunpack.c.l.b16 %v1523_v50 }
  0xc6   : > { %1442 = vmatpush.bf16.msra.mxu1 %v2542_v5  ;;  %v1468_v24 = vsel %vm3066_vm2, 0.0, %v795_v22  ;;  %v821_v43 = vpop.f32.mrf.mxu3 }
  0xc7   : > { %1218 = vmatpush.bf16.msra.mxu0 %v2595_v17  ;;  %v1470_v28 = vpack.c.bf16 %v1468_v24, %v1468_v24  ;;  %v1420_v31 = vunpack.c.l.b16 %v1416_v26  ;;  %v1577_v52 = vpack.c.bf16 %v821_v43, %v821_v43  ;;  %v2856_v24 = vld [vmem:[%s3039_s4] ss:$0 sm:$0xff] }
  0xc9   : > { %1496 = vmatpush.bf16.msra.mxu3 %v2542_v5  ;;  %1272 = vmatpush.bf16.msra.mxu2 %v2595_v17  ;;  %v1474_v33 = vunpack.c.l.b16 %v1470_v28  ;;  %v1581_v57 = vunpack.c.l.b16 %v1577_v52  ;;  %v2908_v52 = vld [vmem:[%s2875_s21 + $0x8] sm:$0xff] }
  0xca   : > { %1219 = vmatmul.bf16.vlgmr.msra.gmra.mxu0 %v1205_v37  ;;  %1443 = vmatpush.bf16.msra.mxu1 %v2552_v8  ;;  %v1421_v37 = vpack.c.b16 %v1420_v31, %v1419_v30  ;;  %v809_v45 = vpop.f32.mrf.mxu2 }
  0xcb   : > { %1319 = vmatpush.bf16.msrb.mxu0 %v2527_v2  ;;  %v1522_v47 = vsel %vm3067_vm3, 0.0, %v809_v45  ;;  %v2820_v48 = vpop.f32.mrf.mxu0 }
  0xcc   : > { %1273 = vmatmul.bf16.vlgmr.msra.gmra.mxu2 %v1259_v41  ;;  %v1475_v41 = vpack.c.b16 %v1474_v33, %v1473_v32  ;;  %v1524_v51 = vpack.c.bf16 %v1522_v47, %v1522_v47  ;;  %v2166_v47 = vld [vmem:[%s2342_s8 + $0x3c] sm:$0xf] }
  0xcd   : > { %1373 = vmatpush.bf16.msrb.mxu2 %v2527_v2  ;;  %1497 = vmatpush.bf16.msra.mxu3 %v2552_v8  ;;  %v2811_v44 = vpop.f32.mrf.mxu1 }
  0xce   : > { %1444 = vmatpush.bf16.msra.mxu1 %v2560_v10  ;;  %v823_v46 = vpop.f32.mrf.mxu3  ;;  %v1528_v56 = vunpack.c.l.b16 %v1524_v51  ;;  %v1685_v42 = vpack.c.bf16 %v2811_v44, %v2811_v44 }
  0xcf   : > { %1320 = vmatpush.bf16.msrb.mxu0 %v2536_v4  ;;  %v1576_v49 = vsel %vm3068_vm5, 0.0, %v823_v46 }
  0xd0   : > { %v1578_v53 = vpack.c.bf16 %v1576_v49, %v1576_v49  ;;  %v1529_v63 = vpack.c.b16 %v1528_v56, %v1527_v1  ;;  %v2130_v1 = vld [vmem:[%s2342_s8 + $0x38] sm:$0xf] }
  0xd1   : > { %1374 = vmatpush.bf16.msrb.mxu2 %v2536_v4  ;;  %1498 = vmatpush.bf16.msra.mxu3 %v2560_v10  ;;  %v2174_v56 = vld [vmem:[%s2342_s8 + $0x74] sm:$0xf0] }
  0xd2   : > { %1445 = vmatpush.bf16.msra.mxu1 %v2570_v12  ;;  %v2837_v59 = vpop.f32.mrf.mxu2 }
  0xd3   : > { %1321 = vmatpush.bf16.msrb.mxu0 %v2545_v6  ;;  %v837_v0 = vpop.f32.mrf.mxu0 }
  0xd4   : > { %v1630_v34 = vsel %vm3069_vm6, 0.0, %v837_v0  ;;  %v2131_v0 = vor.u32 %v2174_v56, %v2130_v1 }
  0xd5   : > { %1375 = vmatpush.bf16.msrb.mxu2 %v2545_v6  ;;  %1499 = vmatpush.bf16.msra.mxu3 %v2570_v12  ;;  %v2830_v55 = vpop.f32.mrf.mxu1  ;;  %v1632_v38 = vpack.c.bf16 %v1630_v34, %v1630_v34 }
  0xd6   : > { %1446 = vmatpush.bf16.msra.mxu1 %v2582_v14  ;;  %v2828_v54 = vpop.f32.mrf.mxu3 }
  0xd7   : > { %1322 = vmatpush.bf16.msrb.mxu0 %v2555_v9  ;;  %v1636_v51 = vunpack.c.l.b16 %v1632_v38 }
  0xd9   : > { %1376 = vmatpush.bf16.msrb.mxu2 %v2555_v9  ;;  %1500 = vmatpush.bf16.msra.mxu3 %v2582_v14 }
  0xda   : > { %1447 = vmatpush.bf16.msra.mxu1 %v2592_v16 }
  0xdb   : > { %1323 = vmatpush.bf16.msrb.mxu0 %v2563_v11 }
  0xdd   : > { %1377 = vmatpush.bf16.msrb.mxu2 %v2563_v11  ;;  %1501 = vmatpush.bf16.msra.mxu3 %v2592_v16  ;;  %v1018_v22 = vpop.f32.mrf.mxu1 }
  0xde   : > { %1448 = vmatpush.bf16.msra.mxu1 %v2600_v18  ;;  %v2850_v23 = vpop.f32.mrf.mxu3 }
  0xdf   : > { %1324 = vmatpush.bf16.msrb.mxu0 %v2573_v13 }
  0xe1   : > { %1378 = vmatpush.bf16.msrb.mxu2 %v2573_v13  ;;  %1502 = vmatpush.bf16.msra.mxu3 %v2600_v18 }
  0xe2   : > { %1549 = vmatpush.bf16.msrb.mxu1 %v2533_v3 }
  0xe3   : > { %1325 = vmatpush.bf16.msrb.mxu0 %v2585_v15  ;;  %1449 = vmatmul.bf16.vlgmr.msra.gmra.mxu1 %v2107_v61  ;;  %v2173_v61 = vld [vmem:[%s2342_s8 + $0x6c] sm:$0xf0] }
  0xe4   : > { %1503 = vmatmul.bf16.vlgmr.msra.gmra.mxu3 %v2111_v29  ;;  %v2165_v29 = vld [vmem:[%s2342_s8 + $0x34] sm:$0xf] }
  0xe5   : > { %1603 = vmatpush.bf16.msrb.mxu3 %v2533_v3  ;;  %1379 = vmatpush.bf16.msrb.mxu2 %v2585_v15  ;;  %v2127_v20 = vor.u32 %v2165_v29, %v2124_v19  ;;  %v1020_v28 = vpop.f32.mrf.mxu1 }
  0xe6   : > { %1550 = vmatpush.bf16.msrb.mxu1 %v2542_v5 }
  0xe7   : > { %1326 = vmatpush.bf16.msrb.mxu0 %v2595_v17 }
  0xe9   : > { %1604 = vmatpush.bf16.msrb.mxu3 %v2542_v5  ;;  %1380 = vmatpush.bf16.msrb.mxu2 %v2595_v17 }
  0xea   : > { %1327 = vmatmul.bf16.vlgmr.msrb.gmra.mxu0 %v1313_v58  ;;  %1551 = vmatpush.bf16.msrb.mxu1 %v2552_v8  ;;  %v1582_v58 = vunpack.c.l.b16 %v1578_v53 }
  0xeb   : > { %1427 = vmatpush.bf16.msra.mxu0 %v2527_v2 }
  0xec   : > { %1381 = vmatmul.bf16.vlgmr.msrb.gmra.mxu2 %v1367_v62  ;;  %v2123_v62 = vor.u32 %v2173_v61, %v2122_v60  ;;  %v1583_v21 = vpack.c.b16 %v1582_v58, %v1581_v57  ;;  %v1689_v58 = vunpack.c.l.b16 %v1685_v42 }
  0xed   : > { %1481 = vmatpush.bf16.msra.mxu2 %v2527_v2  ;;  %1605 = vmatpush.bf16.msrb.mxu3 %v2552_v8 }
  0xee   : > { %1552 = vmatpush.bf16.msrb.mxu1 %v2560_v10 }
  0xef   : > { %1428 = vmatpush.bf16.msra.mxu0 %v2536_v4 }
  0xf1   : > { %1482 = vmatpush.bf16.msra.mxu2 %v2536_v4  ;;  %1606 = vmatpush.bf16.msrb.mxu3 %v2560_v10 }
  0xf2   : > { %1553 = vmatpush.bf16.msrb.mxu1 %v2570_v12 }
  0xf3   : > { %1429 = vmatpush.bf16.msra.mxu0 %v2545_v6 }
  0xf5   : > { %1483 = vmatpush.bf16.msra.mxu2 %v2545_v6  ;;  %1607 = vmatpush.bf16.msrb.mxu3 %v2570_v12 }
  0xf6   : > { %1554 = vmatpush.bf16.msrb.mxu1 %v2582_v14 }
  0xf7   : > { %1430 = vmatpush.bf16.msra.mxu0 %v2555_v9 }
  0xf9   : > { %1484 = vmatpush.bf16.msra.mxu2 %v2555_v9  ;;  %1608 = vmatpush.bf16.msrb.mxu3 %v2582_v14 }
  0xfa   : > { %1555 = vmatpush.bf16.msrb.mxu1 %v2592_v16 }
  0xfb   : > { %1431 = vmatpush.bf16.msra.mxu0 %v2563_v11 }
  0xfd   : > { %1485 = vmatpush.bf16.msra.mxu2 %v2563_v11  ;;  %1609 = vmatpush.bf16.msrb.mxu3 %v2592_v16 }
  0xfe   : > { %1556 = vmatpush.bf16.msrb.mxu1 %v2600_v18 }
  0xff   : > { %1432 = vmatpush.bf16.msra.mxu0 %v2573_v13 }
 0x101   : > { %1486 = vmatpush.bf16.msra.mxu2 %v2573_v13  ;;  %1610 = vmatpush.bf16.msrb.mxu3 %v2600_v18 }
 0x102   : > { %1657 = vmatpush.bf16.msra.mxu1 %v2533_v3 }
 0x103   : > { %1433 = vmatpush.bf16.msra.mxu0 %v2585_v15  ;;  %1557 = vmatmul.bf16.vlgmr.msrb.gmra.mxu1 %v2115_v36 }
 0x104   : > { %1611 = vmatmul.bf16.vlgmr.msrb.gmra.mxu3 %v2119_v40  ;;  %v1126_v40 = vpop.f32.mrf.mxu1 }
 0x105   : > { %1487 = vmatpush.bf16.msra.mxu2 %v2585_v15  ;;  %1711 = vmatpush.bf16.msra.mxu3 %v2533_v3 }
 0x106   : > { %1658 = vmatpush.bf16.msra.mxu1 %v2542_v5 }
 0x107   : > { %1434 = vmatpush.bf16.msra.mxu0 %v2595_v17 }
 0x109   : > { %1488 = vmatpush.bf16.msra.mxu2 %v2595_v17  ;;  %1712 = vmatpush.bf16.msra.mxu3 %v2542_v5 }
 0x10a   : > { %1435 = vmatmul.bf16.vlgmr.msra.gmra.mxu0 %v1421_v37  ;;  %1659 = vmatpush.bf16.msra.mxu1 %v2552_v8  ;;  %v1631_v37 = vpack.c.bf16 %v2820_v48, %v2820_v48  ;;  %v2132_v48 = vld [vmem:[%s2342_s8 + $0x78] sm:$0xf0] }
 0x10b   : > { %1535 = vmatpush.bf16.msrb.mxu0 %v2527_v2  ;;  %v2135_v57 = vor.u32 %v2166_v47, %v2132_v48 }
 0x10c   : > { %1489 = vmatmul.bf16.vlgmr.msra.gmra.mxu2 %v1475_v41  ;;  %v1635_v49 = vunpack.c.l.b16 %v1631_v37 }
 0x10d   : > { %1589 = vmatpush.bf16.msrb.mxu2 %v2527_v2  ;;  %1713 = vmatpush.bf16.msra.mxu3 %v2552_v8 }
 0x10e   : > { %1660 = vmatpush.bf16.msra.mxu1 %v2560_v10  ;;  %v1637_v29 = vpack.c.b16 %v1636_v51, %v1635_v49 }
 0x10f   : > { %1536 = vmatpush.bf16.msrb.mxu0 %v2536_v4 }
 0x111   : > { %1590 = vmatpush.bf16.msrb.mxu2 %v2536_v4  ;;  %1714 = vmatpush.bf16.msra.mxu3 %v2560_v10 }
 0x112   : > { %1661 = vmatpush.bf16.msra.mxu1 %v2570_v12 }
 0x113   : > { %1537 = vmatpush.bf16.msrb.mxu0 %v2545_v6 }
 0x115   : > { %1591 = vmatpush.bf16.msrb.mxu2 %v2545_v6  ;;  %1715 = vmatpush.bf16.msra.mxu3 %v2570_v12 }
 0x116   : > { %1662 = vmatpush.bf16.msra.mxu1 %v2582_v14 }
 0x117   : > { %1538 = vmatpush.bf16.msrb.mxu0 %v2555_v9 }
 0x119   : > { %1592 = vmatpush.bf16.msrb.mxu2 %v2555_v9  ;;  %1716 = vmatpush.bf16.msra.mxu3 %v2582_v14 }
 0x11a   : > { %1663 = vmatpush.bf16.msra.mxu1 %v2592_v16 }
 0x11b   : > { %1539 = vmatpush.bf16.msrb.mxu0 %v2563_v11 }
 0x11d   : > { %1593 = vmatpush.bf16.msrb.mxu2 %v2563_v11  ;;  %1717 = vmatpush.bf16.msra.mxu3 %v2592_v16 }
 0x11e   : > { %1664 = vmatpush.bf16.msra.mxu1 %v2600_v18 }
 0x11f   : > { %1540 = vmatpush.bf16.msrb.mxu0 %v2573_v13 }
 0x121   : > { %1594 = vmatpush.bf16.msrb.mxu2 %v2573_v13  ;;  %1718 = vmatpush.bf16.msra.mxu3 %v2600_v18 }
 0x122   : > { %1765 = vmatpush.bf16.msrb.mxu1 %v2533_v3 }
 0x123   : > { %1541 = vmatpush.bf16.msrb.mxu0 %v2585_v15  ;;  %1665 = vmatmul.bf16.vlgmr.msra.gmra.mxu1 %v2123_v62 }
 0x124   : > { %1719 = vmatmul.bf16.vlgmr.msra.gmra.mxu3 %v2127_v20 }
 0x125   : > { %1595 = vmatpush.bf16.msrb.mxu2 %v2585_v15  ;;  %1819 = vmatpush.bf16.msrb.mxu3 %v2533_v3  ;;  %v2861_v3 = vpop.f32.mrf.mxu2 }
 0x126   : > { %1766 = vmatpush.bf16.msrb.mxu1 %v2542_v5 }
 0x127   : > { %1542 = vmatpush.bf16.msrb.mxu0 %v2595_v17  ;;  %v1004_v25 = vpop.f32.mrf.mxu0 }
 0x128   : > { %v1005_v26 = vadd.f32 %v2856_v24, %v1004_v25 }
 0x129   : > { %1596 = vmatpush.bf16.msrb.mxu2 %v2595_v17  ;;  %1820 = vmatpush.bf16.msrb.mxu3 %v2542_v5  ;;  %v1072_v5 = vpop.f32.mrf.mxu3 }
 0x12a   : > { %1543 = vmatmul.bf16.vlgmr.msrb.gmra.mxu0 %v1529_v63  ;;  %1767 = vmatpush.bf16.msrb.mxu1 %v2552_v8  ;;  %v1019_v27 = vadd.f32 %v1018_v22, %v1005_v26  ;;  %v1128_v26 = vpop.f32.mrf.mxu1 }
 0x12b   : > { %1643 = vmatpush.bf16.msra.mxu0 %v2527_v2 }
 0x12c   : > { %1597 = vmatmul.bf16.vlgmr.msrb.gmra.mxu2 %v1583_v21 }
 0x12d   : > { %1697 = vmatpush.bf16.msra.mxu2 %v2527_v2  ;;  %1821 = vmatpush.bf16.msrb.mxu3 %v2552_v8  ;;  %v2881_v8 = vld [vmem:[%s2875_s21] sm:$0xff] }
 0x12e   : > { %1768 = vmatpush.bf16.msrb.mxu1 %v2560_v10 }
 0x12f   : > { %1644 = vmatpush.bf16.msra.mxu0 %v2536_v4  ;;  %v1006_v30 = vpop.f32.mrf.mxu0  ;;  %v1058_v31 = vpop.f32.mrf.mxu2 }
 0x130   : > { %v1007_v32 = vadd.f32 %v2856_v24, %v1006_v30  ;;  %v1059_v33 = vadd.f32 %v2856_v24, %v1058_v31 }
 0x131   : > { %1698 = vmatpush.bf16.msra.mxu2 %v2536_v4  ;;  %1822 = vmatpush.bf16.msrb.mxu3 %v2560_v10  ;;  %v1023_v10 = vadd.f32 %v1019_v27, %v2881_v8  ;;  %v1074_v41 = vpop.f32.mrf.mxu3 }
 0x132   : > { %1769 = vmatpush.bf16.msrb.mxu1 %v2570_v12  ;;  %v1021_v35 = vadd.f32 %v1020_v28, %v1007_v32  ;;  %v1073_v36 = vadd.f32 %v1072_v5, %v1059_v33 }
 0x133   : > { %1645 = vmatpush.bf16.msra.mxu0 %v2545_v6  ;;  %v1025_v45 = vmax.f32 %v1023_v10, 0.0 }
 0x134   : > { %v1077_v39 = vadd.f32 %v1073_v36, %v2881_v8  ;;  %v1024_v63 = vadd.f32 %v1021_v35, %v2908_v52 }
 0x135   : > { %1699 = vmatpush.bf16.msra.mxu2 %v2545_v6  ;;  %1823 = vmatpush.bf16.msrb.mxu3 %v2570_v12  ;;  %v1684_v12 = vsel %vm520_vm15, 0.0, %v2830_v55 }
 0x136   : > { %1770 = vmatpush.bf16.msrb.mxu1 %v2582_v14  ;;  %v1686_v43 = vpack.c.bf16 %v1684_v12, %v1684_v12  ;;  %v1079_v46 = vmax.f32 %v1077_v39, 0.0  ;;  %v1026_v27 = vmax.f32 %v1024_v63, 0.0 }
 0x137   : > { %1646 = vmatpush.bf16.msra.mxu0 %v2555_v9  ;;  %v1060_v50 = vpop.f32.mrf.mxu2 }
 0x138   : > { %v1061_v53 = vadd.f32 %v2856_v24, %v1060_v50  ;;  %v1087_v55 = vadd.f32 %v1079_v46, %v1025_v45  ;;  %v1690_v60 = vunpack.c.l.b16 %v1686_v43  ;;  %v1792_v43 = vsel %vm3070_vm7, 0.0, %v2850_v23 }
 0x139   : > { %1700 = vmatpush.bf16.msra.mxu2 %v2555_v9  ;;  %1824 = vmatpush.bf16.msrb.mxu3 %v2582_v14  ;;  %v1112_v14 = vpop.f32.mrf.mxu0  ;;  %v1180_v20 = vpop.f32.mrf.mxu3  ;;  %v1794_v47 = vpack.c.bf16 %v1792_v43, %v1792_v43 }
 0x13a   : > { %v1113_v44 = vadd.f32 %v2856_v24, %v1112_v14  ;;  %1771 = vmatpush.bf16.msrb.mxu1 %v2592_v16  ;;  %v1075_v61 = vadd.f32 %v1074_v41, %v1061_v53  ;;  %v1691_v21 = vpack.c.b16 %v1690_v60, %v1689_v58 }
 0x13b   : > { %1647 = vmatpush.bf16.msra.mxu0 %v2563_v11  ;;  %v1798_v23 = vunpack.c.l.b16 %v1794_v47 }
 0x13c   : > { %v1127_v62 = vadd.f32 %v1126_v40, %v1113_v44  ;;  %v1078_v19 = vadd.f32 %v1075_v61, %v2908_v52 }
 0x13d   : > { %1701 = vmatpush.bf16.msra.mxu2 %v2563_v11  ;;  %1825 = vmatpush.bf16.msrb.mxu3 %v2592_v16 }
 0x13e   : > { %v1131_v16 = vadd.f32 %v1127_v62, %v2881_v8  ;;  %1772 = vmatpush.bf16.msrb.mxu1 %v2600_v18  ;;  %v1080_v22 = vmax.f32 %v1078_v19, 0.0 }
 0x13f   : > { %1648 = vmatpush.bf16.msra.mxu0 %v2573_v13  ;;  %v1166_v28 = vpop.f32.mrf.mxu2 }
 0x140   : > { %v1133_v25 = vmax.f32 %v1131_v16, 0.0  ;;  %v1088_v32 = vadd.f32 %v1080_v22, %v1026_v27 }
 0x141   : > { %1702 = vmatpush.bf16.msra.mxu2 %v2573_v13  ;;  %1826 = vmatpush.bf16.msrb.mxu3 %v2600_v18  ;;  %v1114_v5 = vpop.f32.mrf.mxu0  ;;  %v1167_v18 = vadd.f32 %v2856_v24, %v1166_v28  ;;  %v1182_v12 = vpop.f32.mrf.mxu3 }
 0x142   : > { %1773 = vmatmul.bf16.vlgmr.msrb.gmra.mxu1 %v2131_v0  ;;  %v1141_v30 = vadd.f32 %v1133_v25, %v1087_v55  ;;  %v1115_v31 = vadd.f32 %v2856_v24, %v1114_v5 }
 0x143   : > { %1649 = vmatpush.bf16.msra.mxu0 %v2585_v15  ;;  %v1181_v34 = vadd.f32 %v1180_v20, %v1167_v18 }
 0x144   : > { %1827 = vmatmul.bf16.vlgmr.msrb.gmra.mxu3 %v2135_v57  ;;  %v1129_v33 = vadd.f32 %v1128_v26, %v1115_v31 }
 0x145   : > { %1703 = vmatpush.bf16.msra.mxu2 %v2585_v15  ;;  %v1185_v10 = vadd.f32 %v1181_v34, %v2881_v8 }
 0x147   : > { %1650 = vmatpush.bf16.msra.mxu0 %v2595_v17  ;;  %v1187_v36 = vmax.f32 %v1185_v10, 0.0  ;;  %v1168_v37 = vpop.f32.mrf.mxu2 }
 0x148   : > { %v1169_v40 = vadd.f32 %v2856_v24, %v1168_v37 }
 0x149   : > { %1704 = vmatpush.bf16.msra.mxu2 %v2595_v17  ;;  %v2933_v39 = vadd.f32 %v1187_v36, %v1141_v30  ;;  %v1220_v50 = vpop.f32.mrf.mxu0 }
 0x14a   : > { %1651 = vmatmul.bf16.vlgmr.msra.gmra.mxu0 %v1637_v29  ;;  %v1221_v30 = vadd.f32 %v2856_v24, %v1220_v50 }
 0x14b   : > { %1751 = vmatpush.bf16.msrb.mxu0 %v2527_v2 }
 0x14c   : > { %1705 = vmatmul.bf16.vlgmr.msra.gmra.mxu2 %v1691_v21 }
 0x14d   : > { %1805 = vmatpush.bf16.msrb.mxu2 %v2527_v2  ;;  %v1132_v2 = vadd.f32 %v1129_v33, %v2908_v52 }
 0x14f   : > { %1752 = vmatpush.bf16.msrb.mxu0 %v2536_v4  ;;  %v1134_v35 = vmax.f32 %v1132_v2, 0.0  ;;  %v1274_v14 = vpop.f32.mrf.mxu2 }
 0x150   : > { %v1275_v31 = vadd.f32 %v2856_v24, %v1274_v14 }
 0x151   : > { %1806 = vmatpush.bf16.msrb.mxu2 %v2536_v4  ;;  %v1142_v38 = vadd.f32 %v1134_v35, %v1088_v32  ;;  %v1183_v4 = vadd.f32 %v1182_v12, %v1169_v40  ;;  %v1222_v53 = vpop.f32.mrf.mxu0 }
 0x152   : > { %v1223_v2 = vadd.f32 %v2856_v24, %v1222_v53 }
 0x153   : > { %1753 = vmatpush.bf16.msrb.mxu0 %v2545_v6  ;;  %v1186_v41 = vadd.f32 %v1183_v4, %v2908_v52 }
 0x155   : > { %1807 = vmatpush.bf16.msrb.mxu2 %v2545_v6  ;;  %v1738_v6 = vsel %vm534_vm9, 0.0, %v2861_v3  ;;  %v1188_v42 = vmax.f32 %v1186_v41, 0.0  ;;  %v1793_v3 = vpack.c.bf16 %v2828_v54, %v2828_v54  ;;  %v1288_v54 = vpop.f32.mrf.mxu3 }
 0x156   : > { %v1740_v46 = vpack.c.bf16 %v1738_v6, %v1738_v6  ;;  %v1289_v36 = vadd.f32 %v1288_v54, %v1275_v31 }
 0x157   : > { %1754 = vmatpush.bf16.msrb.mxu0 %v2555_v9  ;;  %v2947_v45 = vadd.f32 %v1188_v42, %v1142_v38  ;;  %v1797_v7 = vunpack.c.l.b16 %v1793_v3  ;;  %v1276_v1 = vpop.f32.mrf.mxu2 }
 0x158   : > { %v1744_v48 = vunpack.c.l.b16 %v1740_v46  ;;  %v1293_v41 = vadd.f32 %v1289_v36, %v2881_v8  ;;  %v1277_v6 = vadd.f32 %v2856_v24, %v1276_v1 }
 0x159   : > { %1808 = vmatpush.bf16.msrb.mxu2 %v2555_v9  ;;  %v1739_v9 = vpack.c.bf16 %v2837_v59, %v2837_v59  ;;  %v1799_v59 = vpack.c.b16 %v1798_v23, %v1797_v7 }
 0x15b   : > { %1755 = vmatpush.bf16.msrb.mxu0 %v2563_v11 }
 0x15d   : > { %1809 = vmatpush.bf16.msrb.mxu2 %v2563_v11  ;;  %v1743_v11 = vunpack.c.l.b16 %v1739_v9  ;;  %v1290_v44 = vpop.f32.mrf.mxu3 }
 0x15f   : > { %1756 = vmatpush.bf16.msrb.mxu0 %v2573_v13  ;;  %v1745_v49 = vpack.c.b16 %v1744_v48, %v1743_v11 }
 0x161   : > { %1810 = vmatpush.bf16.msrb.mxu2 %v2573_v13  ;;  %v1234_v13 = vpop.f32.mrf.mxu1 }
 0x162   : > { %v1235_v18 = vadd.f32 %v1234_v13, %v1221_v30 }
 0x163   : > { %1757 = vmatpush.bf16.msrb.mxu0 %v2585_v15 }
 0x164   : > { %v1239_v12 = vadd.f32 %v1235_v18, %v2881_v8 }
 0x165   : > { %1811 = vmatpush.bf16.msrb.mxu2 %v2585_v15  ;;  %v1396_v56 = vpop.f32.mrf.mxu3 }
 0x166   : > { %v1241_v9 = vmax.f32 %v1239_v12, 0.0 }
 0x167   : > { %1758 = vmatpush.bf16.msrb.mxu0 %v2595_v17  ;;  %v1328_v15 = vpop.f32.mrf.mxu0 }
 0x168   : > { %v1329_v32 = vadd.f32 %v2856_v24, %v1328_v15 }
 0x169   : > { %1812 = vmatpush.bf16.msrb.mxu2 %v2595_v17  ;;  %v1236_v51 = vpop.f32.mrf.mxu1 }
 0x16a   : > { %1759 = vmatmul.bf16.vlgmr.msrb.gmra.mxu0 %v1745_v49  ;;  %v1237_v4 = vadd.f32 %v1236_v51, %v1223_v2  ;;  %v1295_v49 = vmax.f32 %v1293_v41, 0.0 }
 0x16c   : > { %1813 = vmatmul.bf16.vlgmr.msrb.gmra.mxu2 %v1799_v59  ;;  %v1240_v48 = vadd.f32 %v1237_v4, %v2908_v52  ;;  %v1291_v59 = vadd.f32 %v1290_v44, %v1277_v6 }
 0x16d   : > { %v1398_v61 = vpop.f32.mrf.mxu3 }
 0x16f   : > { %v1382_v57 = vpop.f32.mrf.mxu2  ;;  %v1330_v60 = vpop.f32.mrf.mxu0 }
 0x170   : > { %v1383_v37 = vadd.f32 %v2856_v24, %v1382_v57  ;;  %v1331_v3 = vadd.f32 %v2856_v24, %v1330_v60  ;;  %v1242_v57 = vmax.f32 %v1240_v48, 0.0 }
 0x171   : > { %v1342_v55 = vpop.f32.mrf.mxu1 }
 0x172   : > { %v1343_v38 = vadd.f32 %v1342_v55, %v1329_v32  ;;  %v1397_v42 = vadd.f32 %v1396_v56, %v1383_v37  ;;  %v1249_v55 = vadd.f32 %v1241_v9, %v2933_v39 }
 0x174   : > { %v1347_v46 = vadd.f32 %v1343_v38, %v2881_v8  ;;  %v1401_v13 = vadd.f32 %v1397_v42, %v2881_v8 }
 0x175   : > { %v1504_v0 = vpop.f32.mrf.mxu3 }
 0x176   : > { %v1349_v1 = vmax.f32 %v1347_v46, 0.0 }
 0x177   : > { %v1384_v17 = vpop.f32.mrf.mxu2 }
 0x178   : > { %v1385_v50 = vadd.f32 %v2856_v24, %v1384_v17  ;;  %v1294_v17 = vadd.f32 %v1291_v59, %v2908_v52 }
 0x179   : > { %v1344_v58 = vpop.f32.mrf.mxu1 }
 0x17a   : > { %v1345_v15 = vadd.f32 %v1344_v58, %v1331_v3 }
 0x17c   : > { %v1348_v58 = vadd.f32 %v1345_v15, %v2908_v52 }
 0x17d   : > { %v2961_v20 = vpop.f32.mrf.mxu3 }
 0x17e   : > { %v1350_v6 = vmax.f32 %v1348_v58, 0.0 }
 0x181   : > { %v1450_v62 = vpop.f32.mrf.mxu1 }
 0x187   : > { %v1436_v63 = vpop.f32.mrf.mxu0  ;;  %v1612_v26 = vpop.f32.mrf.mxu3 }
 0x188   : > { %v1437_v40 = vadd.f32 %v2856_v24, %v1436_v63  ;;  %v1303_v63 = vadd.f32 %v1295_v49, %v1249_v55 }
 0x189   : > { %v2959_v19 = vpop.f32.mrf.mxu1 }
 0x18a   : > { %v1451_v47 = vadd.f32 %v1450_v62, %v1437_v40  ;;  %v1357_v30 = vadd.f32 %v1349_v1, %v1303_v63 }
 0x18c   : > { %v1455_v56 = vadd.f32 %v1451_v47, %v2881_v8 }
 0x18e   : > { %v1457_v31 = vmax.f32 %v1455_v56, 0.0 }
 0x18f   : > { %v1490_v29 = vpop.f32.mrf.mxu2  ;;  %v1438_v16 = vpop.f32.mrf.mxu0 }
 0x190   : > { %v2968_v33 = vpop.f32.mrf.mxu3  ;;  %v1491_v43 = vadd.f32 %v2856_v24, %v1490_v29  ;;  %v1439_v60 = vadd.f32 %v2856_v24, %v1438_v16  ;;  %v1403_v29 = vmax.f32 %v1401_v13, 0.0 }
 0x191   : > { %v1558_v21 = vpop.f32.mrf.mxu1 }
 0x192   : > { %v1505_v14 = vadd.f32 %v1504_v0, %v1491_v43  ;;  %v1399_v0 = vadd.f32 %v1398_v61, %v1385_v50  ;;  %v1453_v16 = vadd.f32 %v2959_v19, %v1439_v60  ;;  %v1250_v61 = vadd.f32 %v1242_v57, %v2947_v45 }
 0x193   : > { %v1411_v36 = vadd.f32 %v1403_v29, %v1357_v30 }
 0x194   : > { %v1456_v42 = vadd.f32 %v1453_v16, %v2908_v52 }
 0x196   : > { %v1458_v50 = vmax.f32 %v1456_v42, 0.0 }
 0x197   : > { %v1492_v22 = vpop.f32.mrf.mxu2 }
 0x199   : > { %v2963_v5 = vpop.f32.mrf.mxu1 }
 0x1a1   : > { %v1666_v34 = vpop.f32.mrf.mxu1 }
 0x1a7   : > { %v1544_v25 = vpop.f32.mrf.mxu0  ;;  %v1720_v11 = vpop.f32.mrf.mxu3 }
 0x1a8   : > { %v1545_v7 = vadd.f32 %v2856_v24, %v1544_v25  ;;  %v1509_v25 = vadd.f32 %v1505_v14, %v2881_v8 }
 0x1a9   : > { %v1668_v54 = vpop.f32.mrf.mxu1 }
 0x1aa   : > { %v1559_v62 = vadd.f32 %v1558_v21, %v1545_v7  ;;  %v1511_v12 = vmax.f32 %v1509_v25, 0.0 }
 0x1ac   : > { %v1563_v21 = vadd.f32 %v1559_v62, %v2881_v8 }
 0x1ae   : > { %v1565_v43 = vmax.f32 %v1563_v21, 0.0 }
 0x1af   : > { %v1598_v27 = vpop.f32.mrf.mxu2  ;;  %v1546_v28 = vpop.f32.mrf.mxu0 }
 0x1b0   : > { %v1599_v51 = vadd.f32 %v2856_v24, %v1598_v27  ;;  %v1493_v27 = vadd.f32 %v2856_v24, %v1492_v22  ;;  %v1547_v32 = vadd.f32 %v2856_v24, %v1546_v28  ;;  %v1402_v22 = vadd.f32 %v1399_v0, %v2908_v52 }
 0x1b1   : > { %v1465_v28 = vadd.f32 %v1457_v31, %v1411_v36 }
 0x1b2   : > { %v1613_v39 = vadd.f32 %v1612_v26, %v1599_v51  ;;  %v1722_v26 = vpop.f32.mrf.mxu3  ;;  %v1507_v38 = vadd.f32 %v2961_v20, %v1493_v27  ;;  %v1561_v9 = vadd.f32 %v2963_v5, %v1547_v32  ;;  %v1404_v20 = vmax.f32 %v1402_v22, 0.0 }
 0x1b4   : > { %v1617_v40 = vadd.f32 %v1613_v39, %v2881_v8  ;;  %v1510_v7 = vadd.f32 %v1507_v38, %v2908_v52  ;;  %v1564_v14 = vadd.f32 %v1561_v9, %v2908_v52 }
 0x1b6   : > { %v1512_v56 = vmax.f32 %v1510_v7, 0.0  ;;  %v1566_v25 = vmax.f32 %v1564_v14, 0.0 }
 0x1b7   : > { %v1600_v10 = vpop.f32.mrf.mxu2 }
 0x1b8   : > { %v1601_v19 = vadd.f32 %v2856_v24, %v1600_v10  ;;  %v1519_v10 = vadd.f32 %v1511_v12, %v1465_v28 }
 0x1ba   : > { %v1573_v5 = vadd.f32 %v1565_v43, %v1519_v10 }
 0x1bf   : > { %v1774_v37 = vpop.f32.mrf.mxu1 }
 0x1c7   : > { %v1652_v35 = vpop.f32.mrf.mxu0  ;;  %v1828_v1 = vpop.f32.mrf.mxu3 }
 0x1c8   : > { %v1653_v44 = vadd.f32 %v2856_v24, %v1652_v35  ;;  %v1296_v35 = vmax.f32 %v1294_v17, 0.0 }
 0x1ca   : > { %v1667_v2 = vadd.f32 %v1666_v34, %v1653_v44  ;;  %v1304_v3 = vadd.f32 %v1296_v35, %v1250_v61 }
 0x1cc   : > { %v1671_v46 = vadd.f32 %v1667_v2, %v2881_v8  ;;  %v1358_v49 = vadd.f32 %v1350_v6, %v1304_v3 }
 0x1ce   : > { %v1673_v51 = vmax.f32 %v1671_v46, 0.0  ;;  %v1412_v15 = vadd.f32 %v1404_v20, %v1358_v49 }
 0x1cf   : > { %v1706_v23 = vpop.f32.mrf.mxu2  ;;  %v1654_v53 = vpop.f32.mrf.mxu0 }
 0x1d0   : > { %v1707_v18 = vadd.f32 %v2856_v24, %v1706_v23  ;;  %v1655_v47 = vadd.f32 %v2856_v24, %v1654_v53  ;;  %v1619_v23 = vmax.f32 %v1617_v40, 0.0  ;;  %v1466_v0 = vadd.f32 %v1458_v50, %v1412_v15 }
 0x1d2   : > { %v1721_v34 = vadd.f32 %v1720_v11, %v1707_v18  ;;  %v1615_v11 = vadd.f32 %v2968_v33, %v1601_v19  ;;  %v1669_v55 = vadd.f32 %v1668_v54, %v1655_v47  ;;  %v1627_v57 = vadd.f32 %v1619_v23, %v1573_v5  ;;  %v1776_v54 = vpop.f32.mrf.mxu1 }
 0x1d3   : > { %v1520_v18 = vadd.f32 %v1512_v56, %v1466_v0 }
 0x1d4   : > { %v1725_v59 = vadd.f32 %v1721_v34, %v2881_v8  ;;  %v1618_v60 = vadd.f32 %v1615_v11, %v2908_v52  ;;  %v1681_v27 = vadd.f32 %v1673_v51, %v1627_v57  ;;  %v1672_v39 = vadd.f32 %v1669_v55, %v2908_v52 }
 0x1d5   : > { %v1574_v61 = vadd.f32 %v1566_v25, %v1520_v18 }
 0x1d6   : > { %v1727_v44 = vmax.f32 %v1725_v59, 0.0  ;;  %v1620_v16 = vmax.f32 %v1618_v60, 0.0  ;;  %v1674_v35 = vmax.f32 %v1672_v39, 0.0 }
 0x1d7   : > { %v1708_v4 = vpop.f32.mrf.mxu2 }
 0x1d8   : > { %v1709_v13 = vadd.f32 %v2856_v24, %v1708_v4  ;;  %v1735_v21 = vadd.f32 %v1727_v44, %v1681_v27  ;;  %v1628_v12 = vadd.f32 %v1620_v16, %v1574_v61  ;;  %v1830_v4 = vpop.f32.mrf.mxu3 }
 0x1da   : > { %v1723_v63 = vadd.f32 %v1722_v26, %v1709_v13 }
 0x1dc   : > { %v1726_v32 = vadd.f32 %v1723_v63, %v2908_v52 }
 0x1de   : > { %v1728_v38 = vmax.f32 %v1726_v32, 0.0 }
 0x1e7   : > { %v1760_v41 = vpop.f32.mrf.mxu0 }
 0x1e8   : > { %v1761_v45 = vadd.f32 %v2856_v24, %v1760_v41  ;;  %v1682_v41 = vadd.f32 %v1674_v35, %v1628_v12 }
 0x1ea   : > { %v1775_v48 = vadd.f32 %v1774_v37, %v1761_v45  ;;  %v1736_v28 = vadd.f32 %v1728_v38, %v1682_v41 }
 0x1ec   : > { %v1779_v53 = vadd.f32 %v1775_v48, %v2881_v8 }
 0x1ee   : > { %v1781_v30 = vmax.f32 %v1779_v53, 0.0 }
 0x1ef   : > { %v1762_v33 = vpop.f32.mrf.mxu0  ;;  %v1814_v62 = vpop.f32.mrf.mxu2 }
 0x1f0   : > { %v1763_v17 = vadd.f32 %v2856_v24, %v1762_v33  ;;  %v1815_v29 = vadd.f32 %v2856_v24, %v1814_v62  ;;  %v1789_v36 = vadd.f32 %v1781_v30, %v1735_v21 }
 0x1f2   : > { %v1777_v58 = vadd.f32 %v1776_v54, %v1763_v17  ;;  %v1829_v31 = vadd.f32 %v1828_v1, %v1815_v29 }
 0x1f4   : > { %v1833_v2 = vadd.f32 %v1829_v31, %v2881_v8  ;;  %v1780_v22 = vadd.f32 %v1777_v58, %v2908_v52 }
 0x1f6   : > { %v1835_v26 = vmax.f32 %v1833_v2, 0.0  ;;  %v1782_v8 = vmax.f32 %v1780_v22, 0.0 }
 0x1f7   : > { %v1816_v37 = vpop.f32.mrf.mxu2 }
 0x1f8   : > { %v1843_v40 = vadd.f32 %v1835_v26, %v1789_v36  ;;  %v1817_v19 = vadd.f32 %v2856_v24, %v1816_v37  ;;  %v1790_v45 = vadd.f32 %v1782_v8, %v1736_v28 }
 0x1fa   : > { %1845 = vst [vmem:[%s319_s25] sm:$0xff] %v1843_v40  ;;  %v1831_v6 = vadd.f32 %v1830_v4, %v1817_v19 }
 0x1fc   : > { %v1834_v34 = vadd.f32 %v1831_v6, %v2908_v52 }
 0x1fe   : > { %v1836_v42 = vmax.f32 %v1834_v34, 0.0 }
 0x200   : > { %v1844_v43 = vadd.f32 %v1836_v42, %v1790_v45 }
 0x202   : > { %1846 = vst [vmem:[%s319_s25 + $0x8] sm:$0xff] %v1844_v43 }
 0x203 PF: > { %s16_s20 = sadd.s32 1, %s2270_s20   ;;  %s3071_s18 = smov %s2266_s19 }
 0x204   : > { %p13_p8 = scmp.ge.s32.totalorder %s16_s20, 4   ;;  %s3072_s19 = smov %s3074_s22 }
 0x206   :  { %15 = sbr.rel (!%p13_p8) target bundleno = 2 (0x2), region = 81 }
 0x20b   :  { %1876 = vsyncpa [#allocation3], 1 }
 0x20c   :  { %1878 = vsyncpa [#allocation3 + $0x1], 1 }

</bundles_post_ra>
